<compile_context>
chip_gen: v7x
topology: tpu7x:2x2x1
jax: 0.10.0
libtpu: 0.0.40
codegen_flags: <defaults>
</compile_context>

<pallas_src>
import functools

import jax
import jax.numpy as jnp
from jax.experimental import pallas as pl
from jax.experimental.pallas import tpu as pltpu


# ----------------------------------------------------------------------------
# Fused kernel: channel attention -> (max, mean) maps -> padded scratch ->
#               7x7 conv -> BN(eval) -> ReLU -> sigmoid
# ----------------------------------------------------------------------------
def _cbam_fused_kernel(x_ref, w1_ref, w2_ref, cwgt_ref, bn_ref, out_ref,
                       pad_scr, *, ksize, pad):
    # x_ref:    (C, H, W)       VMEM
    # w1_ref:   (inter, C)      VMEM      w2_ref: (C, inter)  VMEM
    # cwgt_ref: (2*k*k,)        SMEM      bn_ref: (2,)        SMEM
    # out_ref:  (1, H, W)       VMEM
    # pad_scr:  (2, H+2p, W+2p) VMEM scratch
    C, H, W = x_ref.shape
    Hp = H + 2 * pad
    Wp = W + 2 * pad
    inv_hw = 1.0 / float(H * W)
    inv_c = 1.0 / float(C)

    x = x_ref[...]  # (C, H, W) f32

    # ---- channel attention: adaptive max / avg pool over HxW (vectorized) ---
    pm3 = jnp.max(jnp.max(x, axis=2, keepdims=True), axis=1, keepdims=True)
    pa3 = jnp.sum(jnp.sum(x, axis=2, keepdims=True), axis=1, keepdims=True)
    pa3 = pa3 * inv_hw                                          # (C, 1, 1) each

    # Pack the per-channel scalars into a (C, 2) matrix (channels on sublanes)
    # so both MLP branches run as ONE 2-column matmul.  Only scalar-sized
    # concatenations here (cheap at small C).
    pm2 = jnp.concatenate([pm3[c] for c in range(C)], axis=0)   # (C, 1)
    pa2 = jnp.concatenate([pa3[c] for c in range(C)], axis=0)   # (C, 1)
    pooled = jnp.concatenate([pm2, pa2], axis=1)                # (C, 2)

    w1 = w1_ref[...]  # (inter, C)
    w2 = w2_ref[...]  # (C, inter)
    h = jnp.maximum(jnp.dot(w1, pooled, preferred_element_type=jnp.float32),
                    0.0)                                         # (inter, 2)
    y = jnp.dot(w2, h, preferred_element_type=jnp.float32)       # (C, 2)
    cw = jax.nn.sigmoid(jnp.sum(y, axis=1, keepdims=True))       # (C, 1)

    # Back to one-(1,1)-tile-per-channel form, then rescale the whole block
    # with a single broadcast multiply and reduce over the channel axis.
    cw3 = jnp.concatenate([cw[c:c + 1, :][None, :, :] for c in range(C)],
                          axis=0)                                # (C, 1, 1)
    scaled = x * cw3                                             # (C, H, W)
    m = jnp.max(scaled, axis=0)                                  # (H, W) max
    s = jnp.sum(scaled, axis=0) * inv_c                          # (H, W) mean

    # ---- zero-padded (2, Hp, Wp) intermediate kept entirely in VMEM ---------
    pad_scr[...] = jnp.zeros((2, Hp, Wp), jnp.float32)
    pad_scr[0, pad:pad + H, pad:pad + W] = m
    pad_scr[1, pad:pad + H, pad:pad + W] = s

    # ---- 7x7 conv (2 -> 1, no bias): lane (kw) shift hoisted out of kh loop,
    #      two partial accumulators to break the serial add chain -------------
    acc0 = jnp.zeros((H, W), jnp.float32)
    acc1 = jnp.zeros((H, W), jnp.float32)
    for ci in range(2):
        for kw in range(ksize):
            col = pad_scr[ci, :, kw:kw + W]          # (Hp, W): one lane shift
            for kh in range(ksize):
                wgt = cwgt_ref[ci * ksize * ksize + kh * ksize + kw]  # SMEM
                tap = wgt * col[kh:kh + H, :]
                if kh % 2 == 0:
                    acc0 = acc0 + tap
                else:
                    acc1 = acc1 + tap
    acc = acc0 + acc1

    ybn = acc * bn_ref[0] + bn_ref[1]    # folded BatchNorm (eval mode)
    ybn = jnp.maximum(ybn, 0.0)          # ReLU
    out_ref[0] = jax.nn.sigmoid(ybn)     # spatial weight


# ----------------------------------------------------------------------------
# Wrapper
# ----------------------------------------------------------------------------
def cbam_pallas(x, w1, w2, conv_w, gamma, beta, running_mean, running_var,
                *, ksize=7, eps=1e-5):
    B, C, H, W = x.shape
    inter = w1.shape[0]
    pad = ksize // 2
    Hp, Wp = H + 2 * pad, W + 2 * pad

    # Glue: flatten conv weights and fold BN (eval) into scale/shift scalars.
    conv_flat = conv_w.reshape(-1).astype(jnp.float32)               # (2*k*k,)
    scale = gamma / jnp.sqrt(running_var + eps)
    shift = beta - running_mean * scale
    # Conv has exactly 1 output channel, so scale[0]/shift[0] is the whole BN.
    bn_params = jnp.stack([scale[0], shift[0]]).astype(jnp.float32)  # (2,)

    return pl.pallas_call(
        functools.partial(_cbam_fused_kernel, ksize=ksize, pad=pad),
        out_shape=jax.ShapeDtypeStruct((B, 1, H, W), jnp.float32),
        grid=(B,),
        in_specs=[
            pl.BlockSpec((None, C, H, W), lambda b: (b, 0, 0, 0)),
            pl.BlockSpec((inter, C), lambda b: (0, 0)),
            pl.BlockSpec((C, inter), lambda b: (0, 0)),
            pl.BlockSpec(memory_space=pltpu.MemorySpace.SMEM),
            pl.BlockSpec(memory_space=pltpu.MemorySpace.SMEM),
        ],
        out_specs=pl.BlockSpec((None, 1, H, W), lambda b: (b, 0, 0, 0)),
        scratch_shapes=[pltpu.VMEM((2, Hp, Wp), jnp.float32)],
        compiler_params=pltpu.CompilerParams(
            dimension_semantics=("parallel",)),
    )(x.astype(jnp.float32), w1.astype(jnp.float32), w2.astype(jnp.float32),
      conv_flat, bn_params)


# ----------------------------------------------------------------------------
# Pure-JAX reference (same math as the PyTorch module, eval-mode BN)
# ----------------------------------------------------------------------------
def cbam_ref(x, w1, w2, conv_w, gamma, beta, running_mean, running_var,
             *, ksize=7, eps=1e-5):
    pad = ksize // 2
    mx = jnp.max(x, axis=(2, 3))    # (B, C)
    av = jnp.mean(x, axis=(2, 3))   # (B, C)

    def mlp(p):
        return jnp.maximum(p @ w1.T, 0.0) @ w2.T

    cw = jax.nn.sigmoid(mlp(mx) + mlp(av))              # (B, C)
    ch = cw[:, :, None, None] * x                       # (B, C, H, W)
    max_out = jnp.max(ch, axis=1, keepdims=True)
    mean_out = jnp.mean(ch, axis=1, keepdims=True)
    out = jnp.concatenate([max_out, mean_out], axis=1)  # (B, 2, H, W)
    conv = jax.lax.conv_general_dilated(
        out, conv_w, window_strides=(1, 1), padding=[(pad, pad), (pad, pad)],
        dimension_numbers=("NCHW", "OIHW", "NCHW"))
    scale = gamma / jnp.sqrt(running_var + eps)
    shift = beta - running_mean * scale
    y = conv * scale[None, :, None, None] + shift[None, :, None, None]
    y = jnp.maximum(y, 0.0)
    return jax.nn.sigmoid(y)


if __name__ == "__main__":
    B, C, H, W = 2, 4, 16, 16
    ksize = 7
    inter = C // 2 if C <= 320 else C // 16

    key = jax.random.PRNGKey(0)
    kx, k1, k2, k3 = jax.random.split(key, 4)

    x = jax.random.normal(kx, (B, C, H, W), jnp.float32)

    # Deterministic parameter init (Kaiming-uniform-like bounds, like PyTorch).
    b1 = 1.0 / (C ** 0.5)
    w1 = jax.random.uniform(k1, (inter, C), jnp.float32, -b1, b1)   # Linear(C->inter)
    b2 = 1.0 / (inter ** 0.5)
    w2 = jax.random.uniform(k2, (C, inter), jnp.float32, -b2, b2)   # Linear(inter->C)
    bc = 1.0 / ((2 * ksize * ksize) ** 0.5)
    conv_w = jax.random.uniform(k3, (1, 2, ksize, ksize), jnp.float32, -bc, bc)
    gamma = jnp.ones((1,), jnp.float32)
    beta = jnp.zeros((1,), jnp.float32)
    running_mean = jnp.zeros((1,), jnp.float32)
    running_var = jnp.ones((1,), jnp.float32)

    out = cbam_pallas(x, w1, w2, conv_w, gamma, beta, running_mean, running_var,
                      ksize=ksize)
    out = jax.block_until_ready(out)

    ref = cbam_ref(x, w1, w2, conv_w, gamma, beta, running_mean, running_var,
                   ksize=ksize)
    assert out.shape == (B, 1, H, W), out.shape
    max_err = float(jnp.max(jnp.abs(out - ref)))
    if max_err > 1e-3:
        raise AssertionError(f"Pallas CBAM mismatch vs reference: {max_err}")

    print("KERNEL_OK")
</pallas_src>

<mosaic_0001>
module attributes {stable_mosaic.version = 11 : i64} {
  func.func @_cbam_fused_kernel(%arg0: i32, %arg1: memref<1x4x16x16xf32, #tpu.memory_space<vmem>>, %arg2: memref<2x4xf32, #tpu.memory_space<vmem>>, %arg3: memref<4x2xf32, #tpu.memory_space<vmem>>, %arg4: memref<98xf32, #tpu.memory_space<smem>>, %arg5: memref<2xf32, #tpu.memory_space<smem>>, %arg6: memref<1x1x16x16xf32, #tpu.memory_space<vmem>>, %arg7: memref<2x22x22xf32, #tpu.memory_space<vmem>>) attributes {dimension_semantics = [#tpu.dimension_semantics<parallel>], iteration_bounds = array<i64: 2>, scalar_prefetch = 0 : i64, scratch_operands = 1 : i64, tpu.core_type = #tpu.core_type<tc>, window_params = [{transform_indices = @transform_0, window_bounds = array<i64: 1, 4, 16, 16>}, {pipeline_mode = #tpu.pipeline_mode<synchronous>, transform_indices = @transform_1, window_bounds = array<i64: 2, 4>}, {pipeline_mode = #tpu.pipeline_mode<synchronous>, transform_indices = @transform_2, window_bounds = array<i64: 4, 2>}, {transform_indices = @transform_3, window_bounds = array<i64: 98>}, {transform_indices = @transform_4, window_bounds = array<i64: 2>}, {transform_indices = @transform_5, window_bounds = array<i64: 1, 1, 16, 16>}]} {
    %c0 = arith.constant 0 : index
    %c0_0 = arith.constant 0 : index
    %c0_1 = arith.constant 0 : index
    %c0_2 = arith.constant 0 : index
    %0 = vector.load %arg1[%c0, %c0_0, %c0_1, %c0_2] : memref<1x4x16x16xf32, #tpu.memory_space<vmem>>, vector<1x4x16x16xf32>
    %1 = vector.shape_cast %0 : vector<1x4x16x16xf32> to vector<4x16x16xf32>
    %cst = arith.constant dense<0xFF800000> : vector<4x16xf32>
    %2 = vector.multi_reduction <maximumf>, %1, %cst [2] : vector<4x16x16xf32> to vector<4x16xf32>
    %3 = vector.shape_cast %2 : vector<4x16xf32> to vector<4x16x1xf32>
    %cst_3 = arith.constant dense<0xFF800000> : vector<4x1xf32>
    %4 = vector.multi_reduction <maximumf>, %3, %cst_3 [1] : vector<4x16x1xf32> to vector<4x1xf32>
    %5 = vector.shape_cast %4 : vector<4x1xf32> to vector<4x1x1xf32>
    %cst_4 = arith.constant dense<0.000000e+00> : vector<4x16xf32>
    %6 = vector.multi_reduction <add>, %1, %cst_4 [2] : vector<4x16x16xf32> to vector<4x16xf32>
    %7 = vector.shape_cast %6 : vector<4x16xf32> to vector<4x16x1xf32>
    %cst_5 = arith.constant dense<0.000000e+00> : vector<4x1xf32>
    %8 = vector.multi_reduction <add>, %7, %cst_5 [1] : vector<4x16x1xf32> to vector<4x1xf32>
    %9 = vector.shape_cast %8 : vector<4x1xf32> to vector<4x1x1xf32>
    %cst_6 = arith.constant 3.906250e-03 : f32
    %10 = vector.broadcast %cst_6 : f32 to vector<4x1x1xf32>
    %11 = arith.mulf %9, %10 : vector<4x1x1xf32>
    %12 = vector.extract_strided_slice %5 {offsets = [0, 0, 0], sizes = [1, 1, 1], strides = [1, 1, 1]} : vector<4x1x1xf32> to vector<1x1x1xf32>
    %13 = vector.shape_cast %12 : vector<1x1x1xf32> to vector<1x1xf32>
    %14 = vector.extract_strided_slice %5 {offsets = [1, 0, 0], sizes = [1, 1, 1], strides = [1, 1, 1]} : vector<4x1x1xf32> to vector<1x1x1xf32>
    %15 = vector.shape_cast %14 : vector<1x1x1xf32> to vector<1x1xf32>
    %16 = vector.extract_strided_slice %5 {offsets = [2, 0, 0], sizes = [1, 1, 1], strides = [1, 1, 1]} : vector<4x1x1xf32> to vector<1x1x1xf32>
    %17 = vector.shape_cast %16 : vector<1x1x1xf32> to vector<1x1xf32>
    %18 = vector.extract_strided_slice %5 {offsets = [3, 0, 0], sizes = [1, 1, 1], strides = [1, 1, 1]} : vector<4x1x1xf32> to vector<1x1x1xf32>
    %19 = vector.shape_cast %18 : vector<1x1x1xf32> to vector<1x1xf32>
    %20 = tpu.concatenate %13, %15, %17, %19 in 0 : vector<1x1xf32>, vector<1x1xf32>, vector<1x1xf32>, vector<1x1xf32> -> vector<4x1xf32>
    %21 = vector.extract_strided_slice %11 {offsets = [0, 0, 0], sizes = [1, 1, 1], strides = [1, 1, 1]} : vector<4x1x1xf32> to vector<1x1x1xf32>
    %22 = vector.shape_cast %21 : vector<1x1x1xf32> to vector<1x1xf32>
    %23 = vector.extract_strided_slice %11 {offsets = [1, 0, 0], sizes = [1, 1, 1], strides = [1, 1, 1]} : vector<4x1x1xf32> to vector<1x1x1xf32>
    %24 = vector.shape_cast %23 : vector<1x1x1xf32> to vector<1x1xf32>
    %25 = vector.extract_strided_slice %11 {offsets = [2, 0, 0], sizes = [1, 1, 1], strides = [1, 1, 1]} : vector<4x1x1xf32> to vector<1x1x1xf32>
    %26 = vector.shape_cast %25 : vector<1x1x1xf32> to vector<1x1xf32>
    %27 = vector.extract_strided_slice %11 {offsets = [3, 0, 0], sizes = [1, 1, 1], strides = [1, 1, 1]} : vector<4x1x1xf32> to vector<1x1x1xf32>
    %28 = vector.shape_cast %27 : vector<1x1x1xf32> to vector<1x1xf32>
    %29 = tpu.concatenate %22, %24, %26, %28 in 0 : vector<1x1xf32>, vector<1x1xf32>, vector<1x1xf32>, vector<1x1xf32> -> vector<4x1xf32>
    %30 = tpu.concatenate %20, %29 in 1 : vector<4x1xf32>, vector<4x1xf32> -> vector<4x2xf32>
    %c0_7 = arith.constant 0 : index
    %c0_8 = arith.constant 0 : index
    %31 = vector.load %arg2[%c0_7, %c0_8] : memref<2x4xf32, #tpu.memory_space<vmem>>, vector<2x4xf32>
    %c0_9 = arith.constant 0 : index
    %c0_10 = arith.constant 0 : index
    %32 = vector.load %arg3[%c0_9, %c0_10] : memref<4x2xf32, #tpu.memory_space<vmem>>, vector<4x2xf32>
    %cst_11 = arith.constant dense<0.000000e+00> : vector<2x2xf32>
    %33 = tpu.matmul %31, %30, %cst_11 {dimension_numbers = #tpu.dot_dimension_numbers<[1], [0], [0], [1], [0, 0, 1, 1], [], []>} : vector<2x4xf32>, vector<4x2xf32>, vector<2x2xf32> -> vector<2x2xf32>
    %cst_12 = arith.constant 0.000000e+00 : f32
    %34 = vector.broadcast %cst_12 : f32 to vector<2x2xf32>
    %35 = arith.maximumf %33, %34 : vector<2x2xf32>
    %cst_13 = arith.constant dense<0.000000e+00> : vector<4x2xf32>
    %36 = tpu.matmul %32, %35, %cst_13 {dimension_numbers = #tpu.dot_dimension_numbers<[1], [0], [0], [1], [0, 0, 1, 1], [], []>} : vector<4x2xf32>, vector<2x2xf32>, vector<4x2xf32> -> vector<4x2xf32>
    %cst_14 = arith.constant dense<0.000000e+00> : vector<4xf32>
    %37 = vector.multi_reduction <add>, %36, %cst_14 [1] : vector<4x2xf32> to vector<4xf32>
    %38 = vector.shape_cast %37 : vector<4xf32> to vector<4x1xf32>
    %39 = arith.negf %38 : vector<4x1xf32>
    %40 = math.exp %39 : vector<4x1xf32>
    %cst_15 = arith.constant 1.000000e+00 : f32
    %41 = vector.broadcast %cst_15 : f32 to vector<4x1xf32>
    %42 = arith.addf %41, %40 : vector<4x1xf32>
    %43 = arith.divf %41, %42 : vector<4x1xf32>
    %44 = vector.extract_strided_slice %43 {offsets = [0, 0], sizes = [1, 1], strides = [1, 1]} : vector<4x1xf32> to vector<1x1xf32>
    %45 = vector.shape_cast %44 : vector<1x1xf32> to vector<1x1x1xf32>
    %46 = vector.extract_strided_slice %43 {offsets = [1, 0], sizes = [1, 1], strides = [1, 1]} : vector<4x1xf32> to vector<1x1xf32>
    %47 = vector.shape_cast %46 : vector<1x1xf32> to vector<1x1x1xf32>
    %48 = vector.extract_strided_slice %43 {offsets = [2, 0], sizes = [1, 1], strides = [1, 1]} : vector<4x1xf32> to vector<1x1xf32>
    %49 = vector.shape_cast %48 : vector<1x1xf32> to vector<1x1x1xf32>
    %50 = vector.extract_strided_slice %43 {offsets = [3, 0], sizes = [1, 1], strides = [1, 1]} : vector<4x1xf32> to vector<1x1xf32>
    %51 = vector.shape_cast %50 : vector<1x1xf32> to vector<1x1x1xf32>
    %52 = tpu.concatenate %45, %47, %49, %51 in 0 : vector<1x1x1xf32>, vector<1x1x1xf32>, vector<1x1x1xf32>, vector<1x1x1xf32> -> vector<4x1x1xf32>
    %53 = vector.broadcast %52 : vector<4x1x1xf32> to vector<4x16x16xf32>
    %54 = arith.mulf %1, %53 : vector<4x16x16xf32>
    %cst_16 = arith.constant dense<0xFF800000> : vector<16x16xf32>
    %55 = vector.multi_reduction <maximumf>, %54, %cst_16 [0] : vector<4x16x16xf32> to vector<16x16xf32>
    %cst_17 = arith.constant dense<0.000000e+00> : vector<16x16xf32>
    %56 = vector.multi_reduction <add>, %54, %cst_17 [0] : vector<4x16x16xf32> to vector<16x16xf32>
    %cst_18 = arith.constant 2.500000e-01 : f32
    %57 = vector.broadcast %cst_18 : f32 to vector<16x16xf32>
    %58 = arith.mulf %56, %57 : vector<16x16xf32>
    %cst_19 = arith.constant 0.000000e+00 : f32
    %59 = vector.broadcast %cst_19 : f32 to vector<2x22x22xf32>
    %c0_20 = arith.constant 0 : index
    %c0_21 = arith.constant 0 : index
    %c0_22 = arith.constant 0 : index
    %60 = vector.load %arg7[%c0_20, %c0_21, %c0_22] : memref<2x22x22xf32, #tpu.memory_space<vmem>>, vector<2x22x22xf32>
    tpu.vector_store %arg7[%c0_20, %c0_21, %c0_22], %59 {strides = array<i32>} : memref<2x22x22xf32, #tpu.memory_space<vmem>>, vector<2x22x22xf32>,
    %c0_23 = arith.constant 0 : index
    %c3 = arith.constant 3 : index
    %c3_24 = arith.constant 3 : index
    %61 = vector.load %arg7[%c0_23, %c3, %c3_24] : memref<2x22x22xf32, #tpu.memory_space<vmem>>, vector<1x16x16xf32>
    %62 = vector.shape_cast %61 : vector<1x16x16xf32> to vector<16x16xf32>
    %63 = vector.shape_cast %55 : vector<16x16xf32> to vector<1x16x16xf32>
    tpu.vector_store %arg7[%c0_23, %c3, %c3_24], %63 {strides = array<i32>} : memref<2x22x22xf32, #tpu.memory_space<vmem>>, vector<1x16x16xf32>,
    %c1 = arith.constant 1 : index
    %c3_25 = arith.constant 3 : index
    %c3_26 = arith.constant 3 : index
    %64 = vector.load %arg7[%c1, %c3_25, %c3_26] : memref<2x22x22xf32, #tpu.memory_space<vmem>>, vector<1x16x16xf32>
    %65 = vector.shape_cast %64 : vector<1x16x16xf32> to vector<16x16xf32>
    %66 = vector.shape_cast %58 : vector<16x16xf32> to vector<1x16x16xf32>
    tpu.vector_store %arg7[%c1, %c3_25, %c3_26], %66 {strides = array<i32>} : memref<2x22x22xf32, #tpu.memory_space<vmem>>, vector<1x16x16xf32>,
    %cst_27 = arith.constant 0.000000e+00 : f32
    %67 = vector.broadcast %cst_27 : f32 to vector<16x16xf32>
    %cst_28 = arith.constant 0.000000e+00 : f32
    %68 = vector.broadcast %cst_28 : f32 to vector<16x16xf32>
    %c0_29 = arith.constant 0 : index
    %c0_30 = arith.constant 0 : index
    %c0_31 = arith.constant 0 : index
    %69 = vector.load %arg7[%c0_29, %c0_30, %c0_31] : memref<2x22x22xf32, #tpu.memory_space<vmem>>, vector<1x22x16xf32>
    %70 = vector.shape_cast %69 : vector<1x22x16xf32> to vector<22x16xf32>
    %c0_32 = arith.constant 0 : index
    %71 = memref.load %arg4[%c0_32] : memref<98xf32, #tpu.memory_space<smem>>
    %72 = vector.extract_strided_slice %70 {offsets = [0, 0], sizes = [16, 16], strides = [1, 1]} : vector<22x16xf32> to vector<16x16xf32>
    %73 = vector.broadcast %71 : f32 to vector<16x16xf32>
    %74 = arith.mulf %73, %72 : vector<16x16xf32>
    %75 = arith.addf %67, %74 : vector<16x16xf32>
    %c7 = arith.constant 7 : index
    %76 = memref.load %arg4[%c7] : memref<98xf32, #tpu.memory_space<smem>>
    %77 = vector.extract_strided_slice %70 {offsets = [1, 0], sizes = [16, 16], strides = [1, 1]} : vector<22x16xf32> to vector<16x16xf32>
    %78 = vector.broadcast %76 : f32 to vector<16x16xf32>
    %79 = arith.mulf %78, %77 : vector<16x16xf32>
    %80 = arith.addf %68, %79 : vector<16x16xf32>
    %c14 = arith.constant 14 : index
    %81 = memref.load %arg4[%c14] : memref<98xf32, #tpu.memory_space<smem>>
    %82 = vector.extract_strided_slice %70 {offsets = [2, 0], sizes = [16, 16], strides = [1, 1]} : vector<22x16xf32> to vector<16x16xf32>
    %83 = vector.broadcast %81 : f32 to vector<16x16xf32>
    %84 = arith.mulf %83, %82 : vector<16x16xf32>
    %85 = arith.addf %75, %84 : vector<16x16xf32>
    %c21 = arith.constant 21 : index
    %86 = memref.load %arg4[%c21] : memref<98xf32, #tpu.memory_space<smem>>
    %87 = vector.extract_strided_slice %70 {offsets = [3, 0], sizes = [16, 16], strides = [1, 1]} : vector<22x16xf32> to vector<16x16xf32>
    %88 = vector.broadcast %86 : f32 to vector<16x16xf32>
    %89 = arith.mulf %88, %87 : vector<16x16xf32>
    %90 = arith.addf %80, %89 : vector<16x16xf32>
    %c28 = arith.constant 28 : index
    %91 = memref.load %arg4[%c28] : memref<98xf32, #tpu.memory_space<smem>>
    %92 = vector.extract_strided_slice %70 {offsets = [4, 0], sizes = [16, 16], strides = [1, 1]} : vector<22x16xf32> to vector<16x16xf32>
    %93 = vector.broadcast %91 : f32 to vector<16x16xf32>
    %94 = arith.mulf %93, %92 : vector<16x16xf32>
    %95 = arith.addf %85, %94 : vector<16x16xf32>
    %c35 = arith.constant 35 : index
    %96 = memref.load %arg4[%c35] : memref<98xf32, #tpu.memory_space<smem>>
    %97 = vector.extract_strided_slice %70 {offsets = [5, 0], sizes = [16, 16], strides = [1, 1]} : vector<22x16xf32> to vector<16x16xf32>
    %98 = vector.broadcast %96 : f32 to vector<16x16xf32>
    %99 = arith.mulf %98, %97 : vector<16x16xf32>
    %100 = arith.addf %90, %99 : vector<16x16xf32>
    %c42 = arith.constant 42 : index
    %101 = memref.load %arg4[%c42] : memref<98xf32, #tpu.memory_space<smem>>
    %102 = vector.extract_strided_slice %70 {offsets = [6, 0], sizes = [16, 16], strides = [1, 1]} : vector<22x16xf32> to vector<16x16xf32>
    %103 = vector.broadcast %101 : f32 to vector<16x16xf32>
    %104 = arith.mulf %103, %102 : vector<16x16xf32>
    %105 = arith.addf %95, %104 : vector<16x16xf32>
    %c0_33 = arith.constant 0 : index
    %c0_34 = arith.constant 0 : index
    %c1_35 = arith.constant 1 : index
    %106 = vector.load %arg7[%c0_33, %c0_34, %c1_35] : memref<2x22x22xf32, #tpu.memory_space<vmem>>, vector<1x22x16xf32>
    %107 = vector.shape_cast %106 : vector<1x22x16xf32> to vector<22x16xf32>
    %c1_36 = arith.constant 1 : index
    %108 = memref.load %arg4[%c1_36] : memref<98xf32, #tpu.memory_space<smem>>
    %109 = vector.extract_strided_slice %107 {offsets = [0, 0], sizes = [16, 16], strides = [1, 1]} : vector<22x16xf32> to vector<16x16xf32>
    %110 = vector.broadcast %108 : f32 to vector<16x16xf32>
    %111 = arith.mulf %110, %109 : vector<16x16xf32>
    %112 = arith.addf %105, %111 : vector<16x16xf32>
    %c8 = arith.constant 8 : index
    %113 = memref.load %arg4[%c8] : memref<98xf32, #tpu.memory_space<smem>>
    %114 = vector.extract_strided_slice %107 {offsets = [1, 0], sizes = [16, 16], strides = [1, 1]} : vector<22x16xf32> to vector<16x16xf32>
    %115 = vector.broadcast %113 : f32 to vector<16x16xf32>
    %116 = arith.mulf %115, %114 : vector<16x16xf32>
    %117 = arith.addf %100, %116 : vector<16x16xf32>
    %c15 = arith.constant 15 : index
    %118 = memref.load %arg4[%c15] : memref<98xf32, #tpu.memory_space<smem>>
    %119 = vector.extract_strided_slice %107 {offsets = [2, 0], sizes = [16, 16], strides = [1, 1]} : vector<22x16xf32> to vector<16x16xf32>
    %120 = vector.broadcast %118 : f32 to vector<16x16xf32>
    %121 = arith.mulf %120, %119 : vector<16x16xf32>
    %122 = arith.addf %112, %121 : vector<16x16xf32>
    %c22 = arith.constant 22 : index
    %123 = memref.load %arg4[%c22] : memref<98xf32, #tpu.memory_space<smem>>
    %124 = vector.extract_strided_slice %107 {offsets = [3, 0], sizes = [16, 16], strides = [1, 1]} : vector<22x16xf32> to vector<16x16xf32>
    %125 = vector.broadcast %123 : f32 to vector<16x16xf32>
    %126 = arith.mulf %125, %124 : vector<16x16xf32>
    %127 = arith.addf %117, %126 : vector<16x16xf32>
    %c29 = arith.constant 29 : index
    %128 = memref.load %arg4[%c29] : memref<98xf32, #tpu.memory_space<smem>>
    %129 = vector.extract_strided_slice %107 {offsets = [4, 0], sizes = [16, 16], strides = [1, 1]} : vector<22x16xf32> to vector<16x16xf32>
    %130 = vector.broadcast %128 : f32 to vector<16x16xf32>
    %131 = arith.mulf %130, %129 : vector<16x16xf32>
    %132 = arith.addf %122, %131 : vector<16x16xf32>
    %c36 = arith.constant 36 : index
    %133 = memref.load %arg4[%c36] : memref<98xf32, #tpu.memory_space<smem>>
    %134 = vector.extract_strided_slice %107 {offsets = [5, 0], sizes = [16, 16], strides = [1, 1]} : vector<22x16xf32> to vector<16x16xf32>
    %135 = vector.broadcast %133 : f32 to vector<16x16xf32>
    %136 = arith.mulf %135, %134 : vector<16x16xf32>
    %137 = arith.addf %127, %136 : vector<16x16xf32>
    %c43 = arith.constant 43 : index
    %138 = memref.load %arg4[%c43] : memref<98xf32, #tpu.memory_space<smem>>
    %139 = vector.extract_strided_slice %107 {offsets = [6, 0], sizes = [16, 16], strides = [1, 1]} : vector<22x16xf32> to vector<16x16xf32>
    %140 = vector.broadcast %138 : f32 to vector<16x16xf32>
    %141 = arith.mulf %140, %139 : vector<16x16xf32>
    %142 = arith.addf %132, %141 : vector<16x16xf32>
    %c0_37 = arith.constant 0 : index
    %c0_38 = arith.constant 0 : index
    %c2 = arith.constant 2 : index
    %143 = vector.load %arg7[%c0_37, %c0_38, %c2] : memref<2x22x22xf32, #tpu.memory_space<vmem>>, vector<1x22x16xf32>
    %144 = vector.shape_cast %143 : vector<1x22x16xf32> to vector<22x16xf32>
    %c2_39 = arith.constant 2 : index
    %145 = memref.load %arg4[%c2_39] : memref<98xf32, #tpu.memory_space<smem>>
    %146 = vector.extract_strided_slice %144 {offsets = [0, 0], sizes = [16, 16], strides = [1, 1]} : vector<22x16xf32> to vector<16x16xf32>
    %147 = vector.broadcast %145 : f32 to vector<16x16xf32>
    %148 = arith.mulf %147, %146 : vector<16x16xf32>
    %149 = arith.addf %142, %148 : vector<16x16xf32>
    %c9 = arith.constant 9 : index
    %150 = memref.load %arg4[%c9] : memref<98xf32, #tpu.memory_space<smem>>
    %151 = vector.extract_strided_slice %144 {offsets = [1, 0], sizes = [16, 16], strides = [1, 1]} : vector<22x16xf32> to vector<16x16xf32>
    %152 = vector.broadcast %150 : f32 to vector<16x16xf32>
    %153 = arith.mulf %152, %151 : vector<16x16xf32>
    %154 = arith.addf %137, %153 : vector<16x16xf32>
    %c16 = arith.constant 16 : index
    %155 = memref.load %arg4[%c16] : memref<98xf32, #tpu.memory_space<smem>>
    %156 = vector.extract_strided_slice %144 {offsets = [2, 0], sizes = [16, 16], strides = [1, 1]} : vector<22x16xf32> to vector<16x16xf32>
    %157 = vector.broadcast %155 : f32 to vector<16x16xf32>
    %158 = arith.mulf %157, %156 : vector<16x16xf32>
    %159 = arith.addf %149, %158 : vector<16x16xf32>
    %c23 = arith.constant 23 : index
    %160 = memref.load %arg4[%c23] : memref<98xf32, #tpu.memory_space<smem>>
    %161 = vector.extract_strided_slice %144 {offsets = [3, 0], sizes = [16, 16], strides = [1, 1]} : vector<22x16xf32> to vector<16x16xf32>
    %162 = vector.broadcast %160 : f32 to vector<16x16xf32>
    %163 = arith.mulf %162, %161 : vector<16x16xf32>
    %164 = arith.addf %154, %163 : vector<16x16xf32>
    %c30 = arith.constant 30 : index
    %165 = memref.load %arg4[%c30] : memref<98xf32, #tpu.memory_space<smem>>
    %166 = vector.extract_strided_slice %144 {offsets = [4, 0], sizes = [16, 16], strides = [1, 1]} : vector<22x16xf32> to vector<16x16xf32>
    %167 = vector.broadcast %165 : f32 to vector<16x16xf32>
    %168 = arith.mulf %167, %166 : vector<16x16xf32>
    %169 = arith.addf %159, %168 : vector<16x16xf32>
    %c37 = arith.constant 37 : index
    %170 = memref.load %arg4[%c37] : memref<98xf32, #tpu.memory_space<smem>>
    %171 = vector.extract_strided_slice %144 {offsets = [5, 0], sizes = [16, 16], strides = [1, 1]} : vector<22x16xf32> to vector<16x16xf32>
    %172 = vector.broadcast %170 : f32 to vector<16x16xf32>
    %173 = arith.mulf %172, %171 : vector<16x16xf32>
    %174 = arith.addf %164, %173 : vector<16x16xf32>
    %c44 = arith.constant 44 : index
    %175 = memref.load %arg4[%c44] : memref<98xf32, #tpu.memory_space<smem>>
    %176 = vector.extract_strided_slice %144 {offsets = [6, 0], sizes = [16, 16], strides = [1, 1]} : vector<22x16xf32> to vector<16x16xf32>
    %177 = vector.broadcast %175 : f32 to vector<16x16xf32>
    %178 = arith.mulf %177, %176 : vector<16x16xf32>
    %179 = arith.addf %169, %178 : vector<16x16xf32>
    %c0_40 = arith.constant 0 : index
    %c0_41 = arith.constant 0 : index
    %c3_42 = arith.constant 3 : index
    %180 = vector.load %arg7[%c0_40, %c0_41, %c3_42] : memref<2x22x22xf32, #tpu.memory_space<vmem>>, vector<1x22x16xf32>
    %181 = vector.shape_cast %180 : vector<1x22x16xf32> to vector<22x16xf32>
    %c3_43 = arith.constant 3 : index
    %182 = memref.load %arg4[%c3_43] : memref<98xf32, #tpu.memory_space<smem>>
    %183 = vector.extract_strided_slice %181 {offsets = [0, 0], sizes = [16, 16], strides = [1, 1]} : vector<22x16xf32> to vector<16x16xf32>
    %184 = vector.broadcast %182 : f32 to vector<16x16xf32>
    %185 = arith.mulf %184, %183 : vector<16x16xf32>
    %186 = arith.addf %179, %185 : vector<16x16xf32>
    %c10 = arith.constant 10 : index
    %187 = memref.load %arg4[%c10] : memref<98xf32, #tpu.memory_space<smem>>
    %188 = vector.extract_strided_slice %181 {offsets = [1, 0], sizes = [16, 16], strides = [1, 1]} : vector<22x16xf32> to vector<16x16xf32>
    %189 = vector.broadcast %187 : f32 to vector<16x16xf32>
    %190 = arith.mulf %189, %188 : vector<16x16xf32>
    %191 = arith.addf %174, %190 : vector<16x16xf32>
    %c17 = arith.constant 17 : index
    %192 = memref.load %arg4[%c17] : memref<98xf32, #tpu.memory_space<smem>>
    %193 = vector.extract_strided_slice %181 {offsets = [2, 0], sizes = [16, 16], strides = [1, 1]} : vector<22x16xf32> to vector<16x16xf32>
    %194 = vector.broadcast %192 : f32 to vector<16x16xf32>
    %195 = arith.mulf %194, %193 : vector<16x16xf32>
    %196 = arith.addf %186, %195 : vector<16x16xf32>
    %c24 = arith.constant 24 : index
    %197 = memref.load %arg4[%c24] : memref<98xf32, #tpu.memory_space<smem>>
    %198 = vector.extract_strided_slice %181 {offsets = [3, 0], sizes = [16, 16], strides = [1, 1]} : vector<22x16xf32> to vector<16x16xf32>
    %199 = vector.broadcast %197 : f32 to vector<16x16xf32>
    %200 = arith.mulf %199, %198 : vector<16x16xf32>
    %201 = arith.addf %191, %200 : vector<16x16xf32>
    %c31 = arith.constant 31 : index
    %202 = memref.load %arg4[%c31] : memref<98xf32, #tpu.memory_space<smem>>
    %203 = vector.extract_strided_slice %181 {offsets = [4, 0], sizes = [16, 16], strides = [1, 1]} : vector<22x16xf32> to vector<16x16xf32>
    %204 = vector.broadcast %202 : f32 to vector<16x16xf32>
    %205 = arith.mulf %204, %203 : vector<16x16xf32>
    %206 = arith.addf %196, %205 : vector<16x16xf32>
    %c38 = arith.constant 38 : index
    %207 = memref.load %arg4[%c38] : memref<98xf32, #tpu.memory_space<smem>>
    %208 = vector.extract_strided_slice %181 {offsets = [5, 0], sizes = [16, 16], strides = [1, 1]} : vector<22x16xf32> to vector<16x16xf32>
    %209 = vector.broadcast %207 : f32 to vector<16x16xf32>
    %210 = arith.mulf %209, %208 : vector<16x16xf32>
    %211 = arith.addf %201, %210 : vector<16x16xf32>
    %c45 = arith.constant 45 : index
    %212 = memref.load %arg4[%c45] : memref<98xf32, #tpu.memory_space<smem>>
    %213 = vector.extract_strided_slice %181 {offsets = [6, 0], sizes = [16, 16], strides = [1, 1]} : vector<22x16xf32> to vector<16x16xf32>
    %214 = vector.broadcast %212 : f32 to vector<16x16xf32>
    %215 = arith.mulf %214, %213 : vector<16x16xf32>
    %216 = arith.addf %206, %215 : vector<16x16xf32>
    %c0_44 = arith.constant 0 : index
    %c0_45 = arith.constant 0 : index
    %c4 = arith.constant 4 : index
    %217 = vector.load %arg7[%c0_44, %c0_45, %c4] : memref<2x22x22xf32, #tpu.memory_space<vmem>>, vector<1x22x16xf32>
    %218 = vector.shape_cast %217 : vector<1x22x16xf32> to vector<22x16xf32>
    %c4_46 = arith.constant 4 : index
    %219 = memref.load %arg4[%c4_46] : memref<98xf32, #tpu.memory_space<smem>>
    %220 = vector.extract_strided_slice %218 {offsets = [0, 0], sizes = [16, 16], strides = [1, 1]} : vector<22x16xf32> to vector<16x16xf32>
    %221 = vector.broadcast %219 : f32 to vector<16x16xf32>
    %222 = arith.mulf %221, %220 : vector<16x16xf32>
    %223 = arith.addf %216, %222 : vector<16x16xf32>
    %c11 = arith.constant 11 : index
    %224 = memref.load %arg4[%c11] : memref<98xf32, #tpu.memory_space<smem>>
    %225 = vector.extract_strided_slice %218 {offsets = [1, 0], sizes = [16, 16], strides = [1, 1]} : vector<22x16xf32> to vector<16x16xf32>
    %226 = vector.broadcast %224 : f32 to vector<16x16xf32>
    %227 = arith.mulf %226, %225 : vector<16x16xf32>
    %228 = arith.addf %211, %227 : vector<16x16xf32>
    %c18 = arith.constant 18 : index
    %229 = memref.load %arg4[%c18] : memref<98xf32, #tpu.memory_space<smem>>
    %230 = vector.extract_strided_slice %218 {offsets = [2, 0], sizes = [16, 16], strides = [1, 1]} : vector<22x16xf32> to vector<16x16xf32>
    %231 = vector.broadcast %229 : f32 to vector<16x16xf32>
    %232 = arith.mulf %231, %230 : vector<16x16xf32>
    %233 = arith.addf %223, %232 : vector<16x16xf32>
    %c25 = arith.constant 25 : index
    %234 = memref.load %arg4[%c25] : memref<98xf32, #tpu.memory_space<smem>>
    %235 = vector.extract_strided_slice %218 {offsets = [3, 0], sizes = [16, 16], strides = [1, 1]} : vector<22x16xf32> to vector<16x16xf32>
    %236 = vector.broadcast %234 : f32 to vector<16x16xf32>
    %237 = arith.mulf %236, %235 : vector<16x16xf32>
    %238 = arith.addf %228, %237 : vector<16x16xf32>
    %c32 = arith.constant 32 : index
    %239 = memref.load %arg4[%c32] : memref<98xf32, #tpu.memory_space<smem>>
    %240 = vector.extract_strided_slice %218 {offsets = [4, 0], sizes = [16, 16], strides = [1, 1]} : vector<22x16xf32> to vector<16x16xf32>
    %241 = vector.broadcast %239 : f32 to vector<16x16xf32>
    %242 = arith.mulf %241, %240 : vector<16x16xf32>
    %243 = arith.addf %233, %242 : vector<16x16xf32>
    %c39 = arith.constant 39 : index
    %244 = memref.load %arg4[%c39] : memref<98xf32, #tpu.memory_space<smem>>
    %245 = vector.extract_strided_slice %218 {offsets = [5, 0], sizes = [16, 16], strides = [1, 1]} : vector<22x16xf32> to vector<16x16xf32>
    %246 = vector.broadcast %244 : f32 to vector<16x16xf32>
    %247 = arith.mulf %246, %245 : vector<16x16xf32>
    %248 = arith.addf %238, %247 : vector<16x16xf32>
    %c46 = arith.constant 46 : index
    %249 = memref.load %arg4[%c46] : memref<98xf32, #tpu.memory_space<smem>>
    %250 = vector.extract_strided_slice %218 {offsets = [6, 0], sizes = [16, 16], strides = [1, 1]} : vector<22x16xf32> to vector<16x16xf32>
    %251 = vector.broadcast %249 : f32 to vector<16x16xf32>
    %252 = arith.mulf %251, %250 : vector<16x16xf32>
    %253 = arith.addf %243, %252 : vector<16x16xf32>
    %c0_47 = arith.constant 0 : index
    %c0_48 = arith.constant 0 : index
    %c5 = arith.constant 5 : index
    %254 = vector.load %arg7[%c0_47, %c0_48, %c5] : memref<2x22x22xf32, #tpu.memory_space<vmem>>, vector<1x22x16xf32>
    %255 = vector.shape_cast %254 : vector<1x22x16xf32> to vector<22x16xf32>
    %c5_49 = arith.constant 5 : index
    %256 = memref.load %arg4[%c5_49] : memref<98xf32, #tpu.memory_space<smem>>
    %257 = vector.extract_strided_slice %255 {offsets = [0, 0], sizes = [16, 16], strides = [1, 1]} : vector<22x16xf32> to vector<16x16xf32>
    %258 = vector.broadcast %256 : f32 to vector<16x16xf32>
    %259 = arith.mulf %258, %257 : vector<16x16xf32>
    %260 = arith.addf %253, %259 : vector<16x16xf32>
    %c12 = arith.constant 12 : index
    %261 = memref.load %arg4[%c12] : memref<98xf32, #tpu.memory_space<smem>>
    %262 = vector.extract_strided_slice %255 {offsets = [1, 0], sizes = [16, 16], strides = [1, 1]} : vector<22x16xf32> to vector<16x16xf32>
    %263 = vector.broadcast %261 : f32 to vector<16x16xf32>
    %264 = arith.mulf %263, %262 : vector<16x16xf32>
    %265 = arith.addf %248, %264 : vector<16x16xf32>
    %c19 = arith.constant 19 : index
    %266 = memref.load %arg4[%c19] : memref<98xf32, #tpu.memory_space<smem>>
    %267 = vector.extract_strided_slice %255 {offsets = [2, 0], sizes = [16, 16], strides = [1, 1]} : vector<22x16xf32> to vector<16x16xf32>
    %268 = vector.broadcast %266 : f32 to vector<16x16xf32>
    %269 = arith.mulf %268, %267 : vector<16x16xf32>
    %270 = arith.addf %260, %269 : vector<16x16xf32>
    %c26 = arith.constant 26 : index
    %271 = memref.load %arg4[%c26] : memref<98xf32, #tpu.memory_space<smem>>
    %272 = vector.extract_strided_slice %255 {offsets = [3, 0], sizes = [16, 16], strides = [1, 1]} : vector<22x16xf32> to vector<16x16xf32>
    %273 = vector.broadcast %271 : f32 to vector<16x16xf32>
    %274 = arith.mulf %273, %272 : vector<16x16xf32>
    %275 = arith.addf %265, %274 : vector<16x16xf32>
    %c33 = arith.constant 33 : index
    %276 = memref.load %arg4[%c33] : memref<98xf32, #tpu.memory_space<smem>>
    %277 = vector.extract_strided_slice %255 {offsets = [4, 0], sizes = [16, 16], strides = [1, 1]} : vector<22x16xf32> to vector<16x16xf32>
    %278 = vector.broadcast %276 : f32 to vector<16x16xf32>
    %279 = arith.mulf %278, %277 : vector<16x16xf32>
    %280 = arith.addf %270, %279 : vector<16x16xf32>
    %c40 = arith.constant 40 : index
    %281 = memref.load %arg4[%c40] : memref<98xf32, #tpu.memory_space<smem>>
    %282 = vector.extract_strided_slice %255 {offsets = [5, 0], sizes = [16, 16], strides = [1, 1]} : vector<22x16xf32> to vector<16x16xf32>
    %283 = vector.broadcast %281 : f32 to vector<16x16xf32>
    %284 = arith.mulf %283, %282 : vector<16x16xf32>
    %285 = arith.addf %275, %284 : vector<16x16xf32>
    %c47 = arith.constant 47 : index
    %286 = memref.load %arg4[%c47] : memref<98xf32, #tpu.memory_space<smem>>
    %287 = vector.extract_strided_slice %255 {offsets = [6, 0], sizes = [16, 16], strides = [1, 1]} : vector<22x16xf32> to vector<16x16xf32>
    %288 = vector.broadcast %286 : f32 to vector<16x16xf32>
    %289 = arith.mulf %288, %287 : vector<16x16xf32>
    %290 = arith.addf %280, %289 : vector<16x16xf32>
    %c0_50 = arith.constant 0 : index
    %c0_51 = arith.constant 0 : index
    %c6 = arith.constant 6 : index
    %291 = vector.load %arg7[%c0_50, %c0_51, %c6] : memref<2x22x22xf32, #tpu.memory_space<vmem>>, vector<1x22x16xf32>
    %292 = vector.shape_cast %291 : vector<1x22x16xf32> to vector<22x16xf32>
    %c6_52 = arith.constant 6 : index
    %293 = memref.load %arg4[%c6_52] : memref<98xf32, #tpu.memory_space<smem>>
    %294 = vector.extract_strided_slice %292 {offsets = [0, 0], sizes = [16, 16], strides = [1, 1]} : vector<22x16xf32> to vector<16x16xf32>
    %295 = vector.broadcast %293 : f32 to vector<16x16xf32>
    %296 = arith.mulf %295, %294 : vector<16x16xf32>
    %297 = arith.addf %290, %296 : vector<16x16xf32>
    %c13 = arith.constant 13 : index
    %298 = memref.load %arg4[%c13] : memref<98xf32, #tpu.memory_space<smem>>
    %299 = vector.extract_strided_slice %292 {offsets = [1, 0], sizes = [16, 16], strides = [1, 1]} : vector<22x16xf32> to vector<16x16xf32>
    %300 = vector.broadcast %298 : f32 to vector<16x16xf32>
    %301 = arith.mulf %300, %299 : vector<16x16xf32>
    %302 = arith.addf %285, %301 : vector<16x16xf32>
    %c20 = arith.constant 20 : index
    %303 = memref.load %arg4[%c20] : memref<98xf32, #tpu.memory_space<smem>>
    %304 = vector.extract_strided_slice %292 {offsets = [2, 0], sizes = [16, 16], strides = [1, 1]} : vector<22x16xf32> to vector<16x16xf32>
    %305 = vector.broadcast %303 : f32 to vector<16x16xf32>
    %306 = arith.mulf %305, %304 : vector<16x16xf32>
    %307 = arith.addf %297, %306 : vector<16x16xf32>
    %c27 = arith.constant 27 : index
    %308 = memref.load %arg4[%c27] : memref<98xf32, #tpu.memory_space<smem>>
    %309 = vector.extract_strided_slice %292 {offsets = [3, 0], sizes = [16, 16], strides = [1, 1]} : vector<22x16xf32> to vector<16x16xf32>
    %310 = vector.broadcast %308 : f32 to vector<16x16xf32>
    %311 = arith.mulf %310, %309 : vector<16x16xf32>
    %312 = arith.addf %302, %311 : vector<16x16xf32>
    %c34 = arith.constant 34 : index
    %313 = memref.load %arg4[%c34] : memref<98xf32, #tpu.memory_space<smem>>
    %314 = vector.extract_strided_slice %292 {offsets = [4, 0], sizes = [16, 16], strides = [1, 1]} : vector<22x16xf32> to vector<16x16xf32>
    %315 = vector.broadcast %313 : f32 to vector<16x16xf32>
    %316 = arith.mulf %315, %314 : vector<16x16xf32>
    %317 = arith.addf %307, %316 : vector<16x16xf32>
    %c41 = arith.constant 41 : index
    %318 = memref.load %arg4[%c41] : memref<98xf32, #tpu.memory_space<smem>>
    %319 = vector.extract_strided_slice %292 {offsets = [5, 0], sizes = [16, 16], strides = [1, 1]} : vector<22x16xf32> to vector<16x16xf32>
    %320 = vector.broadcast %318 : f32 to vector<16x16xf32>
    %321 = arith.mulf %320, %319 : vector<16x16xf32>
    %322 = arith.addf %312, %321 : vector<16x16xf32>
    %c48 = arith.constant 48 : index
    %323 = memref.load %arg4[%c48] : memref<98xf32, #tpu.memory_space<smem>>
    %324 = vector.extract_strided_slice %292 {offsets = [6, 0], sizes = [16, 16], strides = [1, 1]} : vector<22x16xf32> to vector<16x16xf32>
    %325 = vector.broadcast %323 : f32 to vector<16x16xf32>
    %326 = arith.mulf %325, %324 : vector<16x16xf32>
    %327 = arith.addf %317, %326 : vector<16x16xf32>
    %c1_53 = arith.constant 1 : index
    %c0_54 = arith.constant 0 : index
    %c0_55 = arith.constant 0 : index
    %328 = vector.load %arg7[%c1_53, %c0_54, %c0_55] : memref<2x22x22xf32, #tpu.memory_space<vmem>>, vector<1x22x16xf32>
    %329 = vector.shape_cast %328 : vector<1x22x16xf32> to vector<22x16xf32>
    %c49 = arith.constant 49 : index
    %330 = memref.load %arg4[%c49] : memref<98xf32, #tpu.memory_space<smem>>
    %331 = vector.extract_strided_slice %329 {offsets = [0, 0], sizes = [16, 16], strides = [1, 1]} : vector<22x16xf32> to vector<16x16xf32>
    %332 = vector.broadcast %330 : f32 to vector<16x16xf32>
    %333 = arith.mulf %332, %331 : vector<16x16xf32>
    %334 = arith.addf %327, %333 : vector<16x16xf32>
    %c56 = arith.constant 56 : index
    %335 = memref.load %arg4[%c56] : memref<98xf32, #tpu.memory_space<smem>>
    %336 = vector.extract_strided_slice %329 {offsets = [1, 0], sizes = [16, 16], strides = [1, 1]} : vector<22x16xf32> to vector<16x16xf32>
    %337 = vector.broadcast %335 : f32 to vector<16x16xf32>
    %338 = arith.mulf %337, %336 : vector<16x16xf32>
    %339 = arith.addf %322, %338 : vector<16x16xf32>
    %c63 = arith.constant 63 : index
    %340 = memref.load %arg4[%c63] : memref<98xf32, #tpu.memory_space<smem>>
    %341 = vector.extract_strided_slice %329 {offsets = [2, 0], sizes = [16, 16], strides = [1, 1]} : vector<22x16xf32> to vector<16x16xf32>
    %342 = vector.broadcast %340 : f32 to vector<16x16xf32>
    %343 = arith.mulf %342, %341 : vector<16x16xf32>
    %344 = arith.addf %334, %343 : vector<16x16xf32>
    %c70 = arith.constant 70 : index
    %345 = memref.load %arg4[%c70] : memref<98xf32, #tpu.memory_space<smem>>
    %346 = vector.extract_strided_slice %329 {offsets = [3, 0], sizes = [16, 16], strides = [1, 1]} : vector<22x16xf32> to vector<16x16xf32>
    %347 = vector.broadcast %345 : f32 to vector<16x16xf32>
    %348 = arith.mulf %347, %346 : vector<16x16xf32>
    %349 = arith.addf %339, %348 : vector<16x16xf32>
    %c77 = arith.constant 77 : index
    %350 = memref.load %arg4[%c77] : memref<98xf32, #tpu.memory_space<smem>>
    %351 = vector.extract_strided_slice %329 {offsets = [4, 0], sizes = [16, 16], strides = [1, 1]} : vector<22x16xf32> to vector<16x16xf32>
    %352 = vector.broadcast %350 : f32 to vector<16x16xf32>
    %353 = arith.mulf %352, %351 : vector<16x16xf32>
    %354 = arith.addf %344, %353 : vector<16x16xf32>
    %c84 = arith.constant 84 : index
    %355 = memref.load %arg4[%c84] : memref<98xf32, #tpu.memory_space<smem>>
    %356 = vector.extract_strided_slice %329 {offsets = [5, 0], sizes = [16, 16], strides = [1, 1]} : vector<22x16xf32> to vector<16x16xf32>
    %357 = vector.broadcast %355 : f32 to vector<16x16xf32>
    %358 = arith.mulf %357, %356 : vector<16x16xf32>
    %359 = arith.addf %349, %358 : vector<16x16xf32>
    %c91 = arith.constant 91 : index
    %360 = memref.load %arg4[%c91] : memref<98xf32, #tpu.memory_space<smem>>
    %361 = vector.extract_strided_slice %329 {offsets = [6, 0], sizes = [16, 16], strides = [1, 1]} : vector<22x16xf32> to vector<16x16xf32>
    %362 = vector.broadcast %360 : f32 to vector<16x16xf32>
    %363 = arith.mulf %362, %361 : vector<16x16xf32>
    %364 = arith.addf %354, %363 : vector<16x16xf32>
    %c1_56 = arith.constant 1 : index
    %c0_57 = arith.constant 0 : index
    %c1_58 = arith.constant 1 : index
    %365 = vector.load %arg7[%c1_56, %c0_57, %c1_58] : memref<2x22x22xf32, #tpu.memory_space<vmem>>, vector<1x22x16xf32>
    %366 = vector.shape_cast %365 : vector<1x22x16xf32> to vector<22x16xf32>
    %c50 = arith.constant 50 : index
    %367 = memref.load %arg4[%c50] : memref<98xf32, #tpu.memory_space<smem>>
    %368 = vector.extract_strided_slice %366 {offsets = [0, 0], sizes = [16, 16], strides = [1, 1]} : vector<22x16xf32> to vector<16x16xf32>
    %369 = vector.broadcast %367 : f32 to vector<16x16xf32>
    %370 = arith.mulf %369, %368 : vector<16x16xf32>
    %371 = arith.addf %364, %370 : vector<16x16xf32>
    %c57 = arith.constant 57 : index
    %372 = memref.load %arg4[%c57] : memref<98xf32, #tpu.memory_space<smem>>
    %373 = vector.extract_strided_slice %366 {offsets = [1, 0], sizes = [16, 16], strides = [1, 1]} : vector<22x16xf32> to vector<16x16xf32>
    %374 = vector.broadcast %372 : f32 to vector<16x16xf32>
    %375 = arith.mulf %374, %373 : vector<16x16xf32>
    %376 = arith.addf %359, %375 : vector<16x16xf32>
    %c64 = arith.constant 64 : index
    %377 = memref.load %arg4[%c64] : memref<98xf32, #tpu.memory_space<smem>>
    %378 = vector.extract_strided_slice %366 {offsets = [2, 0], sizes = [16, 16], strides = [1, 1]} : vector<22x16xf32> to vector<16x16xf32>
    %379 = vector.broadcast %377 : f32 to vector<16x16xf32>
    %380 = arith.mulf %379, %378 : vector<16x16xf32>
    %381 = arith.addf %371, %380 : vector<16x16xf32>
    %c71 = arith.constant 71 : index
    %382 = memref.load %arg4[%c71] : memref<98xf32, #tpu.memory_space<smem>>
    %383 = vector.extract_strided_slice %366 {offsets = [3, 0], sizes = [16, 16], strides = [1, 1]} : vector<22x16xf32> to vector<16x16xf32>
    %384 = vector.broadcast %382 : f32 to vector<16x16xf32>
    %385 = arith.mulf %384, %383 : vector<16x16xf32>
    %386 = arith.addf %376, %385 : vector<16x16xf32>
    %c78 = arith.constant 78 : index
    %387 = memref.load %arg4[%c78] : memref<98xf32, #tpu.memory_space<smem>>
    %388 = vector.extract_strided_slice %366 {offsets = [4, 0], sizes = [16, 16], strides = [1, 1]} : vector<22x16xf32> to vector<16x16xf32>
    %389 = vector.broadcast %387 : f32 to vector<16x16xf32>
    %390 = arith.mulf %389, %388 : vector<16x16xf32>
    %391 = arith.addf %381, %390 : vector<16x16xf32>
    %c85 = arith.constant 85 : index
    %392 = memref.load %arg4[%c85] : memref<98xf32, #tpu.memory_space<smem>>
    %393 = vector.extract_strided_slice %366 {offsets = [5, 0], sizes = [16, 16], strides = [1, 1]} : vector<22x16xf32> to vector<16x16xf32>
    %394 = vector.broadcast %392 : f32 to vector<16x16xf32>
    %395 = arith.mulf %394, %393 : vector<16x16xf32>
    %396 = arith.addf %386, %395 : vector<16x16xf32>
    %c92 = arith.constant 92 : index
    %397 = memref.load %arg4[%c92] : memref<98xf32, #tpu.memory_space<smem>>
    %398 = vector.extract_strided_slice %366 {offsets = [6, 0], sizes = [16, 16], strides = [1, 1]} : vector<22x16xf32> to vector<16x16xf32>
    %399 = vector.broadcast %397 : f32 to vector<16x16xf32>
    %400 = arith.mulf %399, %398 : vector<16x16xf32>
    %401 = arith.addf %391, %400 : vector<16x16xf32>
    %c1_59 = arith.constant 1 : index
    %c0_60 = arith.constant 0 : index
    %c2_61 = arith.constant 2 : index
    %402 = vector.load %arg7[%c1_59, %c0_60, %c2_61] : memref<2x22x22xf32, #tpu.memory_space<vmem>>, vector<1x22x16xf32>
    %403 = vector.shape_cast %402 : vector<1x22x16xf32> to vector<22x16xf32>
    %c51 = arith.constant 51 : index
    %404 = memref.load %arg4[%c51] : memref<98xf32, #tpu.memory_space<smem>>
    %405 = vector.extract_strided_slice %403 {offsets = [0, 0], sizes = [16, 16], strides = [1, 1]} : vector<22x16xf32> to vector<16x16xf32>
    %406 = vector.broadcast %404 : f32 to vector<16x16xf32>
    %407 = arith.mulf %406, %405 : vector<16x16xf32>
    %408 = arith.addf %401, %407 : vector<16x16xf32>
    %c58 = arith.constant 58 : index
    %409 = memref.load %arg4[%c58] : memref<98xf32, #tpu.memory_space<smem>>
    %410 = vector.extract_strided_slice %403 {offsets = [1, 0], sizes = [16, 16], strides = [1, 1]} : vector<22x16xf32> to vector<16x16xf32>
    %411 = vector.broadcast %409 : f32 to vector<16x16xf32>
    %412 = arith.mulf %411, %410 : vector<16x16xf32>
    %413 = arith.addf %396, %412 : vector<16x16xf32>
    %c65 = arith.constant 65 : index
    %414 = memref.load %arg4[%c65] : memref<98xf32, #tpu.memory_space<smem>>
    %415 = vector.extract_strided_slice %403 {offsets = [2, 0], sizes = [16, 16], strides = [1, 1]} : vector<22x16xf32> to vector<16x16xf32>
    %416 = vector.broadcast %414 : f32 to vector<16x16xf32>
    %417 = arith.mulf %416, %415 : vector<16x16xf32>
    %418 = arith.addf %408, %417 : vector<16x16xf32>
    %c72 = arith.constant 72 : index
    %419 = memref.load %arg4[%c72] : memref<98xf32, #tpu.memory_space<smem>>
    %420 = vector.extract_strided_slice %403 {offsets = [3, 0], sizes = [16, 16], strides = [1, 1]} : vector<22x16xf32> to vector<16x16xf32>
    %421 = vector.broadcast %419 : f32 to vector<16x16xf32>
    %422 = arith.mulf %421, %420 : vector<16x16xf32>
    %423 = arith.addf %413, %422 : vector<16x16xf32>
    %c79 = arith.constant 79 : index
    %424 = memref.load %arg4[%c79] : memref<98xf32, #tpu.memory_space<smem>>
    %425 = vector.extract_strided_slice %403 {offsets = [4, 0], sizes = [16, 16], strides = [1, 1]} : vector<22x16xf32> to vector<16x16xf32>
    %426 = vector.broadcast %424 : f32 to vector<16x16xf32>
    %427 = arith.mulf %426, %425 : vector<16x16xf32>
    %428 = arith.addf %418, %427 : vector<16x16xf32>
    %c86 = arith.constant 86 : index
    %429 = memref.load %arg4[%c86] : memref<98xf32, #tpu.memory_space<smem>>
    %430 = vector.extract_strided_slice %403 {offsets = [5, 0], sizes = [16, 16], strides = [1, 1]} : vector<22x16xf32> to vector<16x16xf32>
    %431 = vector.broadcast %429 : f32 to vector<16x16xf32>
    %432 = arith.mulf %431, %430 : vector<16x16xf32>
    %433 = arith.addf %423, %432 : vector<16x16xf32>
    %c93 = arith.constant 93 : index
    %434 = memref.load %arg4[%c93] : memref<98xf32, #tpu.memory_space<smem>>
    %435 = vector.extract_strided_slice %403 {offsets = [6, 0], sizes = [16, 16], strides = [1, 1]} : vector<22x16xf32> to vector<16x16xf32>
    %436 = vector.broadcast %434 : f32 to vector<16x16xf32>
    %437 = arith.mulf %436, %435 : vector<16x16xf32>
    %438 = arith.addf %428, %437 : vector<16x16xf32>
    %c1_62 = arith.constant 1 : index
    %c0_63 = arith.constant 0 : index
    %c3_64 = arith.constant 3 : index
    %439 = vector.load %arg7[%c1_62, %c0_63, %c3_64] : memref<2x22x22xf32, #tpu.memory_space<vmem>>, vector<1x22x16xf32>
    %440 = vector.shape_cast %439 : vector<1x22x16xf32> to vector<22x16xf32>
    %c52 = arith.constant 52 : index
    %441 = memref.load %arg4[%c52] : memref<98xf32, #tpu.memory_space<smem>>
    %442 = vector.extract_strided_slice %440 {offsets = [0, 0], sizes = [16, 16], strides = [1, 1]} : vector<22x16xf32> to vector<16x16xf32>
    %443 = vector.broadcast %441 : f32 to vector<16x16xf32>
    %444 = arith.mulf %443, %442 : vector<16x16xf32>
    %445 = arith.addf %438, %444 : vector<16x16xf32>
    %c59 = arith.constant 59 : index
    %446 = memref.load %arg4[%c59] : memref<98xf32, #tpu.memory_space<smem>>
    %447 = vector.extract_strided_slice %440 {offsets = [1, 0], sizes = [16, 16], strides = [1, 1]} : vector<22x16xf32> to vector<16x16xf32>
    %448 = vector.broadcast %446 : f32 to vector<16x16xf32>
    %449 = arith.mulf %448, %447 : vector<16x16xf32>
    %450 = arith.addf %433, %449 : vector<16x16xf32>
    %c66 = arith.constant 66 : index
    %451 = memref.load %arg4[%c66] : memref<98xf32, #tpu.memory_space<smem>>
    %452 = vector.extract_strided_slice %440 {offsets = [2, 0], sizes = [16, 16], strides = [1, 1]} : vector<22x16xf32> to vector<16x16xf32>
    %453 = vector.broadcast %451 : f32 to vector<16x16xf32>
    %454 = arith.mulf %453, %452 : vector<16x16xf32>
    %455 = arith.addf %445, %454 : vector<16x16xf32>
    %c73 = arith.constant 73 : index
    %456 = memref.load %arg4[%c73] : memref<98xf32, #tpu.memory_space<smem>>
    %457 = vector.extract_strided_slice %440 {offsets = [3, 0], sizes = [16, 16], strides = [1, 1]} : vector<22x16xf32> to vector<16x16xf32>
    %458 = vector.broadcast %456 : f32 to vector<16x16xf32>
    %459 = arith.mulf %458, %457 : vector<16x16xf32>
    %460 = arith.addf %450, %459 : vector<16x16xf32>
    %c80 = arith.constant 80 : index
    %461 = memref.load %arg4[%c80] : memref<98xf32, #tpu.memory_space<smem>>
    %462 = vector.extract_strided_slice %440 {offsets = [4, 0], sizes = [16, 16], strides = [1, 1]} : vector<22x16xf32> to vector<16x16xf32>
    %463 = vector.broadcast %461 : f32 to vector<16x16xf32>
    %464 = arith.mulf %463, %462 : vector<16x16xf32>
    %465 = arith.addf %455, %464 : vector<16x16xf32>
    %c87 = arith.constant 87 : index
    %466 = memref.load %arg4[%c87] : memref<98xf32, #tpu.memory_space<smem>>
    %467 = vector.extract_strided_slice %440 {offsets = [5, 0], sizes = [16, 16], strides = [1, 1]} : vector<22x16xf32> to vector<16x16xf32>
    %468 = vector.broadcast %466 : f32 to vector<16x16xf32>
    %469 = arith.mulf %468, %467 : vector<16x16xf32>
    %470 = arith.addf %460, %469 : vector<16x16xf32>
    %c94 = arith.constant 94 : index
    %471 = memref.load %arg4[%c94] : memref<98xf32, #tpu.memory_space<smem>>
    %472 = vector.extract_strided_slice %440 {offsets = [6, 0], sizes = [16, 16], strides = [1, 1]} : vector<22x16xf32> to vector<16x16xf32>
    %473 = vector.broadcast %471 : f32 to vector<16x16xf32>
    %474 = arith.mulf %473, %472 : vector<16x16xf32>
    %475 = arith.addf %465, %474 : vector<16x16xf32>
    %c1_65 = arith.constant 1 : index
    %c0_66 = arith.constant 0 : index
    %c4_67 = arith.constant 4 : index
    %476 = vector.load %arg7[%c1_65, %c0_66, %c4_67] : memref<2x22x22xf32, #tpu.memory_space<vmem>>, vector<1x22x16xf32>
    %477 = vector.shape_cast %476 : vector<1x22x16xf32> to vector<22x16xf32>
    %c53 = arith.constant 53 : index
    %478 = memref.load %arg4[%c53] : memref<98xf32, #tpu.memory_space<smem>>
    %479 = vector.extract_strided_slice %477 {offsets = [0, 0], sizes = [16, 16], strides = [1, 1]} : vector<22x16xf32> to vector<16x16xf32>
    %480 = vector.broadcast %478 : f32 to vector<16x16xf32>
    %481 = arith.mulf %480, %479 : vector<16x16xf32>
    %482 = arith.addf %475, %481 : vector<16x16xf32>
    %c60 = arith.constant 60 : index
    %483 = memref.load %arg4[%c60] : memref<98xf32, #tpu.memory_space<smem>>
    %484 = vector.extract_strided_slice %477 {offsets = [1, 0], sizes = [16, 16], strides = [1, 1]} : vector<22x16xf32> to vector<16x16xf32>
    %485 = vector.broadcast %483 : f32 to vector<16x16xf32>
    %486 = arith.mulf %485, %484 : vector<16x16xf32>
    %487 = arith.addf %470, %486 : vector<16x16xf32>
    %c67 = arith.constant 67 : index
    %488 = memref.load %arg4[%c67] : memref<98xf32, #tpu.memory_space<smem>>
    %489 = vector.extract_strided_slice %477 {offsets = [2, 0], sizes = [16, 16], strides = [1, 1]} : vector<22x16xf32> to vector<16x16xf32>
    %490 = vector.broadcast %488 : f32 to vector<16x16xf32>
    %491 = arith.mulf %490, %489 : vector<16x16xf32>
    %492 = arith.addf %482, %491 : vector<16x16xf32>
    %c74 = arith.constant 74 : index
    %493 = memref.load %arg4[%c74] : memref<98xf32, #tpu.memory_space<smem>>
    %494 = vector.extract_strided_slice %477 {offsets = [3, 0], sizes = [16, 16], strides = [1, 1]} : vector<22x16xf32> to vector<16x16xf32>
    %495 = vector.broadcast %493 : f32 to vector<16x16xf32>
    %496 = arith.mulf %495, %494 : vector<16x16xf32>
    %497 = arith.addf %487, %496 : vector<16x16xf32>
    %c81 = arith.constant 81 : index
    %498 = memref.load %arg4[%c81] : memref<98xf32, #tpu.memory_space<smem>>
    %499 = vector.extract_strided_slice %477 {offsets = [4, 0], sizes = [16, 16], strides = [1, 1]} : vector<22x16xf32> to vector<16x16xf32>
    %500 = vector.broadcast %498 : f32 to vector<16x16xf32>
    %501 = arith.mulf %500, %499 : vector<16x16xf32>
    %502 = arith.addf %492, %501 : vector<16x16xf32>
    %c88 = arith.constant 88 : index
    %503 = memref.load %arg4[%c88] : memref<98xf32, #tpu.memory_space<smem>>
    %504 = vector.extract_strided_slice %477 {offsets = [5, 0], sizes = [16, 16], strides = [1, 1]} : vector<22x16xf32> to vector<16x16xf32>
    %505 = vector.broadcast %503 : f32 to vector<16x16xf32>
    %506 = arith.mulf %505, %504 : vector<16x16xf32>
    %507 = arith.addf %497, %506 : vector<16x16xf32>
    %c95 = arith.constant 95 : index
    %508 = memref.load %arg4[%c95] : memref<98xf32, #tpu.memory_space<smem>>
    %509 = vector.extract_strided_slice %477 {offsets = [6, 0], sizes = [16, 16], strides = [1, 1]} : vector<22x16xf32> to vector<16x16xf32>
    %510 = vector.broadcast %508 : f32 to vector<16x16xf32>
    %511 = arith.mulf %510, %509 : vector<16x16xf32>
    %512 = arith.addf %502, %511 : vector<16x16xf32>
    %c1_68 = arith.constant 1 : index
    %c0_69 = arith.constant 0 : index
    %c5_70 = arith.constant 5 : index
    %513 = vector.load %arg7[%c1_68, %c0_69, %c5_70] : memref<2x22x22xf32, #tpu.memory_space<vmem>>, vector<1x22x16xf32>
    %514 = vector.shape_cast %513 : vector<1x22x16xf32> to vector<22x16xf32>
    %c54 = arith.constant 54 : index
    %515 = memref.load %arg4[%c54] : memref<98xf32, #tpu.memory_space<smem>>
    %516 = vector.extract_strided_slice %514 {offsets = [0, 0], sizes = [16, 16], strides = [1, 1]} : vector<22x16xf32> to vector<16x16xf32>
    %517 = vector.broadcast %515 : f32 to vector<16x16xf32>
    %518 = arith.mulf %517, %516 : vector<16x16xf32>
    %519 = arith.addf %512, %518 : vector<16x16xf32>
    %c61 = arith.constant 61 : index
    %520 = memref.load %arg4[%c61] : memref<98xf32, #tpu.memory_space<smem>>
    %521 = vector.extract_strided_slice %514 {offsets = [1, 0], sizes = [16, 16], strides = [1, 1]} : vector<22x16xf32> to vector<16x16xf32>
    %522 = vector.broadcast %520 : f32 to vector<16x16xf32>
    %523 = arith.mulf %522, %521 : vector<16x16xf32>
    %524 = arith.addf %507, %523 : vector<16x16xf32>
    %c68 = arith.constant 68 : index
    %525 = memref.load %arg4[%c68] : memref<98xf32, #tpu.memory_space<smem>>
    %526 = vector.extract_strided_slice %514 {offsets = [2, 0], sizes = [16, 16], strides = [1, 1]} : vector<22x16xf32> to vector<16x16xf32>
    %527 = vector.broadcast %525 : f32 to vector<16x16xf32>
    %528 = arith.mulf %527, %526 : vector<16x16xf32>
    %529 = arith.addf %519, %528 : vector<16x16xf32>
    %c75 = arith.constant 75 : index
    %530 = memref.load %arg4[%c75] : memref<98xf32, #tpu.memory_space<smem>>
    %531 = vector.extract_strided_slice %514 {offsets = [3, 0], sizes = [16, 16], strides = [1, 1]} : vector<22x16xf32> to vector<16x16xf32>
    %532 = vector.broadcast %530 : f32 to vector<16x16xf32>
    %533 = arith.mulf %532, %531 : vector<16x16xf32>
    %534 = arith.addf %524, %533 : vector<16x16xf32>
    %c82 = arith.constant 82 : index
    %535 = memref.load %arg4[%c82] : memref<98xf32, #tpu.memory_space<smem>>
    %536 = vector.extract_strided_slice %514 {offsets = [4, 0], sizes = [16, 16], strides = [1, 1]} : vector<22x16xf32> to vector<16x16xf32>
    %537 = vector.broadcast %535 : f32 to vector<16x16xf32>
    %538 = arith.mulf %537, %536 : vector<16x16xf32>
    %539 = arith.addf %529, %538 : vector<16x16xf32>
    %c89 = arith.constant 89 : index
    %540 = memref.load %arg4[%c89] : memref<98xf32, #tpu.memory_space<smem>>
    %541 = vector.extract_strided_slice %514 {offsets = [5, 0], sizes = [16, 16], strides = [1, 1]} : vector<22x16xf32> to vector<16x16xf32>
    %542 = vector.broadcast %540 : f32 to vector<16x16xf32>
    %543 = arith.mulf %542, %541 : vector<16x16xf32>
    %544 = arith.addf %534, %543 : vector<16x16xf32>
    %c96 = arith.constant 96 : index
    %545 = memref.load %arg4[%c96] : memref<98xf32, #tpu.memory_space<smem>>
    %546 = vector.extract_strided_slice %514 {offsets = [6, 0], sizes = [16, 16], strides = [1, 1]} : vector<22x16xf32> to vector<16x16xf32>
    %547 = vector.broadcast %545 : f32 to vector<16x16xf32>
    %548 = arith.mulf %547, %546 : vector<16x16xf32>
    %549 = arith.addf %539, %548 : vector<16x16xf32>
    %c1_71 = arith.constant 1 : index
    %c0_72 = arith.constant 0 : index
    %c6_73 = arith.constant 6 : index
    %550 = vector.load %arg7[%c1_71, %c0_72, %c6_73] : memref<2x22x22xf32, #tpu.memory_space<vmem>>, vector<1x22x16xf32>
    %551 = vector.shape_cast %550 : vector<1x22x16xf32> to vector<22x16xf32>
    %c55 = arith.constant 55 : index
    %552 = memref.load %arg4[%c55] : memref<98xf32, #tpu.memory_space<smem>>
    %553 = vector.extract_strided_slice %551 {offsets = [0, 0], sizes = [16, 16], strides = [1, 1]} : vector<22x16xf32> to vector<16x16xf32>
    %554 = vector.broadcast %552 : f32 to vector<16x16xf32>
    %555 = arith.mulf %554, %553 : vector<16x16xf32>
    %556 = arith.addf %549, %555 : vector<16x16xf32>
    %c62 = arith.constant 62 : index
    %557 = memref.load %arg4[%c62] : memref<98xf32, #tpu.memory_space<smem>>
    %558 = vector.extract_strided_slice %551 {offsets = [1, 0], sizes = [16, 16], strides = [1, 1]} : vector<22x16xf32> to vector<16x16xf32>
    %559 = vector.broadcast %557 : f32 to vector<16x16xf32>
    %560 = arith.mulf %559, %558 : vector<16x16xf32>
    %561 = arith.addf %544, %560 : vector<16x16xf32>
    %c69 = arith.constant 69 : index
    %562 = memref.load %arg4[%c69] : memref<98xf32, #tpu.memory_space<smem>>
    %563 = vector.extract_strided_slice %551 {offsets = [2, 0], sizes = [16, 16], strides = [1, 1]} : vector<22x16xf32> to vector<16x16xf32>
    %564 = vector.broadcast %562 : f32 to vector<16x16xf32>
    %565 = arith.mulf %564, %563 : vector<16x16xf32>
    %566 = arith.addf %556, %565 : vector<16x16xf32>
    %c76 = arith.constant 76 : index
    %567 = memref.load %arg4[%c76] : memref<98xf32, #tpu.memory_space<smem>>
    %568 = vector.extract_strided_slice %551 {offsets = [3, 0], sizes = [16, 16], strides = [1, 1]} : vector<22x16xf32> to vector<16x16xf32>
    %569 = vector.broadcast %567 : f32 to vector<16x16xf32>
    %570 = arith.mulf %569, %568 : vector<16x16xf32>
    %571 = arith.addf %561, %570 : vector<16x16xf32>
    %c83 = arith.constant 83 : index
    %572 = memref.load %arg4[%c83] : memref<98xf32, #tpu.memory_space<smem>>
    %573 = vector.extract_strided_slice %551 {offsets = [4, 0], sizes = [16, 16], strides = [1, 1]} : vector<22x16xf32> to vector<16x16xf32>
    %574 = vector.broadcast %572 : f32 to vector<16x16xf32>
    %575 = arith.mulf %574, %573 : vector<16x16xf32>
    %576 = arith.addf %566, %575 : vector<16x16xf32>
    %c90 = arith.constant 90 : index
    %577 = memref.load %arg4[%c90] : memref<98xf32, #tpu.memory_space<smem>>
    %578 = vector.extract_strided_slice %551 {offsets = [5, 0], sizes = [16, 16], strides = [1, 1]} : vector<22x16xf32> to vector<16x16xf32>
    %579 = vector.broadcast %577 : f32 to vector<16x16xf32>
    %580 = arith.mulf %579, %578 : vector<16x16xf32>
    %581 = arith.addf %571, %580 : vector<16x16xf32>
    %c97 = arith.constant 97 : index
    %582 = memref.load %arg4[%c97] : memref<98xf32, #tpu.memory_space<smem>>
    %583 = vector.extract_strided_slice %551 {offsets = [6, 0], sizes = [16, 16], strides = [1, 1]} : vector<22x16xf32> to vector<16x16xf32>
    %584 = vector.broadcast %582 : f32 to vector<16x16xf32>
    %585 = arith.mulf %584, %583 : vector<16x16xf32>
    %586 = arith.addf %576, %585 : vector<16x16xf32>
    %587 = arith.addf %586, %581 : vector<16x16xf32>
    %c0_74 = arith.constant 0 : index
    %588 = memref.load %arg5[%c0_74] : memref<2xf32, #tpu.memory_space<smem>>
    %589 = vector.broadcast %588 : f32 to vector<16x16xf32>
    %590 = arith.mulf %587, %589 : vector<16x16xf32>
    %c1_75 = arith.constant 1 : index
    %591 = memref.load %arg5[%c1_75] : memref<2xf32, #tpu.memory_space<smem>>
    %592 = vector.broadcast %591 : f32 to vector<16x16xf32>
    %593 = arith.addf %590, %592 : vector<16x16xf32>
    %cst_76 = arith.constant 0.000000e+00 : f32
    %594 = vector.broadcast %cst_76 : f32 to vector<16x16xf32>
    %595 = arith.maximumf %593, %594 : vector<16x16xf32>
    %596 = arith.negf %595 : vector<16x16xf32>
    %597 = math.exp %596 : vector<16x16xf32>
    %cst_77 = arith.constant 1.000000e+00 : f32
    %598 = vector.broadcast %cst_77 : f32 to vector<16x16xf32>
    %599 = arith.addf %598, %597 : vector<16x16xf32>
    %600 = arith.divf %598, %599 : vector<16x16xf32>
    %c0_78 = arith.constant 0 : index
    %c0_79 = arith.constant 0 : index
    %c0_80 = arith.constant 0 : index
    %c0_81 = arith.constant 0 : index
    %601 = vector.load %arg6[%c0_78, %c0_79, %c0_80, %c0_81] : memref<1x1x16x16xf32, #tpu.memory_space<vmem>>, vector<1x1x16x16xf32>
    %602 = vector.shape_cast %601 : vector<1x1x16x16xf32> to vector<16x16xf32>
    %603 = vector.shape_cast %600 : vector<16x16xf32> to vector<1x1x16x16xf32>
    tpu.vector_store %arg6[%c0_78, %c0_79, %c0_80, %c0_81], %603 {strides = array<i32>} : memref<1x1x16x16xf32, #tpu.memory_space<vmem>>, vector<1x1x16x16xf32>,
    return
  }
  func.func @transform_0(%arg0: i32) -> (i32, i32, i32, i32) {
    %c0_i32 = arith.constant 0 : i32
    %c0_i32_0 = arith.constant 0 : i32
    %c0_i32_1 = arith.constant 0 : i32
    %c0_i32_2 = arith.constant 0 : i32
    return %arg0, %c0_i32, %c0_i32_0, %c0_i32_1 : i32, i32, i32, i32
  }
  func.func @transform_1(%arg0: i32) -> (i32, i32) {
    %c0_i32 = arith.constant 0 : i32
    %c0_i32_0 = arith.constant 0 : i32
    %c0_i32_1 = arith.constant 0 : i32
    return %c0_i32, %c0_i32_0 : i32, i32
  }
  func.func @transform_2(%arg0: i32) -> (i32, i32) {
    %c0_i32 = arith.constant 0 : i32
    %c0_i32_0 = arith.constant 0 : i32
    %c0_i32_1 = arith.constant 0 : i32
    return %c0_i32, %c0_i32_0 : i32, i32
  }
  func.func @transform_3(%arg0: i32) -> i32 {
    %c0_i32 = arith.constant 0 : i32
    %c0_i32_0 = arith.constant 0 : i32
    return %c0_i32 : i32
  }
  func.func @transform_4(%arg0: i32) -> i32 {
    %c0_i32 = arith.constant 0 : i32
    %c0_i32_0 = arith.constant 0 : i32
    return %c0_i32 : i32
  }
  func.func @transform_5(%arg0: i32) -> (i32, i32, i32, i32) {
    %c0_i32 = arith.constant 0 : i32
    %c0_i32_0 = arith.constant 0 : i32
    %c0_i32_1 = arith.constant 0 : i32
    %c0_i32_2 = arith.constant 0 : i32
    return %arg0, %c0_i32, %c0_i32_0, %c0_i32_1 : i32, i32, i32, i32
  }
}

</mosaic_0001>

<bundles_post_ra>
// kernel: tpu_custom_call.1
= control target key start
LH: loop header
LB: loop body
LE: loop exit
PB: predicated region body
PF: predicated region fallthrough
CT: control target
= control target key end

     0   :  { %10 = vsyncpa [#allocation4], 0  ;;  %s5310_s0 = inlined_call_operand.hbm [shape: f32[2,4,16,16], index: 0, kind: input, shape index: {}]   ;;  %s5311_s1 = inlined_call_operand.vmem [shape: f32[2,4], index: 1, kind: input, shape index: {}]   ;;  %s5312_s2 = inlined_call_operand.vmem [shape: f32[4,2], index: 2, kind: input, shape index: {}]   ;;  %s5313_s3 = inlined_call_operand.vmem [shape: f32[98], index: 3, kind: input, shape index: {}]   ;;  %s5314_s4 = inlined_call_operand.vmem [shape: f32[2], index: 4, kind: input, shape index: {}]   ;;  %s5315_s5 = inlined_call_operand.hbm [shape: f32[2,1,16,16], index: 5, kind: output, shape index: {}]  }
   0x1   :  { %12 = vsyncpa [#allocation4 + $0x1], 0 }
   0x2   :  { %13 = vsyncpa [#allocation6], 0 }
   0x3   :  { %14 = vsyncpa [#allocation9], 0 }
   0x4   :  { %15 = vsyncpa [#allocation5], 0 }
   0x5   :  { %17 = vsyncpa [#allocation5 + $0x1], 0  ;;  %s3207_s18 = smov 0   ;;  %s3209_s19 = smov 0  }
   0x6   :  { %s3211_s20 = smov 0   ;;  %s3213_s21 = smov 0  }
   0x7 LB: > { %s3228_s22 = sadd.s32 4294967295, %s3157_s21   ;;  %s2777_s23 = sadd.s32 4294967294, %s3157_s21   ;;  %s3157_s21 = sphi %s3213_s21, %s5659_s21   ;;  %s3153_s20 = sphi %s3211_s20, %s5658_s20   ;;  %s3149_s19 = sphi %s3209_s19, %s5657_s19   ;;  %s3145_s18 = sphi %s3207_s18, %s5656_s18  }
   0x8   : > { %s3232_s24 = sadd.s32 1, %s3157_s21   ;;  %s30_s25 = sadd.s32 1, %s3153_s20 }
   0x9   : > { %s27_s26 = ssub.s32 %s3157_s21, %s3232_s24  ;;  %p37_p0 = scmp.ne.s32.totalorder %s3153_s20, %s3149_s19 }
   0xa   : > { %p28_p1 = scmp.eq.s32.totalorder %s27_s26, 0  ;;  %p38_p2 = scmp.eq.s32.totalorder %s3157_s21, 0 }
   0xb   : > { %p43_p3 = scmp.ne.s32.totalorder %s3149_s19, %s3145_s18  ;;  %p5316_p4 = scmp.eq.s32.totalorder %s3228_s22, 0 }
   0xc   : > { %s3244_s27 = scalar_select %p28_p1, %s3153_s20, %s30_s25  }
   0xd   : > { %p3246_p5 = por %p38_p2, %p37_p0  ;;  %p3252_p6 = por %p5316_p4, %p43_p3 }
   0xe   : > { %p151_p7 = scmp.eq.s32.totalorder %s3228_s22, 1  ;;  %p157_p8 = scmp.eq.s32.totalorder %s2777_s23, 1 }
   0xf   : > { %s5368_s29 = scalar_select %p3252_p6, 1, 0 }
  0x10   : > { %p2778_p9 = scmp.ge.s32.totalorder %s3157_s21, 1  ;;  %p164_p10 = scmp.lt.s32.totalorder %s3157_s21, 3 }
  0x11   : > { %p3259_p11 = por %p151_p7, %p37_p0  ;;  %p3263_p12 = por %p157_p8, %p43_p3 }
  0x12   : > { %p3267_p13 = pnand %p2778_p9, %p164_p10  ;;  %s183_s10 = sshll.u32 %s5313_s3, 4  ;;  %s184_s10 = int_to_ptr.vmem [resolvable:$true] %s183_s10 }
  0x13   : > { %s5369_s30 = scalar_select %p3259_p11, 1, 0 }
  0x14   : > { %s5370_s6 = scalar_select %p3263_p12, 1, 0 }
  0x15   : > { %s5371_s7 = scalar_select %p3267_p13, 1, 0 }
  0x16   : > { %p2936_p1 = pneg %p3267_p13  ;;  %p2953_p2 = scmp.lt.s32.totalorder %s3157_s21, 2 }
  0x17   : > { %s194_s14 = sshll.u32 %s5314_s4, 4  ;;  %s3023_s16 = scalar_lea.vmem %s184_s10, 16  ;;  %s195_s14 = int_to_ptr.vmem [resolvable:$true] %s194_s14 }
  0x18   : > { %p3280_p7 = pnand %p2936_p1, %p5316_p4  ;;  %p3289_p3 = pnand %p2953_p2, %p3246_p5 }
  0x19   : > { %p3024_p8 = scmp.ne.s32.totalorder %s184_s10, %s3023_s16  ;;  %p3031_p0 = scmp.lt.s32.totalorder %s184_s10, %s184_s10 }
  0x1a   : > { %s5373_s15 = scalar_select %p3289_p3, 1, 0 }
  0x1b   : > { %p3025_p9 = pneg %p3280_p7  ;;  %p3032_p4 = scmp.lt.s32.totalorder %s3023_s16, %s3023_s16 }
  0x1d   : > { %p3026_p10 = pnand %p3025_p9, %p3024_p8  ;;  %p3033_p12 = por %p3032_p4, %p3031_p0 }
  0x1f   : > { %p3027_p1 = pneg %p3026_p10 }
  0x21   : > { %p3034_p11 = pnand %p3033_p12, %p3027_p1 }
  0x23   : > { %3037 = shalt.err (!%p3034_p11)
}
  0x24   : > { %s3159_s17 = smov [#allocation7]   ;;  %s205_s23 = sand.u32 1, %s3153_s20  }
  0x25   : > { %2939 = dma.vmem_to_smem (!%p3280_p7), %s184_s10, 16, %s3159_s17, [#allocation6]  }
  0x26   : > { %s3038_s25 = scalar_lea.vmem %s195_s14, 16  ;;  %p3046_p8 = scmp.lt.s32.totalorder %s195_s14, %s195_s14 }
  0x27   : > { %p3039_p5 = scmp.ne.s32.totalorder %s195_s14, %s3038_s25  ;;  %p3047_p10 = scmp.lt.s32.totalorder %s3038_s25, %s3038_s25 }
  0x29   : > { %p3041_p2 = pnand %p3039_p5, %p3025_p9  ;;  %p3048_p13 = por %p3047_p10, %p3046_p8 }
  0x2b   : > { %p3042_p6 = pneg %p3041_p2 }
  0x2d   : > { %p3049_p3 = pnand %p3048_p13, %p3042_p6 }
  0x2f   : > { %3052 = shalt.err (!%p3049_p3)
}
  0x30   : > { %s3160_s26 = smov [#allocation8]   ;;  %s2782_s28 = sshll.u32 %s205_s23, 6 }
  0x31   : > { %2942 = dma.vmem_to_smem (!%p3280_p7), %s195_s14, 16, %s3160_s26, [#allocation9]  }
  0x32   : > { %s2900_s8 = sshll.u32 %s3157_s21, 10  ;;  %s209_s13 = scalar_lea.vmem [#allocation3], %s2782_s28 }
  0x33   : > { %s3310_s12 = scalar_lea.hbm %s5310_s0, %s2900_s8  ;;  %s216_s16 = sshll.u32 %s209_s13, 4  ;;  %s3312_s16 = int_to_ptr.vmem [resolvable:$true] %s216_s16 }
  0x34   : > { %s3314_s11 = scalar_lea.sflag [#allocation4], %s205_s23  ;;  %s3053_s17 = scalar_lea.hbm %s3310_s12, 1024 }
  0x35   : > { %p3054_p4 = scmp.ne.s32.totalorder %s3310_s12, %s3053_s17  ;;  %p5374_p6 = scmp.ne.s32.totalorder %s5373_s15, 0 }
  0x36   : > { %s3058_s26 = scalar_lea.hbm %s5310_s0, 2048  ;;  %p3059_p0 = scmp.lt.u32.totalorder %s3310_s12, %s5310_s0 }
  0x37   : > { %p3055_p11 = pneg %p5374_p6  ;;  %p3060_p7 = scmp.lt.u32.totalorder %s3058_s26, %s3053_s17 }
  0x38   : > { %p3062_p9 = scmp.lt.u32.totalorder %s3053_s17, %s3310_s12 }
  0x39   : > { %p3056_p12 = pnand %p3055_p11, %p3054_p4  ;;  %p3061_p3 = por %p3060_p7, %p3059_p0 }
  0x3b   : > { %p3057_p13 = pneg %p3056_p12  ;;  %p3063_p1 = por %p3062_p9, %p3061_p3 }
  0x3d   : > { %p3064_p5 = pnand %p3063_p1, %p3057_p13 }
  0x3f   : > { %3067 = shalt.err (!%p3064_p5)
}
  0x40   : > { %s3068_s23 = scalar_lea.vmem %s3312_s16, 1024  ;;  %s3161_s28 = smov [#allocation3]  }
  0x41   : > { %p3069_p2 = scmp.ne.s32.totalorder %s3312_s16, %s3068_s23  ;;  %s3073_s10 = sshll.u32 %s3161_s28, 4  ;;  %s3074_s10 = int_to_ptr.vmem [resolvable:$false] %s3073_s10 }
  0x42   : > { %s3075_s13 = scalar_lea.vmem %s3074_s10, 2048  ;;  %p3076_p4 = scmp.lt.s32.totalorder %s3312_s16, %s3074_s10 }
  0x43   : > { %p3071_p8 = pnand %p3069_p2, %p3055_p11  ;;  %p3077_p12 = scmp.lt.s32.totalorder %s3075_s13, %s3068_s23 }
  0x45   : > { %p3072_p10 = pneg %p3071_p8  ;;  %p3078_p0 = por %p3077_p12, %p3076_p4 }
  0x47   : > { %p3079_p7 = pnand %p3078_p0, %p3072_p10 }
  0x49   : > { %3082 = shalt.err (!%p3079_p7)
}
  0x4a   : > { %s3162_s17 = smov 128   ;;  %s3163_s14 = smov 8  }
  0x4b   : > { %2946 = dma.hbm_to_vmem [thread:$0]  (!%p5374_p6), %s3310_s12, 1024, %s3312_s16, %s3314_s11, %s3162_s17, %s3162_s17, %s3163_s14  }
  0x4c   : > { %p5375_p11 = scmp.ne.s32.totalorder %s5371_s7, 0 }
  0x4e   : > { %228 = sbr.rel (%p5375_p11) target bundleno = 1747 (0x6d3), region = 40 }
  0x55   : > { %s3345_s25 = sand.u32 1, %s3149_s19   ;;  %p5376_p13 = scmp.ne.s32.totalorder %s5368_s29, 0 }
  0x56   : > { %s2786_s26 = sshll.u32 %s3345_s25, 6  ;;  %s231_s8 = scalar_lea.sflag [#allocation4], %s3345_s25 }
  0x57   : > { %s234_s9 = scalar_lea.vmem [#allocation3], %s2786_s26 }
  0x58   : > { %3128 = dma.done.wait (%p5376_p13), %s231_s8, 1024  }
  0x59   : > { %3130 = vsyncadd (%p5376_p13), %s231_s8, 4294966272  ;;  %p5377_p3 = scmp.eq.s32.totalorder %s3228_s22, 0 }
  0x5b   : > { %3132 = dma.done.wait (%p5377_p3), [#allocation6], 16   ;;  %p5378_p6 = pmov %p5377_p3 }
  0x5c   : > { %p5379_p9 = pmov %p5377_p3 }
  0x5d   : > { %3134 = vsyncadd (%p5378_p6), [#allocation6], 4294967280 }
  0x5e   : > { %3136 = dma.done.wait (%p5379_p9), [#allocation9], 16   ;;  %p5380_p1 = pmov %p5377_p3 }
  0x60   : > { %3138 = vsyncadd (%p5380_p1), [#allocation9], 4294967280 }
  0x61   : > { %247 = sfence }
  0x62   : > { %v3361_v0 = vld [vmem:[%s234_s9 + $0x10] sm:$0xff]  ;;  %vm278_vm0 = vcmask 130048   ;;  %v3363_v1 = vld [vmem:[%s234_s9] sm:$0xff]  ;;  %v3365_v2 = vld [vmem:[%s234_s9 + $0x18] sm:$0xff]  ;;  %v3164_v54 = vmov 0.0   ;;  %vm3165_vm1 = vmmov 0  }
  0x63   : > { %v337_v3 = vsel %vm278_vm0, %v3361_v0, 0.0  ;;  %v331_v4 = vsel %vm278_vm0, %v3363_v1, 0.0  ;;  %v3371_v5 = vld [vmem:[%s234_s9 + $0x8] sm:$0xff]  ;;  %v340_v6 = vsel %vm278_vm0, %v3365_v2, 0.0  ;;  %v3379_v9 = vld [vmem:[%s234_s9 + $0x20] sm:$0xff]  ;;  %v3385_v12 = vld [vmem:[%s234_s9 + $0x38] sm:$0xff]  ;;  %2906 = vmatprep.subr.mxu0 %v3164_v54  ;;  %2911 = vmatprep.subr.mxu1 %v3164_v54 }
  0x64   : > { %338 = vadd.xlane.f32.xlu1 %v337_v3  ;;  %332 = vadd.xlane.f32.xlu0 %v331_v4  ;;  %v334_v7 = vsel %vm278_vm0, %v3371_v5, 0.0  ;;  %v3377_v8 = vld [vmem:[%s234_s9 + $0x28] sm:$0xff]  ;;  %v343_v11 = vsel %vm278_vm0, %v3379_v9, 0.0  ;;  %v3387_v13 = vld [vmem:[%s234_s9 + $0x30] sm:$0xff]  ;;  %v352_v14 = vsel %vm278_vm0, %v3385_v12, 0.0  ;;  %v282_v16 = vsel %vm278_vm0, %v3371_v5, -inf }
  0x65   : > { %v346_v10 = vsel %vm278_vm0, %v3377_v8, 0.0  ;;  %v349_v15 = vsel %vm278_vm0, %v3387_v13, 0.0  ;;  %v279_v17 = vsel %vm278_vm0, %v3363_v1, -inf  ;;  %v288_v18 = vsel %vm278_vm0, %v3365_v2, -inf  ;;  %2908 = vmatprep.mubr.msk.f32.mxu0 %vm3165_vm1, %v3164_v54  ;;  %2913 = vmatprep.mubr.msk.f32.mxu1 %vm3165_vm1, %v3164_v54  ;;  %s3166_s29 = smov 1   ;;  %s3167_s13 = smov 3  }
  0x66   : > { %v285_v19 = vsel %vm278_vm0, %v3361_v0, -inf  ;;  %v294_v20 = vsel %vm278_vm0, %v3377_v8, -inf  ;;  %v291_v21 = vsel %vm278_vm0, %v3379_v9, -inf  ;;  %v300_v22 = vsel %vm278_vm0, %v3385_v12, -inf  ;;  %s2801_s17 = sld [smem:[#allocation7 + $0x1]]  ;;  %s2802_s14 = sld [smem:[#allocation7 + $0x8]] }
  0x67   : > { %v297_v23 = vsel %vm278_vm0, %v3387_v13, -inf  ;;  %vm387_vm2 = vcmask 1040384   ;;  %vm389_vm3 = vcmask 1041408   ;;  %vm391_vm4 = vcmask 1042432   ;;  %s2808_s26 = sld [smem:[#allocation7 + $0x2]]  ;;  %s3168_s8 = smov 127  }
  0x68   : > { %341 = vadd.xlane.f32.xlu1 %v340_v6  ;;  %335 = vadd.xlane.f32.xlu0 %v334_v7  ;;  %vm400_vm5 = vcmask 7168   ;;  %vm408_vm6 = vcmask 1043456   ;;  %vm404_vm7 = vcmask 31744   ;;  %vm483_vm8 = vcmask 15360   ;;  %s2809_s9 = sld [smem:[#allocation7 + $0x9]]  ;;  %s2816_s7 = sld [smem:[#allocation7 + $0xa]] }
  0x69   : > { %vm560_vm9 = vcmask 11264   ;;  %vm624_vm10 = vcmask 179200   ;;  %vm627_vm11 = vcmask 177152   ;;  %vm640_vm12 = vcmask 154648   ;;  %s3169_s15 = smov 126   ;;  %s2822_s12 = sld [smem:[#allocation7 + $0x4]] }
  0x6a   : > { %625 = vst.msk [vmem:[#allocation2] sm:$0xff] %vm624_vm10, %v3164_v54  ;;  %626 = vst.msk [vmem:[#allocation2 + $0x8] sm:$0xff] %vm624_vm10, %v3164_v54  ;;  %s5355_s16 = smov 125   ;;  %vm679_vm13 = vcmask 1045504   ;;  %vm2634_vm14 = vcmask 1046528   ;;  %p5653_p2 = scmp.ne.s32.totalorder %s5369_s30, 0 }
  0x6b   : > { %629 = vst.msk [vmem:[#allocation2 + $0x18] sm:$0xff] %vm624_vm10, %v3164_v54  ;;  %630 = vst.msk [vmem:[#allocation2 + $0x20] sm:$0xff] %vm624_vm10, %v3164_v54 }
  0x6c   : > { %347 = vadd.xlane.f32.xlu1 %v346_v10  ;;  %344 = vadd.xlane.f32.xlu0 %v343_v11  ;;  %628 = vst.msk [vmem:[#allocation2 + $0x10] sm:$0x3f] %vm627_vm11, %v3164_v54  ;;  %631 = vst.msk [vmem:[#allocation2 + $0x28] sm:$0x3f] %vm627_vm11, %v3164_v54  ;;  %v762_v54 = vstv %s2801_s17  ;;  %s2836_s17 = sld [smem:[#allocation7 + $0x6]] }
  0x70   : > { %353 = vadd.xlane.f32.xlu1 %v352_v14  ;;  %350 = vadd.xlane.f32.xlu0 %v349_v15 }
  0x74   : > { %283 = vmax.xlane.f32.xlu1 %v282_v16  ;;  %280 = vmax.xlane.f32.xlu0 %v279_v17 }
  0x78   : > { %289 = vmax.xlane.f32.xlu1 %v288_v18  ;;  %286 = vmax.xlane.f32.xlu0 %v285_v19 }
  0x7c   : > { %295 = vmax.xlane.f32.xlu1 %v294_v20  ;;  %292 = vmax.xlane.f32.xlu0 %v291_v21 }
  0x80   : > { %301 = vmax.xlane.f32.xlu1 %v300_v22  ;;  %298 = vmax.xlane.f32.xlu0 %v297_v23 }
  0xf1   : > { %v339_v24 = vpop.xlane.xlu1 %338  ;;  %v333_v25 = vpop.xlane.xlu0 %332 }
  0xf5   : > { %v342_v26 = vpop.xlane.xlu1 %341  ;;  %v336_v27 = vpop.xlane.xlu0 %335 }
  0xf6   : > { %v362_v28 = vadd.f32 %v342_v26, %v339_v24  ;;  %v355_v29 = vadd.f32 %v336_v27, %v333_v25 }
  0xf8   : > { %v363_v30 = vrot.slane %v362_v28, 4  ;;  %v356_v31 = vrot.slane %v355_v29, 4 }
  0xf9   : > { %v348_v32 = vpop.xlane.xlu1 %347  ;;  %v345_v33 = vpop.xlane.xlu0 %344 }
  0xfa   : > { %v364_v34 = vadd.f32 %v363_v30, %v362_v28  ;;  %v357_v35 = vadd.f32 %v356_v31, %v355_v29  ;;  %v369_v36 = vadd.f32 %v348_v32, %v345_v33 }
  0xfc   : > { %v365_v37 = vrot.slane %v364_v34, 2  ;;  %v358_v38 = vrot.slane %v357_v35, 2  ;;  %v370_v39 = vrot.slane %v369_v36, 4 }
  0xfd   : > { %v354_v40 = vpop.xlane.xlu1 %353  ;;  %v351_v41 = vpop.xlane.xlu0 %350 }
  0xfe   : > { %v366_v42 = vadd.f32 %v365_v37, %v364_v34  ;;  %v359_v43 = vadd.f32 %v358_v38, %v357_v35  ;;  %v371_v44 = vadd.f32 %v370_v39, %v369_v36  ;;  %v376_v45 = vadd.f32 %v354_v40, %v351_v41 }
 0x100   : > { %v367_v46 = vrot.slane %v366_v42, 1  ;;  %v360_v47 = vrot.slane %v359_v43, 1  ;;  %v372_v48 = vrot.slane %v371_v44, 2  ;;  %v377_v49 = vrot.slane %v376_v45, 4 }
 0x101   : > { %v284_v50 = vpop.xlane.xlu1 %283  ;;  %v281_v51 = vpop.xlane.xlu0 %280 }
 0x102   : > { %v373_v52 = vadd.f32 %v372_v48, %v371_v44  ;;  %v378_v53 = vadd.f32 %v377_v49, %v376_v45  ;;  %v303_v55 = vmax.f32 %v281_v51, %v284_v50  ;;  %v368_v56 = vadd.f32 %v367_v46, %v366_v42 }
 0x103   : > { %v361_v57 = vadd.f32 %v360_v47, %v359_v43 }
 0x104   : > { %v374_v58 = vrot.slane %v373_v52, 1  ;;  %v379_v59 = vrot.slane %v378_v53, 2  ;;  %v304_v60 = vrot.slane %v303_v55, 4  ;;  %v384_v7 = vmul.f32 0.00390625, %v368_v56 }
 0x105   : > { %v290_v61 = vpop.xlane.xlu1 %289  ;;  %v287_v62 = vpop.xlane.xlu0 %286  ;;  %v383_v10 = vmul.f32 0.00390625, %v361_v57 }
 0x106   : > { %v375_v63 = vadd.f32 %v374_v58, %v373_v52  ;;  %v380_v3 = vadd.f32 %v379_v59, %v378_v53  ;;  %v310_v4 = vmax.f32 %v287_v62, %v290_v61  ;;  %v305_v6 = vmax.f32 %v303_v55, %v304_v60  ;;  %v402_v52 = vld [vmem:[%s5311_s1] sm:$0x3] }
 0x107   : > { %v393_v24 = vsel %vm387_vm2, %v383_v10, %v384_v7  ;;  %v403_v58 = vld [vmem:[%s5312_s2] sm:$0xf] }
 0x108   : > { %v381_v11 = vrot.slane %v380_v3, 1  ;;  %v311_v14 = vrot.slane %v310_v4, 4  ;;  %v385_v15 = vmul.f32 0.00390625, %v375_v63  ;;  %v306_v16 = vrot.slane %v305_v6, 2 }
 0x109   : > { %v296_v17 = vpop.xlane.xlu1 %295  ;;  %v293_v18 = vpop.xlane.xlu0 %292 }
 0x10a   : > { %v382_v19 = vadd.f32 %v381_v11, %v380_v3  ;;  %v312_v20 = vmax.f32 %v310_v4, %v311_v14  ;;  %v317_v21 = vmax.f32 %v293_v18, %v296_v17  ;;  %v307_v22 = vmax.f32 %v305_v6, %v306_v16 }
 0x10b   : > { %v394_v27 = vsel %vm389_vm3, %v393_v24, %v385_v15 }
 0x10c   : > { %v386_v23 = vmul.f32 0.00390625, %v382_v19  ;;  %v313_v25 = vrot.slane %v312_v20, 2  ;;  %v318_v26 = vrot.slane %v317_v21, 4  ;;  %v308_v28 = vrot.slane %v307_v22, 1 }
 0x10d   : > { %v302_v29 = vpop.xlane.xlu1 %301  ;;  %v299_v30 = vpop.xlane.xlu0 %298 }
 0x10e   : > { %v395_v31 = vsel %vm391_vm4, %v394_v27, %v386_v23  ;;  %v314_v32 = vmax.f32 %v312_v20, %v313_v25  ;;  %v319_v33 = vmax.f32 %v317_v21, %v318_v26  ;;  %v324_v34 = vmax.f32 %v299_v30, %v302_v29 }
 0x10f   : > { %397 = vrot.lane.b32.xlu0 %v395_v31, %s3166_s29  ;;  %v309_v38 = vmax.f32 %v307_v22, %v308_v28  ;;  %s2815_s29 = sld [smem:[#allocation7 + $0x3]] }
 0x110   : > { %v315_v35 = vrot.slane %v314_v32, 1  ;;  %v320_v36 = vrot.slane %v319_v33, 2  ;;  %v325_v37 = vrot.slane %v324_v34, 4 }
 0x112   : > { %v316_v39 = vmax.f32 %v314_v32, %v315_v35  ;;  %v321_v40 = vmax.f32 %v319_v33, %v320_v36  ;;  %v326_v41 = vmax.f32 %v324_v34, %v325_v37 }
 0x114   : > { %v322_v42 = vrot.slane %v321_v40, 1  ;;  %v327_v43 = vrot.slane %v326_v41, 2  ;;  %v388_v46 = vsel %vm387_vm2, %v309_v38, %v316_v39 }
 0x116   : > { %v323_v44 = vmax.f32 %v321_v40, %v322_v42  ;;  %v328_v45 = vmax.f32 %v326_v41, %v327_v43 }
 0x118   : > { %v329_v47 = vrot.slane %v328_v45, 1  ;;  %v390_v48 = vsel %vm389_vm3, %v388_v46, %v323_v44 }
 0x11a   : > { %v330_v49 = vmax.f32 %v328_v45, %v329_v47 }
 0x11c   : > { %v392_v50 = vsel %vm391_vm4, %v390_v48, %v330_v49 }
 0x181   : > { %v398_v51 = vpop.permute.xlu0 %397 }
 0x182   : > { %v401_v53 = vsel %vm400_vm5, %v392_v50, %v398_v51 }
 0x183   : > { %2907 = vmatpush3.msk.msra.mxu0 %vm408_vm6, %v401_v53 }
 0x184   : > { %2909 = vmatmul.mubr.msk.f32.vlgmr.msra.gmra.mrb[0].mxu0 %vm404_vm7, %v402_v52 }
 0x257   : > { %v478_v55 = vpop.f32.mrb[0].mxu0 }
 0x258   : > { %v482_v56 = vmax.f32 %v478_v55, 0.0  ;;  %v2910_v57 = vpop.f32.mrb[1].mxu0  ;;  %v776_v55 = vstv %s2802_s14  ;;  %s5347_s14 = smov 123  }
 0x25a   : > { %2912 = vmatpush3.msk.msra.mxu1 %vm389_vm3, %v482_v56 }
 0x25b   : > { %2914 = vmatmul.mubr.msk.f32.vlgmr.msra.gmra.mrb[0].mxu1 %vm483_vm8, %v403_v58 }
 0x32e   : > { %v556_v59 = vpop.f32.mrb[0].mxu1 }
 0x32f   : > { %v2915_v60 = vpop.f32.mrb[1].mxu1  ;;  %v561_v61 = vsel %vm560_vm9, %v556_v59, 0.0 }
 0x330   : > { %562 = vadd.xlane.f32.xlu1 %v561_v61 }
 0x3bd   : > { %v563_v62 = vpop.xlane.xlu1 %562 }
 0x3be   : > { %v2794_v63 = vmul.f32 -1.442695, %v563_v62  ;;  %v909_v62 = vstv %s2808_s26  ;;  %s2837_s26 = sld [smem:[#allocation7 + $0xd]] }
 0x3c0   : > { %3005 = vpow2.f32 %v2794_v63 }
 0x3ca   : > { %v3006_v3 = vpop.eup %3005 }
 0x3cb   : > { %v567_v4 = vadd.f32 1.0, %v3006_v3 }
 0x3cd   : > { %3007 = vrcp.f32 %v567_v4  ;;  %v923_v4 = vstv %s2809_s9  ;;  %s2825_s9 = sld [smem:[#allocation7 + $0x19]] }
 0x3d7   : > { %v3008_v6 = vpop.eup %3007 }
 0x3d8   : > { %2916 = vpush %v3008_v6  ;;  %v571_v7 = vrot.slane %v3008_v6, 1  ;;  %v572_v10 = vrot.slane %v3008_v6, 2  ;;  %v573_v11 = vrot.slane %v3008_v6, 3 }
 0x3da   : > { %2918 = vpush %v571_v7 }
 0x3db   : > { %2920 = vpush %v572_v10  ;;  %v1056_v10 = vstv %s2815_s29  ;;  %s2827_s29 = sld [smem:[#allocation7 + $0x27]] }
 0x3dc   : > { %2922 = vpush %v573_v11 }
 0x409   : > { %s2917_s11 = spop %2916 }
 0x40a   : > { %v575_v14 = vstv %s2917_s11  ;;  %s2823_s11 = sld [smem:[#allocation7 + $0xb]] }
 0x40b   : > { %s2919_s23 = spop %2918  ;;  %v586_v15 = vmul.f32 %v575_v14, %v3363_v1  ;;  %v587_v17 = vmul.f32 %v575_v14, %v3371_v5 }
 0x40c   : > { %v578_v16 = vstv %s2919_s23  ;;  %s2921_s28 = spop %2920  ;;  %s2829_s23 = sld [smem:[#allocation7 + $0x5]] }
 0x40d   : > { %s2923_s10 = spop %2922  ;;  %v588_v18 = vmul.f32 %v578_v16, %v3361_v0  ;;  %v589_v19 = vmul.f32 %v578_v16, %v3365_v2  ;;  %v581_v20 = vstv %s2921_s28  ;;  %v594_v1 = vsel %vm278_vm0, %v586_v15, -inf  ;;  %s2830_s28 = sld [smem:[#allocation7 + $0xc]] }
 0x40e   : > { %v584_v21 = vstv %s2923_s10  ;;  %v590_v22 = vmul.f32 %v581_v20, %v3379_v9  ;;  %v591_v23 = vmul.f32 %v581_v20, %v3377_v8  ;;  %v608_v26 = vsel %vm278_vm0, %v586_v15, 0.0  ;;  %s5353_s10 = smov 124  }
 0x40f   : > { %v592_v24 = vmul.f32 %v584_v21, %v3387_v13  ;;  %v593_v25 = vmul.f32 %v584_v21, %v3385_v12  ;;  %v609_v5 = vsel %vm278_vm0, %v588_v18, 0.0  ;;  %v616_v0 = vsel %vm278_vm0, %v589_v19, 0.0 }
 0x410   : > { %v615_v2 = vsel %vm278_vm0, %v587_v17, 0.0  ;;  %v595_v27 = vsel %vm278_vm0, %v588_v18, -inf  ;;  %v610_v28 = vadd.f32 %v609_v5, %v608_v26  ;;  %v596_v9 = vsel %vm278_vm0, %v590_v22, -inf }
 0x411   : > { %v602_v8 = vsel %vm278_vm0, %v589_v19, -inf  ;;  %v617_v13 = vadd.f32 %v616_v0, %v615_v2  ;;  %v597_v29 = vmax.f32 %v594_v1, %v596_v9  ;;  %v611_v12 = vsel %vm278_vm0, %v590_v22, 0.0 }
 0x412   : > { %v603_v30 = vsel %vm278_vm0, %v591_v23, -inf  ;;  %v612_v31 = vadd.f32 %v611_v12, %v610_v28  ;;  %v598_v32 = vsel %vm278_vm0, %v592_v24, -inf  ;;  %v605_v33 = vsel %vm278_vm0, %v593_v25, -inf }
 0x413   : > { %v599_v34 = vmax.f32 %v595_v27, %v598_v32  ;;  %v613_v35 = vsel %vm278_vm0, %v592_v24, 0.0  ;;  %v601_v36 = vsel %vm278_vm0, %v587_v17, -inf  ;;  %v618_v37 = vsel %vm278_vm0, %v591_v23, 0.0 }
 0x414   : > { %v614_v38 = vadd.f32 %v613_v35, %v612_v31  ;;  %v604_v39 = vmax.f32 %v601_v36, %v603_v30  ;;  %v619_v40 = vadd.f32 %v618_v37, %v617_v13  ;;  %v606_v41 = vmax.f32 %v602_v8, %v605_v33 }
 0x415   : > { %v600_v42 = vmax.f32 %v597_v29, %v599_v34  ;;  %v620_v44 = vsel %vm278_vm0, %v593_v25, 0.0  ;;  %v1070_v15 = vstv %s2816_s7  ;;  %v1203_v20 = vstv %s2822_s12  ;;  %s2806_s7 = sld [smem:[#allocation7 + $0x24]]  ;;  %s3519_s12 = sld [smem:[#allocation7 + $0x17]] }
 0x416   : > { %v622_v43 = vmul.f32 0.25, %v614_v38  ;;  %v621_v45 = vadd.f32 %v620_v44, %v619_v40  ;;  %v607_v46 = vmax.f32 %v604_v39, %v606_v41  ;;  %v1217_v23 = vstv %s2823_s11  ;;  %s2832_s11 = sld [smem:[#allocation7 + $0x1a]] }
 0x417   : > { %634 = vrot.lane.b32.xlu1 %v600_v42, %s3167_s13  ;;  %v1350_v1 = vstv %s2829_s23  ;;  %v1364_v0 = vstv %s2830_s28  ;;  %v1497_v29 = vstv %s2836_s17  ;;  %s2804_s23 = sld [smem:[#allocation7 + $0x16]]  ;;  %s5351_s28 = smov 122  }
 0x418   : > { %645 = vrot.lane.b32.xlu0 %v622_v43, %s3167_s13  ;;  %v623_v47 = vmul.f32 0.25, %v621_v45  ;;  %v1511_v31 = vstv %s2837_s26  ;;  %v3526_v32 = vstv %s2825_s9  ;;  %v3528_v33 = vstv %s2827_s29  ;;  %s2834_s17 = sld [smem:[#allocation7 + $0x28]]  ;;  %s2839_s9 = sld [smem:[#allocation7 + $0x1b]] }
 0x419   : > { %s2818_s26 = sld [smem:[#allocation7 + $0x18]]  ;;  %s2803_s29 = sld [smem:[#allocation7 + $0xf]] }
 0x41b   : > { %636 = vrot.lane.b32.xlu1 %v607_v46, %s3167_s13  ;;  %v3551_v41 = vstv %s2806_s7  ;;  %s2841_s7 = sld [smem:[#allocation7 + $0x29]] }
 0x41f   : > { %647 = vrot.lane.b32.xlu1 %v623_v47, %s3167_s13  ;;  %s2820_s13 = sld [smem:[#allocation7 + $0x26]] }
 0x425   : > { %v3507_v28 = vstv %s2820_s13  ;;  %s2813_s13 = sld [smem:[#allocation7 + $0x25]] }
 0x489   : > { %v635_v48 = vpop.permute.xlu1 %634 }
 0x48a   : > { %641 = vst.msk [vmem:[#allocation2 + $0x3] sm:$0xff] %vm640_vm12, %v635_v48  ;;  %v646_v49 = vpop.permute.xlu0 %645  ;;  %v3571_v48 = vstv %s3519_s12  ;;  %s2805_s12 = sld [smem:[#allocation7 + $0x1d]] }
 0x48b   : > { %652 = vst.msk [vmem:[#allocation2 + $0x1b] sm:$0xff] %vm640_vm12, %v646_v49  ;;  %v3573_v49 = vstv %s2832_s11  ;;  %s2807_s11 = sld [smem:[#allocation7 + $0x2b]] }
 0x48d   : > { %v637_v50 = vpop.permute.xlu1 %636 }
 0x48e   : > { %642 = vst.msk [vmem:[#allocation2 + $0xb] sm:$0xff] %vm640_vm12, %v637_v50 }
 0x491   : > { %v3457_v51 = vld [vmem:[#allocation2] sm:$0xff]  ;;  %v648_v52 = vpop.permute.xlu1 %647 }
 0x492   : > { %653 = vst.msk [vmem:[#allocation2 + $0x23] sm:$0xff] %vm640_vm12, %v648_v52  ;;  %v763_v53 = vmul.f32 %v762_v54, %v3457_v51  ;;  %v777_v57 = vmul.f32 %v776_v55, %v3457_v51  ;;  %v910_v3 = vmul.f32 %v909_v62, %v3457_v51  ;;  %v924_v7 = vmul.f32 %v923_v4, %v3457_v51 }
 0x493   : > { %v1057_v11 = vmul.f32 %v1056_v10, %v3457_v51  ;;  %v1071_v16 = vmul.f32 %v1070_v15, %v3457_v51  ;;  %v1204_v22 = vmul.f32 %v1203_v20, %v3457_v51  ;;  %v1218_v25 = vmul.f32 %v1217_v23, %v3457_v51 }
 0x494   : > { %767 = vrot.lane.b32.xlu0 %v763_v53, %s3168_s8  ;;  %v1351_v26 = vmul.f32 %v1350_v1, %v3457_v51  ;;  %v1365_v2 = vmul.f32 %v1364_v0, %v3457_v51  ;;  %v1498_v35 = vmul.f32 %v1497_v29, %v3457_v51  ;;  %v1512_v40 = vmul.f32 %v1511_v31, %v3457_v51 }
 0x495   : > { %v3461_v56 = vld [vmem:[#allocation2 + $0x8] sm:$0xff]  ;;  %v3465_v59 = vld [vmem:[#allocation2 + $0x10] sm:$0x3f]  ;;  %v3577_v52 = vstv %s2804_s23  ;;  %s2810_s23 = sld [smem:[#allocation7 + $0x10]] }
 0x496   : > { %v764_v58 = vmul.f32 %v762_v54, %v3461_v56  ;;  %v779_v60 = vmul.f32 %v776_v55, %v3465_v59  ;;  %v778_v61 = vmul.f32 %v776_v55, %v3461_v56  ;;  %v911_v63 = vmul.f32 %v909_v62, %v3461_v56 }
 0x497   : > { %v925_v6 = vmul.f32 %v923_v4, %v3461_v56  ;;  %v926_v14 = vmul.f32 %v923_v4, %v3465_v59  ;;  %v1058_v17 = vmul.f32 %v1056_v10, %v3461_v56  ;;  %v1073_v18 = vmul.f32 %v1070_v15, %v3465_v59 }
 0x498   : > { %783 = vrot.lane.b32.xlu0 %v777_v57, %s3168_s8  ;;  %769 = vrot.lane.b32.xlu1 %v764_v58, %s3168_s8  ;;  %v1072_v19 = vmul.f32 %v1070_v15, %v3461_v56  ;;  %v1205_v21 = vmul.f32 %v1203_v20, %v3461_v56  ;;  %v1219_v24 = vmul.f32 %v1217_v23, %v3461_v56 }
 0x499   : > { %v1220_v5 = vmul.f32 %v1217_v23, %v3465_v59  ;;  %v1352_v27 = vmul.f32 %v1350_v1, %v3461_v56  ;;  %v3513_v9 = vmul.f32 %v3507_v28, %v3465_v59  ;;  %v1367_v8 = vmul.f32 %v1364_v0, %v3465_v59 }
 0x49a   : > { %v1366_v13 = vmul.f32 %v1364_v0, %v3461_v56  ;;  %v3524_v30 = vmul.f32 %v3507_v28, %v3461_v56  ;;  %v1499_v34 = vmul.f32 %v1497_v29, %v3461_v56  ;;  %v3534_v36 = vmul.f32 %v3526_v32, %v3465_v59 }
 0x49b   : > { %v1167_v12 = vrot.slane %v3513_v9, 4  ;;  %v3539_v38 = vmul.f32 %v3528_v33, %v3465_v59  ;;  %v1513_v42 = vmul.f32 %v1511_v31, %v3461_v56  ;;  %v3556_v43 = vmul.f32 %v3551_v41, %v3465_v59 }
 0x49c   : > { %787 = vrot.lane.b32.xlu0 %v779_v60, %s3168_s8  ;;  %785 = vrot.lane.b32.xlu1 %v778_v61, %s3168_s8  ;;  %v1165_v37 = vrot.slane %v3524_v30, 4  ;;  %v1268_v44 = vrot.slane %v3534_v36, 2  ;;  %v3561_v45 = vmul.f32 %v3526_v32, %v3461_v56  ;;  %v3566_v47 = vmul.f32 %v3528_v33, %v3461_v56 }
 0x49d   : > { %v1314_v46 = vrot.slane %v3539_v38, 4  ;;  %v1514_v54 = vmul.f32 %v1511_v31, %v3465_v59  ;;  %v1408_v53 = vmul.f32 %v3573_v49, %v3465_v59  ;;  %v873_v57 = vrot.slane %v3556_v43, 4 }
 0x49e   : > { %v3548_v39 = vsel %vm408_vm6, %v1165_v37, %v1167_v12  ;;  %v1266_v50 = vrot.slane %v3561_v45, 2  ;;  %v1312_v55 = vrot.slane %v3566_v47, 4  ;;  %v3585_v58 = vmul.f32 %v3571_v48, %v3465_v59 }
 0x49f   : > { %v3589_v60 = vmul.f32 %v3577_v52, %v3465_v59  ;;  %v1415_v4 = vrot.slane %v1408_v53, 2  ;;  %v796_v0 = vstv %s2803_s29  ;;  %v842_v36 = vstv %s2805_s12  ;;  %s2821_s29 = sld [smem:[#allocation7 + $0x2d]]  ;;  %s2826_s12 = sld [smem:[#allocation7 + $0x20]] }
 0x4a0   : > { %916 = vrot.lane.b32.xlu0 %v911_v63, %s3169_s15  ;;  %914 = vrot.lane.b32.xlu1 %v910_v3, %s3169_s15  ;;  %v3594_v61 = vsel %vm679_vm13, %v1266_v50, %v1268_v44  ;;  %v3599_v62 = vsel %vm408_vm6, %v1312_v55, %v1314_v46  ;;  %v3605_v63 = vstv %s2813_s13  ;;  %v3607_v3 = vstv %s2834_s17  ;;  %s2812_s13 = sld [smem:[#allocation7 + $0x1e]]  ;;  %s2814_s17 = sld [smem:[#allocation7 + $0x2c]] }
 0x4a1   : > { %v827_v10 = vrot.slane %v3589_v60, 2  ;;  %v799_v9 = vmul.f32 %v796_v0, %v3465_v59 }
 0x4a3   : > { %v806_v31 = vrot.slane %v799_v9, 2  ;;  %v888_v9 = vstv %s2807_s11  ;;  %s2828_s11 = sld [smem:[#allocation7 + $0x2e]] }
 0x4a4   : > { %932 = vrot.lane.b32.xlu0 %v925_v6, %s3169_s15  ;;  %930 = vrot.lane.b32.xlu1 %v924_v7, %s3169_s15  ;;  %v3611_v6 = vmul.f32 %v3573_v49, %v3461_v56  ;;  %v974_v7 = vrot.slane %v3585_v58, 2 }
 0x4a6   : > { %v1413_v15 = vrot.slane %v3611_v6, 2 }
 0x4a8   : > { %1061 = vrot.lane.b32.xlu0 %v1057_v11, %s5355_s16  ;;  %934 = vrot.lane.b32.xlu1 %v926_v14, %s3169_s15  ;;  %v3617_v11 = vmul.f32 %v3605_v63, %v3465_v59  ;;  %v1454_v14 = vmul.f32 %v3607_v3, %v3465_v59 }
 0x4aa   : > { %v1461_v20 = vrot.slane %v1454_v14, 4 }
 0x4ac   : > { %1077 = vrot.lane.b32.xlu0 %v1071_v16, %s5355_s16  ;;  %1063 = vrot.lane.b32.xlu1 %v1058_v17, %s5355_s16  ;;  %v3626_v16 = vstv %s2818_s26  ;;  %v3631_v17 = vsel %vm679_vm13, %v1413_v15, %v1415_v4  ;;  %s2817_s26 = sld [smem:[#allocation7 + $0x11]] }
 0x4b0   : > { %1081 = vrot.lane.b32.xlu0 %v1073_v18, %s5355_s16  ;;  %1079 = vrot.lane.b32.xlu1 %v1072_v19, %s5355_s16  ;;  %v1020_v18 = vrot.slane %v3617_v11, 4  ;;  %v3636_v19 = vmul.f32 %v3626_v16, %v3465_v59 }
 0x4b2   : > { %v1090_v58 = vstv %s2817_s26  ;;  %s2838_s26 = sld [smem:[#allocation7 + $0x14]] }
 0x4b4   : > { %1210 = vrot.lane.b32.xlu0 %v1205_v21, %s5353_s10  ;;  %1208 = vrot.lane.b32.xlu1 %v1204_v22, %s5353_s10  ;;  %v3640_v21 = vmul.f32 %v3607_v3, %v3461_v56  ;;  %v3642_v22 = vstv %s2839_s9  ;;  %s2819_s9 = sld [smem:[#allocation7 + $0x1f]] }
 0x4b5   : > { %v1555_v23 = vmul.f32 %v3642_v22, %v3465_v59 }
 0x4b8   : > { %1226 = vrot.lane.b32.xlu0 %v1219_v24, %s5353_s10  ;;  %1224 = vrot.lane.b32.xlu1 %v1218_v25, %s5353_s10  ;;  %v1459_v24 = vrot.slane %v3640_v21, 4  ;;  %v1121_v25 = vrot.slane %v3636_v19, 2 }
 0x4ba   : > { %v3657_v1 = vsel %vm408_vm6, %v1459_v24, %v1461_v20 }
 0x4bc   : > { %1355 = vrot.lane.b32.xlu0 %v1351_v26, %s5347_s14  ;;  %1228 = vrot.lane.b32.xlu1 %v1220_v5, %s5353_s10  ;;  %v1562_v26 = vrot.slane %v1555_v23, 2  ;;  %v3665_v5 = vmul.f32 %v3642_v22, %v3461_v56  ;;  %v845_v23 = vmul.f32 %v842_v36, %v3465_v59 }
 0x4c0   : > { %1371 = vrot.lane.b32.xlu0 %v1365_v2, %s5347_s14  ;;  %1357 = vrot.lane.b32.xlu1 %v1352_v27, %s5347_s14  ;;  %v1560_v2 = vrot.slane %v3665_v5, 2  ;;  %v798_v27 = vmul.f32 %v796_v0, %v3461_v56 }
 0x4c4   : > { %1375 = vrot.lane.b32.xlu0 %v1367_v8, %s5347_s14  ;;  %1373 = vrot.lane.b32.xlu1 %v1366_v13, %s5347_s14  ;;  %v3675_v8 = vsel %vm679_vm13, %v1560_v2, %v1562_v26  ;;  %v3677_v13 = vstv %s2841_s7  ;;  %s2824_s7 = sld [smem:[#allocation7 + $0x12]] }
 0x4c5   : > { %v3681_v29 = vmul.f32 %v3677_v13, %v3465_v59 }
 0x4c7   : > { %v1608_v38 = vrot.slane %v3681_v29, 4 }
 0x4c8   : > { %1504 = vrot.lane.b32.xlu0 %v1499_v34, %s5351_s28  ;;  %1502 = vrot.lane.b32.xlu1 %v1498_v35, %s5351_s28  ;;  %v819_v34 = vmul.f32 %v3577_v52, %v3461_v56  ;;  %v797_v35 = vmul.f32 %v796_v0, %v3457_v51 }
 0x4ca   : > { %v803_v53 = vrot.slane %v797_v35, 2  ;;  %v891_v35 = vmul.f32 %v888_v9, %v3465_v59 }
 0x4cc   : > { %1520 = vrot.lane.b32.xlu0 %v1513_v42, %s5351_s28  ;;  %1518 = vrot.lane.b32.xlu1 %v1512_v40, %s5351_s28  ;;  %v844_v40 = vmul.f32 %v842_v36, %v3461_v56 }
 0x4ce   : > { %v850_v60 = vrot.slane %v844_v40, 4  ;;  %v943_v40 = vstv %s2810_s23  ;;  %s2831_s23 = sld [smem:[#allocation7 + $0x13]] }
 0x4d0   : > { %879 = vrot.lane.b32.xlu0 %v873_v57, %s3168_s8  ;;  %1522 = vrot.lane.b32.xlu1 %v1514_v54, %s5351_s28  ;;  %v818_v54 = vmul.f32 %v3577_v52, %v3457_v51  ;;  %v864_v52 = vmul.f32 %v3551_v41, %v3457_v51 }
 0x4d2   : > { %v824_v0 = vrot.slane %v818_v54, 2  ;;  %v898_v54 = vrot.slane %v891_v35, 6 }
 0x4d4   : > { %980 = vrot.lane.b32.xlu0 %v974_v7, %s3169_s15  ;;  %833 = vrot.lane.b32.xlu1 %v827_v10, %s3168_s8 }
 0x4d8   : > { %1173 = vrot.lane.b32.xlu0 %v1167_v12, %s5355_s16  ;;  %1026 = vrot.lane.b32.xlu1 %v1020_v18, %s3169_s15  ;;  %v804_v12 = vrot.slane %v798_v27, 2 }
 0x4da   : > { %v807_v42 = vsel %vm679_vm13, %v804_v12, %v806_v31  ;;  %v805_v14 = vsel %vm679_vm13, %v803_v53, %v804_v12  ;;  %v852_v31 = vrot.slane %v845_v23, 4  ;;  %v944_v53 = vmul.f32 %v943_v40, %v3457_v51 }
 0x4dc   : > { %1274 = vrot.lane.b32.xlu0 %v1268_v44, %s5353_s10  ;;  %1127 = vrot.lane.b32.xlu1 %v1121_v25, %s5355_s16  ;;  %v825_v44 = vrot.slane %v819_v34, 2  ;;  %v890_v34 = vmul.f32 %v888_v9, %v3461_v56 }
 0x4e0   : > { %1467 = vrot.lane.b32.xlu0 %v1461_v20, %s5347_s14  ;;  %1320 = vrot.lane.b32.xlu1 %v1314_v46, %s5353_s10  ;;  %v843_v46 = vmul.f32 %v842_v36, %v3457_v51  ;;  %v865_v20 = vmul.f32 %v3551_v41, %v3461_v56  ;;  %v870_v36 = vrot.slane %v864_v52, 4 }
 0x4e2   : > { %v871_v12 = vrot.slane %v865_v20, 4 }
 0x4e4   : > { %1568 = vrot.lane.b32.xlu0 %v1562_v26, %s5351_s28  ;;  %1421 = vrot.lane.b32.xlu1 %v1415_v4, %s5347_s14  ;;  %v828_v4 = vsel %vm679_vm13, %v825_v44, %v827_v10  ;;  %v849_v26 = vrot.slane %v843_v46, 4  ;;  %v826_v10 = vsel %vm679_vm13, %v824_v0, %v825_v44  ;;  %v872_v41 = vsel %vm408_vm6, %v870_v36, %v871_v12 }
 0x4e5   : > { %v853_v44 = vsel %vm408_vm6, %v850_v60, %v852_v31  ;;  %v896_v46 = vrot.slane %v890_v34, 6  ;;  %v874_v23 = vsel %vm408_vm6, %v871_v12, %v873_v57  ;;  %v950_v0 = vrot.slane %v944_v53, 2 }
 0x4e6   : > { %v851_v27 = vsel %vm408_vm6, %v849_v26, %v850_v60  ;;  %v966_v60 = vmul.f32 %v3571_v48, %v3461_v56  ;;  %v946_v26 = vmul.f32 %v943_v40, %v3465_v59  ;;  %v989_v57 = vstv %s2812_s13  ;;  %s2833_s13 = sld [smem:[#allocation7 + $0x21]] }
 0x4e7   : > { %v899_v20 = vsel %vm389_vm3, %v896_v46, %v898_v54  ;;  %v991_v31 = vmul.f32 %v989_v57, %v3461_v56  ;;  %v992_v34 = vmul.f32 %v989_v57, %v3465_v59 }
 0x4e8   : > { %810 = vrot.lane.b32.xlu0 %v807_v42, %s3168_s8  ;;  %1614 = vrot.lane.b32.xlu1 %v1608_v38, %s5351_s28  ;;  %v945_v42 = vmul.f32 %v943_v40, %v3461_v56  ;;  %v953_v12 = vrot.slane %v946_v26, 2 }
 0x4ec   : > { %831 = vrot.lane.b32.xlu0 %v828_v4, %s3168_s8  ;;  %808 = vrot.lane.b32.xlu1 %v805_v14, %s3168_s8  ;;  %v889_v4 = vmul.f32 %v888_v9, %v3457_v51  ;;  %v951_v14 = vrot.slane %v945_v42, 2  ;;  %v972_v9 = vrot.slane %v966_v60, 2  ;;  %v997_v42 = vrot.slane %v991_v31, 4 }
 0x4ee   : > { %v895_v52 = vrot.slane %v889_v4, 6  ;;  %v954_v40 = vsel %vm679_vm13, %v951_v14, %v953_v12 }
 0x4f0   : > { %854 = vrot.lane.b32.xlu0 %v851_v27, %s3168_s8  ;;  %829 = vrot.lane.b32.xlu1 %v826_v10, %s3168_s8  ;;  %v965_v27 = vmul.f32 %v3571_v48, %v3457_v51  ;;  %v952_v10 = vsel %vm679_vm13, %v950_v0, %v951_v14  ;;  %v897_v43 = vsel %vm389_vm3, %v895_v52, %v896_v46  ;;  %v1035_v46 = vstv %s2814_s17  ;;  %s2835_s17 = sld [smem:[#allocation7 + $0x2f]] }
 0x4f1   : > { %v1012_v48 = vmul.f32 %v3605_v63, %v3461_v56  ;;  %v1037_v53 = vmul.f32 %v1035_v46, %v3461_v56  ;;  %v1036_v14 = vmul.f32 %v1035_v46, %v3457_v51 }
 0x4f2   : > { %v971_v35 = vrot.slane %v965_v27, 2  ;;  %v1092_v27 = vmul.f32 %v1090_v58, %v3461_v56 }
 0x4f3   : > { %v1018_v54 = vrot.slane %v1012_v48, 4  ;;  %v1043_v52 = vrot.slane %v1037_v53, 6  ;;  %v1113_v48 = vmul.f32 %v3626_v16, %v3461_v56 }
 0x4f4   : > { %875 = vrot.lane.b32.xlu0 %v872_v41, %s3168_s8  ;;  %856 = vrot.lane.b32.xlu1 %v853_v44, %s3168_s8  ;;  %v973_v36 = vsel %vm679_vm13, %v971_v35, %v972_v9  ;;  %v999_v41 = vrot.slane %v992_v34, 4  ;;  %v990_v44 = vmul.f32 %v989_v57, %v3457_v51  ;;  %v1098_v31 = vrot.slane %v1092_v27, 2 }
 0x4f5   : > { %v1021_v0 = vsel %vm408_vm6, %v1018_v54, %v1020_v18 }
 0x4f6   : > { %v1000_v4 = vsel %vm408_vm6, %v997_v42, %v999_v41  ;;  %v996_v60 = vrot.slane %v990_v44, 4  ;;  %v1136_v41 = vstv %s2819_s9  ;;  %s2840_s9 = sld [smem:[#allocation7 + $0x22]] }
 0x4f7   : > { %v1138_v53 = vmul.f32 %v1136_v41, %v3461_v56 }
 0x4f8   : > { %902 = vrot.lane.b32.xlu0 %v899_v20, %s3168_s8  ;;  %877 = vrot.lane.b32.xlu1 %v874_v23, %s3168_s8  ;;  %v975_v20 = vsel %vm679_vm13, %v972_v9, %v974_v7  ;;  %v1011_v23 = vmul.f32 %v3605_v63, %v3457_v51  ;;  %v998_v7 = vsel %vm408_vm6, %v996_v60, %v997_v42  ;;  %v1042_v63 = vrot.slane %v1036_v14, 6 }
 0x4f9   : > { %v1112_v14 = vmul.f32 %v3626_v16, %v3457_v51 }
 0x4fa   : > { %v1017_v57 = vrot.slane %v1011_v23, 4  ;;  %v1044_v9 = vsel %vm389_vm3, %v1042_v63, %v1043_v52 }
 0x4fb   : > { %v1118_v16 = vrot.slane %v1112_v14, 2 }
 0x4fc   : > { %955 = vrot.lane.b32.xlu0 %v952_v10, %s3169_s15  ;;  %900 = vrot.lane.b32.xlu1 %v897_v43, %s3168_s8  ;;  %v1093_v10 = vmul.f32 %v1090_v58, %v3465_v59  ;;  %v1038_v43 = vmul.f32 %v1035_v46, %v3465_v59  ;;  %v1019_v12 = vsel %vm408_vm6, %v1017_v57, %v1018_v54  ;;  %v1119_v54 = vrot.slane %v1113_v48, 2 }
 0x4fe   : > { %v1100_v34 = vrot.slane %v1093_v10, 2  ;;  %v1045_v35 = vrot.slane %v1038_v43, 6  ;;  %v1158_v10 = vmul.f32 %v3507_v28, %v3457_v51  ;;  %v1182_v43 = vstv %s2821_s29  ;;  %s2842_s29 = sld [smem:[#allocation7 + $0x30]] }
 0x500   : > { %976 = vrot.lane.b32.xlu0 %v973_v36, %s3169_s15  ;;  %957 = vrot.lane.b32.xlu1 %v954_v40, %s3169_s15  ;;  %v1091_v36 = vmul.f32 %v1090_v58, %v3457_v51  ;;  %v1101_v44 = vsel %vm679_vm13, %v1098_v31, %v1100_v34  ;;  %v1046_v46 = vsel %vm389_vm3, %v1043_v52, %v1045_v35  ;;  %v1144_v58 = vrot.slane %v1138_v53, 4 }
 0x501   : > { %v1164_v34 = vrot.slane %v1158_v10, 4 }
 0x504   : > { %1003 = vrot.lane.b32.xlu0 %v1000_v4, %s3169_s15  ;;  %978 = vrot.lane.b32.xlu1 %v975_v20, %s3169_s15  ;;  %v1097_v4 = vrot.slane %v1091_v36, 2  ;;  %v1137_v20 = vmul.f32 %v1136_v41, %v3457_v51  ;;  %v1237_v36 = vstv %s2824_s7  ;;  %s3978_s7 = sld [smem:[#allocation7 + $0x32]] }
 0x505   : > { %v1238_v53 = vmul.f32 %v1237_v36, %v3457_v51 }
 0x506   : > { %v3754_v26 = vpop.permute.xlu0 %767  ;;  %v1099_v52 = vsel %vm679_vm13, %v1097_v4, %v1098_v31  ;;  %v1143_v27 = vrot.slane %v1137_v20, 4  ;;  %v1185_v31 = vmul.f32 %v1182_v43, %v3465_v59  ;;  %v1183_v4 = vmul.f32 %v1182_v43, %v3457_v51 }
 0x508   : > { %1024 = vrot.lane.b32.xlu0 %v1021_v0, %s3169_s15  ;;  %1001 = vrot.lane.b32.xlu1 %v998_v7, %s3169_s15  ;;  %v1122_v0 = vsel %vm679_vm13, %v1119_v54, %v1121_v25  ;;  %v1139_v7 = vmul.f32 %v1136_v41, %v3465_v59  ;;  %v1184_v25 = vmul.f32 %v1182_v43, %v3461_v56 }
 0x509   : > { %v1145_v57 = vsel %vm408_vm6, %v1143_v27, %v1144_v58  ;;  %v1166_v41 = vsel %vm408_vm6, %v1164_v34, %v1165_v37  ;;  %v1283_v27 = vstv %s2826_s12  ;;  %s2851_s12 = sld [smem:[#allocation7 + $0x39]] }
 0x50a   : > { %v3765_v11 = vpop.permute.xlu0 %783  ;;  %v3767_v18 = vpop.permute.xlu1 %769  ;;  %v1190_v48 = vrot.slane %v1184_v25, 6  ;;  %v1285_v43 = vmul.f32 %v1283_v27, %v3461_v56 }
 0x50b   : > { %5381 = vst [vmem:[#allocation15_spill] sm:$0xff] %v3765_v11 }
 0x50c   : > { %1047 = vrot.lane.b32.xlu0 %v1044_v9, %s3169_s15  ;;  %1022 = vrot.lane.b32.xlu1 %v1019_v12, %s3169_s15  ;;  %v1120_v9 = vsel %vm679_vm13, %v1118_v16, %v1119_v54  ;;  %v1146_v12 = vrot.slane %v1139_v7, 4  ;;  %v1239_v54 = vmul.f32 %v1237_v36, %v3461_v56  ;;  %v1259_v7 = vmul.f32 %v3526_v32, %v3457_v51 }
 0x50e   : > { %v3776_v40 = vpop.permute.xlu0 %787  ;;  %v3778_v42 = vpop.permute.xlu1 %785  ;;  %v1245_v37 = vrot.slane %v1239_v54, 2  ;;  %v1265_v32 = vrot.slane %v1259_v7, 2 }
 0x50f   : > { %5382 = vst [vmem:[#allocation16_spill] sm:$0xff] %v3778_v42 }
 0x510   : > { %1104 = vrot.lane.b32.xlu0 %v1101_v44, %s5355_s16  ;;  %1049 = vrot.lane.b32.xlu1 %v1046_v46, %s3169_s15  ;;  %v1147_v44 = vsel %vm408_vm6, %v1144_v58, %v1146_v12  ;;  %v1192_v46 = vrot.slane %v1185_v31, 6  ;;  %v1189_v58 = vrot.slane %v1183_v4, 6  ;;  %v1267_v34 = vsel %vm679_vm13, %v1265_v32, %v1266_v50 }
 0x512   : > { %v3788_v23 = vpop.permute.xlu0 %916  ;;  %v3790_v60 = vpop.permute.xlu1 %914  ;;  %v1193_v30 = vsel %vm389_vm3, %v1190_v48, %v1192_v46 }
 0x513   : > { %5383 = vst [vmem:[#allocation17_spill] sm:$0xff] %v3788_v23 }
 0x514   : > { %1125 = vrot.lane.b32.xlu0 %v1122_v0, %s5355_s16  ;;  %1102 = vrot.lane.b32.xlu1 %v1099_v52, %s5355_s16  ;;  %v1240_v0 = vmul.f32 %v1237_v36, %v3465_v59  ;;  %v1244_v52 = vrot.slane %v1238_v53, 2  ;;  %v1329_v53 = vstv %s2828_s11  ;;  %s2857_s11 = sld [smem:[#allocation7 + $0x33]] }
 0x515   : > { %v1331_v45 = vmul.f32 %v1329_v53, %v3461_v56 }
 0x516   : > { %v3801_v63 = vpop.permute.xlu0 %932  ;;  %v3803_v19 = vpop.permute.xlu1 %930  ;;  %v1246_v25 = vsel %vm679_vm13, %v1244_v52, %v1245_v37 }
 0x517   : > { %5384 = vst [vmem:[#allocation18_spill] sm:$0xff] %v3801_v63  ;;  %5385 = vst [vmem:[#allocation19_spill] sm:$0xff] %v3803_v19 }
 0x518   : > { %1148 = vrot.lane.b32.xlu0 %v1145_v57, %s5355_s16  ;;  %1123 = vrot.lane.b32.xlu1 %v1120_v9, %s5355_s16  ;;  %v1191_v57 = vsel %vm389_vm3, %v1189_v58, %v1190_v48  ;;  %v1247_v9 = vrot.slane %v1240_v0, 2  ;;  %v1291_v48 = vrot.slane %v1285_v43, 4  ;;  %v1384_v0 = vstv %s2831_s23  ;;  %s2858_s23 = sld [smem:[#allocation7 + $0x3a]] }
 0x519   : > { %v1386_v7 = vmul.f32 %v1384_v0, %v3461_v56  ;;  %v1337_v43 = vrot.slane %v1331_v45, 6 }
 0x51a   : > { %v3811_v28 = vpop.permute.xlu0 %1061  ;;  %v3813_v35 = vpop.permute.xlu1 %934  ;;  %v1248_v36 = vsel %vm679_vm13, %v1245_v37, %v1247_v9  ;;  %v1305_v37 = vmul.f32 %v3528_v33, %v3457_v51 }
 0x51b   : > { %5386 = vst [vmem:[#allocation20_spill] sm:$0xff] %v3811_v28  ;;  %v1392_v32 = vrot.slane %v1386_v7, 2 }
 0x51c   : > { %1169 = vrot.lane.b32.xlu0 %v1166_v41, %s5355_s16  ;;  %1150 = vrot.lane.b32.xlu1 %v1147_v44, %s5355_s16  ;;  %v1284_v44 = vmul.f32 %v1283_v27, %v3457_v51 }
 0x51e   : > { %v3824_v20 = vpop.permute.xlu0 %1077  ;;  %v3826_v14 = vpop.permute.xlu1 %1063  ;;  %v1290_v50 = vrot.slane %v1284_v44, 4 }
 0x51f   : > { %5387 = vst [vmem:[#allocation21_spill] sm:$0xff] %v3824_v20  ;;  %5388 = vst [vmem:[#allocation22_spill] sm:$0xff] %v3826_v14 }
 0x520   : > { %1196 = vrot.lane.b32.xlu0 %v1193_v30, %s5355_s16  ;;  %1171 = vrot.lane.b32.xlu1 %v3548_v39, %s5355_s16  ;;  %v1286_v39 = vmul.f32 %v1283_v27, %v3465_v59  ;;  %v1330_v30 = vmul.f32 %v1329_v53, %v3457_v51  ;;  %v1292_v27 = vsel %vm408_vm6, %v1290_v50, %v1291_v48 }
 0x522   : > { %v3835_v16 = vpop.permute.xlu0 %1081  ;;  %v3837_v10 = vpop.permute.xlu1 %1079  ;;  %v1293_v41 = vrot.slane %v1286_v39, 4  ;;  %v1336_v33 = vrot.slane %v1330_v30, 6 }
 0x523   : > { %5389 = vst [vmem:[#allocation23_spill] sm:$0xff] %v3837_v10 }
 0x524   : > { %1249 = vrot.lane.b32.xlu0 %v1246_v25, %s5353_s10  ;;  %1194 = vrot.lane.b32.xlu1 %v1191_v57, %s5355_s16  ;;  %v1294_v4 = vsel %vm408_vm6, %v1291_v48, %v1293_v41  ;;  %v1387_v25 = vmul.f32 %v1384_v0, %v3465_v59  ;;  %v1311_v57 = vrot.slane %v1305_v37, 4  ;;  %v1406_v37 = vmul.f32 %v3573_v49, %v3457_v51 }
 0x525   : > { %v1452_v49 = vmul.f32 %v3607_v3, %v3457_v51 }
 0x526   : > { %v3845_v12 = vpop.permute.xlu0 %1210  ;;  %v3847_v31 = vpop.permute.xlu1 %1208  ;;  %v1394_v48 = vrot.slane %v1387_v25, 2 }
 0x527   : > { %5390 = vst [vmem:[#allocation24_spill] sm:$0xff] %v3845_v12  ;;  %5391 = vst [vmem:[#allocation25_spill] sm:$0xff] %v3847_v31  ;;  %v1458_v3 = vrot.slane %v1452_v49, 4 }
 0x528   : > { %1270 = vrot.lane.b32.xlu0 %v1267_v34, %s5353_s10  ;;  %1251 = vrot.lane.b32.xlu1 %v1248_v36, %s5353_s10  ;;  %v1338_v34 = vsel %vm389_vm3, %v1336_v33, %v1337_v43  ;;  %v1313_v36 = vsel %vm408_vm6, %v1311_v57, %v1312_v55  ;;  %v1395_v45 = vsel %vm679_vm13, %v1392_v32, %v1394_v48  ;;  %v1412_v33 = vrot.slane %v1406_v37, 2 }
 0x529   : > { %v1476_v57 = vstv %s2835_s17  ;;  %v1460_v6 = vsel %vm408_vm6, %v1458_v3, %v1459_v24  ;;  %s2865_s17 = sld [smem:[#allocation7 + $0x3b]] }
 0x52a   : > { %v3856_v46 = vpop.permute.xlu0 %1226  ;;  %v3858_v54 = vpop.permute.xlu1 %1224 }
 0x52b   : > { %5392 = vst [vmem:[#allocation26_spill] sm:$0xff] %v3856_v46  ;;  %5393 = vst [vmem:[#allocation27_spill] sm:$0xff] %v3858_v54 }
 0x52c   : > { %1297 = vrot.lane.b32.xlu0 %v1294_v4, %s5353_s10  ;;  %1272 = vrot.lane.b32.xlu1 %v3594_v61, %s5353_s10  ;;  %v1332_v61 = vmul.f32 %v1329_v53, %v3465_v59  ;;  %v1430_v4 = vstv %s2833_s13  ;;  %s2864_s13 = sld [smem:[#allocation7 + $0x34]] }
 0x52d   : > { %v1432_v55 = vmul.f32 %v1430_v4, %v3461_v56  ;;  %v1431_v30 = vmul.f32 %v1430_v4, %v3457_v51  ;;  %v1433_v25 = vmul.f32 %v1430_v4, %v3465_v59 }
 0x52e   : > { %v3868_v52 = vpop.permute.xlu0 %1355  ;;  %v3870_v58 = vpop.permute.xlu1 %1228  ;;  %v1339_v41 = vrot.slane %v1332_v61, 6 }
 0x52f   : > { %5394 = vst [vmem:[#allocation28_spill] sm:$0xff] %v3868_v52  ;;  %v1437_v61 = vrot.slane %v1431_v30, 4 }
 0x530   : > { %1318 = vrot.lane.b32.xlu0 %v3599_v62, %s5353_s10  ;;  %1295 = vrot.lane.b32.xlu1 %v1292_v27, %s5353_s10  ;;  %v1385_v62 = vmul.f32 %v1384_v0, %v3457_v51  ;;  %v1340_v47 = vsel %vm389_vm3, %v1337_v43, %v1339_v41  ;;  %v1438_v43 = vrot.slane %v1432_v55, 4  ;;  %v1440_v41 = vrot.slane %v1433_v25, 4 }
 0x531   : > { %v1531_v55 = vstv %s2838_s26  ;;  %s2871_s26 = sld [smem:[#allocation7 + $0x35]] }
 0x532   : > { %v3879_v9 = vpop.permute.xlu0 %1371  ;;  %v3881_v39 = vpop.permute.xlu1 %1357  ;;  %v1391_v50 = vrot.slane %v1385_v62, 2  ;;  %v1439_v48 = vsel %vm408_vm6, %v1437_v61, %v1438_v43  ;;  %v1479_v62 = vmul.f32 %v1476_v57, %v3465_v59  ;;  %v1533_v30 = vmul.f32 %v1531_v55, %v3461_v56 }
 0x533   : > { %5395 = vst [vmem:[#allocation29_spill] sm:$0xff] %v3879_v9  ;;  %5396 = vst [vmem:[#allocation30_spill] sm:$0xff] %v3881_v39  ;;  %v1532_v37 = vmul.f32 %v1531_v55, %v3457_v51 }
 0x534   : > { %1341 = vrot.lane.b32.xlu0 %v1338_v34, %s5353_s10  ;;  %1316 = vrot.lane.b32.xlu1 %v1313_v36, %s5353_s10  ;;  %v1393_v27 = vsel %vm679_vm13, %v1391_v50, %v1392_v32  ;;  %v1478_v32 = vmul.f32 %v1476_v57, %v3461_v56  ;;  %v1486_v50 = vrot.slane %v1479_v62, 6  ;;  %v1539_v24 = vrot.slane %v1533_v30, 2 }
 0x536   : > { %v3890_v44 = vpop.permute.xlu0 %1375  ;;  %v3892_v53 = vpop.permute.xlu1 %1373 }
 0x537   : > { %5397 = vst [vmem:[#allocation31_spill] sm:$0xff] %v3890_v44  ;;  %5398 = vst [vmem:[#allocation32_spill] sm:$0xff] %v3892_v53  ;;  %v2191_v9 = vstv %s2871_s26  ;;  %s2869_s26 = sld [smem:[#allocation7 + $0x57]] }
 0x538   : > { %1398 = vrot.lane.b32.xlu0 %v1395_v45, %s5347_s14  ;;  %1343 = vrot.lane.b32.xlu1 %v1340_v47, %s5353_s10  ;;  %v1484_v47 = vrot.slane %v1478_v32, 6  ;;  %v1553_v32 = vmul.f32 %v3642_v22, %v3457_v51 }
 0x53a   : > { %v3902_v0 = vpop.permute.xlu0 %1504  ;;  %v3904_v7 = vpop.permute.xlu1 %1502  ;;  %v1487_v21 = vsel %vm389_vm3, %v1484_v47, %v1486_v50  ;;  %v1559_v22 = vrot.slane %v1553_v32, 2  ;;  %v1600_v50 = vmul.f32 %v3677_v13, %v3461_v56 }
 0x53b   : > { %5399 = vst [vmem:[#allocation33_spill] sm:$0xff] %v3902_v0  ;;  %5400 = vst [vmem:[#allocation34_spill] sm:$0xff] %v3904_v7 }
 0x53c   : > { %1419 = vrot.lane.b32.xlu0 %v3631_v17, %s5347_s14  ;;  %1396 = vrot.lane.b32.xlu1 %v1393_v27, %s5347_s14  ;;  %v1414_v17 = vsel %vm679_vm13, %v1412_v33, %v1413_v15  ;;  %v1441_v15 = vsel %vm408_vm6, %v1438_v43, %v1440_v41  ;;  %v1477_v27 = vmul.f32 %v1476_v57, %v3457_v51  ;;  %v1538_v33 = vrot.slane %v1532_v37, 2 }
 0x53d   : > { %v1534_v43 = vmul.f32 %v1531_v55, %v3465_v59  ;;  %v1577_v57 = vstv %s2840_s9  ;;  %v1561_v30 = vsel %vm679_vm13, %v1559_v22, %v1560_v2  ;;  %v1606_v5 = vrot.slane %v1600_v50, 4  ;;  %s2872_s9 = sld [smem:[#allocation7 + $0x3c]] }
 0x53e   : > { %v3913_v34 = vpop.permute.xlu0 %1520  ;;  %v3915_v36 = vpop.permute.xlu1 %1518  ;;  %v1483_v49 = vrot.slane %v1477_v27, 6  ;;  %v1579_v41 = vmul.f32 %v1577_v57, %v3461_v56  ;;  %v1540_v62 = vsel %vm679_vm13, %v1538_v33, %v1539_v24 }
 0x53f   : > { %5401 = vst [vmem:[#allocation35_spill] sm:$0xff] %v3913_v34  ;;  %5402 = vst [vmem:[#allocation36_spill] sm:$0xff] %v3915_v36  ;;  %v1541_v55 = vrot.slane %v1534_v43, 2  ;;  %v2058_v34 = vstv %s2865_s17  ;;  %s2853_s17 = sld [smem:[#allocation7 + $0x47]] }
 0x540   : > { %1442 = vrot.lane.b32.xlu0 %v1439_v48, %s5347_s14  ;;  %1417 = vrot.lane.b32.xlu1 %v1414_v17, %s5347_s14  ;;  %v1485_v3 = vsel %vm389_vm3, %v1483_v49, %v1484_v47  ;;  %v1585_v37 = vrot.slane %v1579_v41, 4  ;;  %v1623_v49 = vstv %s2842_s29  ;;  %v1599_v41 = vmul.f32 %v3677_v13, %v3457_v51  ;;  %s2878_s29 = sld [smem:[#allocation7 + $0x36]] }
 0x541   : > { %v1542_v47 = vsel %vm679_vm13, %v1539_v24, %v1541_v55  ;;  %v1625_v2 = vmul.f32 %v1623_v49, %v3461_v56  ;;  %v1609_v56 = vsel %vm408_vm6, %v1606_v5, %v1608_v38 }
 0x542   : > { %v3925_v4 = vpop.permute.xlu0 %879  ;;  %v3927_v45 = vpop.permute.xlu1 %1522  ;;  %v1605_v13 = vrot.slane %v1599_v41, 4 }
 0x543   : > { %5403 = vst [vmem:[#allocation37_spill] sm:$0xff] %v3927_v45  ;;  %v2205_v7 = vstv %s2872_s9  ;;  %s2862_s9 = sld [smem:[#allocation7 + $0x56]] }
 0x544   : > { %1463 = vrot.lane.b32.xlu0 %v1460_v6, %s5347_s14  ;;  %1444 = vrot.lane.b32.xlu1 %v1441_v15, %s5347_s14  ;;  %v1607_v38 = vsel %vm408_vm6, %v1605_v13, %v1606_v5  ;;  %v1897_v13 = vstv %s2857_s11  ;;  %s4106_s11 = sld [smem:[#allocation7 + $0x37]] }
 0x546   : > { %v3938_v25 = vpop.permute.xlu0 %980  ;;  %v3940_v61 = vpop.permute.xlu1 %833  ;;  %v2338_v39 = vstv %s2878_s29  ;;  %s2874_s29 = sld [smem:[#allocation7 + $0x4a]] }
 0x548   : > { %1490 = vrot.lane.b32.xlu0 %v1487_v21, %s5347_s14  ;;  %1465 = vrot.lane.b32.xlu1 %v3657_v1, %s5347_s14  ;;  %v1580_v1 = vmul.f32 %v1577_v57, %v3465_v59  ;;  %v1578_v21 = vmul.f32 %v1577_v57, %v3457_v51  ;;  %v1624_v57 = vmul.f32 %v1623_v49, %v3457_v51 }
 0x54a   : > { %v3949_v48 = vpop.permute.xlu0 %1173  ;;  %v3951_v17 = vpop.permute.xlu1 %1026  ;;  %v1587_v27 = vrot.slane %v1580_v1, 4  ;;  %v1584_v24 = vrot.slane %v1578_v21, 4  ;;  %v1631_v1 = vrot.slane %v1625_v2, 6  ;;  %v1630_v51 = vrot.slane %v1624_v57, 6 }
 0x54b   : > { %v1764_v2 = vstv %s2851_s12  ;;  %s2886_s12 = sld [smem:[#allocation7 + $0x3e]] }
 0x54c   : > { %1543 = vrot.lane.b32.xlu0 %v1540_v62, %s5351_s28  ;;  %1488 = vrot.lane.b32.xlu1 %v1485_v3, %s5347_s14  ;;  %v1588_v32 = vsel %vm408_vm6, %v1585_v37, %v1587_v27  ;;  %v1586_v55 = vsel %vm408_vm6, %v1584_v24, %v1585_v37  ;;  %v1632_v29 = vsel %vm389_vm3, %v1630_v51, %v1631_v1 }
 0x54e   : > { %v3959_v6 = vpop.permute.xlu0 %1274  ;;  %v3961_v15 = vpop.permute.xlu1 %1127 }
 0x54f   : > { %5404 = vst [vmem:[#allocation38_spill] sm:$0xff] %v3959_v6 }
 0x550   : > { %1564 = vrot.lane.b32.xlu0 %v1561_v30, %s5351_s28  ;;  %1545 = vrot.lane.b32.xlu1 %v1542_v47, %s5351_s28  ;;  %v4001_v30 = vld [vmem:[#allocation2 + $0x18] sm:$0xff]  ;;  %v1750_v47 = vstv %s3978_s7  ;;  %s2879_s7 = sld [smem:[#allocation7 + $0x3d]] }
 0x551   : > { %v1751_v21 = vmul.f32 %v1750_v47, %v4001_v30  ;;  %v1765_v57 = vmul.f32 %v1764_v2, %v4001_v30 }
 0x552   : > { %v3972_v43 = vpop.permute.xlu0 %1467  ;;  %v3974_v33 = vpop.permute.xlu1 %1320 }
 0x553   : > { %5405 = vst [vmem:[#allocation39_spill] sm:$0xff] %v3972_v43  ;;  %5406 = vst [vmem:[#allocation40_spill] sm:$0xff] %v3974_v33 }
 0x554   : > { %1591 = vrot.lane.b32.xlu0 %v1588_v32, %s5351_s28  ;;  %1566 = vrot.lane.b32.xlu1 %v3675_v8, %s5351_s28  ;;  %v1626_v8 = vmul.f32 %v1623_v49, %v3465_v59  ;;  %v4013_v49 = vld [vmem:[#allocation2 + $0x20] sm:$0xff] }
 0x555   : > { %v1752_v41 = vmul.f32 %v1750_v47, %v4013_v49  ;;  %v1766_v51 = vmul.f32 %v1764_v2, %v4013_v49  ;;  %v1899_v47 = vmul.f32 %v1897_v13, %v4013_v49 }
 0x556   : > { %v3986_v62 = vpop.permute.xlu0 %1568  ;;  %v3988_v3 = vpop.permute.xlu1 %1421  ;;  %v1633_v37 = vrot.slane %v1626_v8, 6  ;;  %v2352_v52 = vstv %s2879_s7  ;;  %s2867_s7 = sld [smem:[#allocation7 + $0x49]] }
 0x557   : > { %5407 = vst [vmem:[#allocation41_spill] sm:$0xff] %v3986_v62  ;;  %5408 = vst [vmem:[#allocation42_spill] sm:$0xff] %v3988_v3 }
 0x558   : > { %1612 = vrot.lane.b32.xlu0 %v1609_v56, %s5351_s28  ;;  %1589 = vrot.lane.b32.xlu1 %v1586_v55, %s5351_s28  ;;  %v1634_v32 = vsel %vm389_vm3, %v1631_v1, %v1633_v37  ;;  %v4024_v56 = vld [vmem:[#allocation2 + $0x28] sm:$0x3f]  ;;  %v1898_v37 = vmul.f32 %v1897_v13, %v4001_v30 }
 0x559   : > { %v1767_v8 = vmul.f32 %v1764_v2, %v4024_v56 }
 0x55a   : > { %v3997_v22 = vpop.permute.xlu0 %810  ;;  %v3999_v50 = vpop.permute.xlu1 %1614 }
 0x55b   : > { %5409 = vst [vmem:[#allocation43_spill] sm:$0xff] %v3999_v50  ;;  %v2485_v50 = vstv %s4106_s11  ;;  %s2876_s11 = sld [smem:[#allocation7 + $0x58]] }
 0x55c   : > { %1635 = vrot.lane.b32.xlu0 %v1632_v29, %s5351_s28  ;;  %1610 = vrot.lane.b32.xlu1 %v1607_v38, %s5351_s28  ;;  %v2487_v62 = vmul.f32 %v2485_v50, %v4013_v49 }
 0x55e   : > { %v4008_v59 = vpop.permute.xlu0 %831  ;;  %v4010_v27 = vpop.permute.xlu1 %808 }
 0x55f   : > { %5410 = vst [vmem:[#allocation44_spill] sm:$0xff] %v4008_v59 }
 0x560   : > { %1755 = vrot.lane.b32.xlu0 %v1751_v21, %s3168_s8  ;;  %1637 = vrot.lane.b32.xlu1 %v1634_v32, %s5351_s28  ;;  %v1911_v21 = vstv %s2858_s23  ;;  %s2855_s23 = sld [smem:[#allocation7 + $0x55]] }
 0x562   : > { %v4018_v5 = vpop.permute.xlu0 %854  ;;  %v4020_v24 = vpop.permute.xlu1 %829 }
 0x563   : > { %5411 = vst [vmem:[#allocation45_spill] sm:$0xff] %v4020_v24 }
 0x564   : > { %1771 = vrot.lane.b32.xlu0 %v1765_v57, %s3168_s8  ;;  %1757 = vrot.lane.b32.xlu1 %v1752_v41, %s3168_s8  ;;  %v1913_v57 = vmul.f32 %v1911_v21, %v4013_v49  ;;  %v1912_v41 = vmul.f32 %v1911_v21, %v4001_v30 }
 0x566   : > { %v4028_v55 = vpop.permute.xlu0 %875  ;;  %v4030_v1 = vpop.permute.xlu1 %856 }
 0x567   : > { %5412 = vst [vmem:[#allocation46_spill] sm:$0xff] %v4028_v55 }
 0x568   : > { %1775 = vrot.lane.b32.xlu0 %v1767_v8, %s3168_s8  ;;  %1773 = vrot.lane.b32.xlu1 %v1766_v51, %s3168_s8  ;;  %v2044_v8 = vstv %s2864_s13  ;;  %s2860_s13 = sld [smem:[#allocation7 + $0x48]] }
 0x56a   : > { %v4036_v29 = vpop.permute.xlu0 %902  ;;  %v4038_v38 = vpop.permute.xlu1 %877 }
 0x56b   : > { %5413 = vst [vmem:[#allocation47_spill] sm:$0xff] %v4038_v38 }
 0x56c   : > { %1904 = vrot.lane.b32.xlu0 %v1899_v47, %s3169_s15  ;;  %1902 = vrot.lane.b32.xlu1 %v1898_v37, %s3169_s15  ;;  %v2045_v47 = vmul.f32 %v2044_v8, %v4001_v30  ;;  %v1914_v37 = vmul.f32 %v1911_v21, %v4024_v56 }
 0x56e   : > { %v4044_v32 = vpop.permute.xlu0 %955  ;;  %v4046_v2 = vpop.permute.xlu1 %900 }
 0x56f   : > { %5414 = vst [vmem:[#allocation48_spill] sm:$0xff] %v4044_v32 }
 0x570   : > { %1920 = vrot.lane.b32.xlu0 %v1913_v57, %s3169_s15  ;;  %1918 = vrot.lane.b32.xlu1 %v1912_v41, %s3169_s15  ;;  %v2059_v57 = vmul.f32 %v2058_v34, %v4001_v30  ;;  %v2046_v41 = vmul.f32 %v2044_v8, %v4013_v49 }
 0x572   : > { %v4052_v51 = vpop.permute.xlu0 %976  ;;  %v4054_v13 = vpop.permute.xlu1 %957 }
 0x573   : > { %5415 = vst [vmem:[#allocation49_spill] sm:$0xff] %v4052_v51  ;;  %5416 = vst [vmem:[#allocation50_spill] sm:$0xff] %v4054_v13 }
 0x574   : > { %2049 = vrot.lane.b32.xlu0 %v2045_v47, %s5355_s16  ;;  %1922 = vrot.lane.b32.xlu1 %v1914_v37, %s3169_s15  ;;  %v2061_v47 = vmul.f32 %v2058_v34, %v4024_v56  ;;  %v2060_v37 = vmul.f32 %v2058_v34, %v4013_v49 }
 0x576   : > { %v4060_v36 = vpop.permute.xlu0 %1003  ;;  %v4062_v53 = vpop.permute.xlu1 %978 }
 0x577   : > { %5417 = vst [vmem:[#allocation51_spill] sm:$0xff] %v4060_v36  ;;  %5418 = vst [vmem:[#allocation52_spill] sm:$0xff] %v4062_v53  ;;  %v2486_v53 = vmul.f32 %v2485_v50, %v4001_v30 }
 0x578   : > { %2065 = vrot.lane.b32.xlu0 %v2059_v57, %s5355_s16  ;;  %2051 = vrot.lane.b32.xlu1 %v2046_v41, %s5355_s16  ;;  %v2192_v57 = vmul.f32 %v2191_v9, %v4001_v30  ;;  %v2193_v41 = vmul.f32 %v2191_v9, %v4013_v49 }
 0x57a   : > { %v4068_v21 = vpop.permute.xlu0 %1024  ;;  %v4070_v0 = vpop.permute.xlu1 %1001 }
 0x57b   : > { %5419 = vst [vmem:[#allocation53_spill] sm:$0xff] %v4068_v21  ;;  %5420 = vst [vmem:[#allocation54_spill] sm:$0xff] %v4070_v0 }
 0x57c   : > { %2069 = vrot.lane.b32.xlu0 %v2061_v47, %s5355_s16  ;;  %2067 = vrot.lane.b32.xlu1 %v2060_v37, %s5355_s16  ;;  %v2207_v47 = vmul.f32 %v2205_v7, %v4013_v49  ;;  %v2206_v37 = vmul.f32 %v2205_v7, %v4001_v30 }
 0x57e   : > { %v4076_v8 = vpop.permute.xlu0 %1047  ;;  %v4078_v46 = vpop.permute.xlu1 %1022 }
 0x57f   : > { %5421 = vst [vmem:[#allocation55_spill] sm:$0xff] %v4076_v8  ;;  %5422 = vst [vmem:[#allocation56_spill] sm:$0xff] %v4078_v46  ;;  %v4399_v8 = vld [vmem:[#allocation2] sm:$0xff] }
 0x580   : > { %2196 = vrot.lane.b32.xlu0 %v2192_v57, %s5353_s10  ;;  %2198 = vrot.lane.b32.xlu1 %v2193_v41, %s5353_s10  ;;  %v2339_v57 = vmul.f32 %v2338_v39, %v4001_v30  ;;  %v2208_v41 = vmul.f32 %v2205_v7, %v4024_v56 }
 0x582   : > { %v4084_v34 = vpop.permute.xlu0 %1104  ;;  %v4086_v54 = vpop.permute.xlu1 %1049 }
 0x583   : > { %5423 = vst [vmem:[#allocation57_spill] sm:$0xff] %v4084_v34  ;;  %5424 = vst [vmem:[#allocation58_spill] sm:$0xff] %v4086_v54 }
 0x584   : > { %2214 = vrot.lane.b32.xlu0 %v2207_v47, %s5353_s10  ;;  %2212 = vrot.lane.b32.xlu1 %v2206_v37, %s5353_s10  ;;  %v2353_v47 = vmul.f32 %v2352_v52, %v4001_v30  ;;  %v2340_v37 = vmul.f32 %v2338_v39, %v4013_v49 }
 0x586   : > { %v4092_v9 = vpop.permute.xlu0 %1125  ;;  %v4094_v10 = vpop.permute.xlu1 %1102 }
 0x587   : > { %5425 = vst [vmem:[#allocation59_spill] sm:$0xff] %v4092_v9  ;;  %5426 = vst [vmem:[#allocation60_spill] sm:$0xff] %v4094_v10  ;;  %v2354_v9 = vmul.f32 %v2352_v52, %v4013_v49 }
 0x588   : > { %2343 = vrot.lane.b32.xlu0 %v2339_v57, %s5347_s14  ;;  %2216 = vrot.lane.b32.xlu1 %v2208_v41, %s5353_s10  ;;  %v2355_v41 = vmul.f32 %v2352_v52, %v4024_v56  ;;  %v4127_v52 = vstv %s2855_s23  ;;  %s2888_s23 = sld [smem:[#allocation7 + $0x4c]] }
 0x589   : > { %v4137_v63 = vmul.f32 %v4127_v52, %v4024_v56 }
 0x58a   : > { %v4100_v21 = vpop.permute.xlu0 %1148  ;;  %v4102_v20 = vpop.permute.xlu1 %1123 }
 0x58b   : > { %5427 = vst [vmem:[#allocation61_spill] sm:$0xff] %v4100_v21  ;;  %5428 = vst [vmem:[#allocation62_spill] sm:$0xff] %v4102_v20  ;;  %v2499_v20 = vstv %s2886_s12  ;;  %s2883_s12 = sld [smem:[#allocation7 + $0x59]] }
 0x58c   : > { %2359 = vrot.lane.b32.xlu0 %v2353_v47, %s5347_s14  ;;  %2345 = vrot.lane.b32.xlu1 %v2340_v37, %s5347_s14  ;;  %v2501_v37 = vmul.f32 %v2499_v20, %v4013_v49 }
 0x58e   : > { %v4110_v7 = vpop.permute.xlu0 %1169  ;;  %v4112_v57 = vpop.permute.xlu1 %1150 }
 0x58f   : > { %5429 = vst [vmem:[#allocation63_spill] sm:$0xff] %v4110_v7  ;;  %5430 = vst [vmem:[#allocation64_spill] sm:$0xff] %v4112_v57  ;;  %v2500_v7 = vmul.f32 %v2499_v20, %v4001_v30 }
 0x590   : > { %2363 = vrot.lane.b32.xlu0 %v2355_v41, %s5347_s14  ;;  %2361 = vrot.lane.b32.xlu1 %v2354_v9, %s5347_s14 }
 0x592   : > { %v4118_v39 = vpop.permute.xlu0 %1196  ;;  %v4120_v47 = vpop.permute.xlu1 %1171 }
 0x593   : > { %5431 = vst [vmem:[#allocation65_spill] sm:$0xff] %v4118_v39  ;;  %5432 = vst [vmem:[#allocation66_spill] sm:$0xff] %v4120_v47  ;;  %v2502_v47 = vmul.f32 %v2499_v20, %v4024_v56  ;;  %v5321_v20 = vrot.slane %v4137_v63, 4 }
 0x594   : > { %2508 = vrot.lane.b32.xlu0 %v2501_v37, %s5351_s28  ;;  %2506 = vrot.lane.b32.xlu1 %v2500_v7, %s5351_s28  ;;  %v4141_v7 = vstv %s2860_s13  ;;  %v4143_v37 = vstv %s2853_s17  ;;  %s2881_s13 = sld [smem:[#allocation7 + $0x4b]]  ;;  %s2852_s17 = sld [smem:[#allocation7 + $0x40]] }
 0x595   : > { %v4453_v32 = vmul.f32 %v4141_v7, %v4013_v49 }
 0x596   : > { %v4129_v9 = vpop.permute.xlu0 %1249  ;;  %v4131_v41 = vpop.permute.xlu1 %1194 }
 0x597   : > { %5433 = vst [vmem:[#allocation67_spill] sm:$0xff] %v4129_v9  ;;  %5434 = vst [vmem:[#allocation68_spill] sm:$0xff] %v4131_v41  ;;  %v4153_v9 = vmul.f32 %v4141_v7, %v4024_v56 }
 0x598   : > { %2490 = vrot.lane.b32.xlu0 %v2486_v53, %s5351_s28  ;;  %2510 = vrot.lane.b32.xlu1 %v2502_v47, %s5351_s28  ;;  %v4157_v53 = vmul.f32 %v4143_v37, %v4024_v56  ;;  %v4163_v47 = vstv %s2869_s26  ;;  %s2890_s26 = sld [smem:[#allocation7 + $0x5a]] }
 0x599   : > { %v5322_v51 = vrot.slane %v4153_v9, 2  ;;  %v4175_v39 = vmul.f32 %v4163_v47, %v4024_v56 }
 0x59a   : > { %v4145_v12 = vpop.permute.xlu0 %1270  ;;  %v4147_v46 = vpop.permute.xlu1 %1251  ;;  %v5323_v38 = vrot.slane %v4157_v53, 2  ;;  %v1784_v55 = vstv %s2852_s17  ;;  %s4305_s17 = sld [smem:[#allocation7 + $0x1c]] }
 0x59b   : > { %5435 = vst [vmem:[#allocation69_spill] sm:$0xff] %v4145_v12  ;;  %5436 = vst [vmem:[#allocation70_spill] sm:$0xff] %v4147_v46  ;;  %v4165_v12 = vstv %s2862_s9  ;;  %v5324_v45 = vrot.slane %v4175_v39, 4  ;;  %s2797_s9 = sld [smem:[#allocation7 + $0x15]]  ;;  %v1787_v24 = vmul.f32 %v1784_v55, %v4024_v56 }
 0x59c   : > { %1867 = vrot.lane.b32.xlu0 %v5321_v20, %s3168_s8  ;;  %2492 = vrot.lane.b32.xlu1 %v2487_v62, %s5351_s28  ;;  %5439 = vst [vmem:[#allocation73_spill] sm:$0xff] %v4175_v39  ;;  %v4179_v62 = vmul.f32 %v4165_v12, %v4024_v56  ;;  %v4187_v20 = vstv %s2874_s29  ;;  %s2854_s29 = sld [smem:[#allocation7 + $0x4e]] }
 0x59d   : > { %5440 = vst [vmem:[#allocation74_spill] sm:$0xff] %v4187_v20 }
 0x59e   : > { %v4167_v50 = vpop.permute.xlu0 %1297  ;;  %v4169_v46 = vpop.permute.xlu1 %1272  ;;  %v5325_v59 = vrot.slane %v4179_v62, 4 }
 0x59f   : > { %5437 = vst [vmem:[#allocation71_spill] sm:$0xff] %v4167_v50  ;;  %5438 = vst [vmem:[#allocation72_spill] sm:$0xff] %v4169_v46  ;;  %v4189_v46 = vstv %s2867_s7  ;;  %s4263_s7 = sld [smem:[#allocation7 + $0x7]] }
 0x5a0   : > { %1968 = vrot.lane.b32.xlu0 %v5322_v51, %s3169_s15  ;;  %1821 = vrot.lane.b32.xlu1 %v5323_v38, %s3168_s8  ;;  %v4199_v51 = vmul.f32 %v4187_v20, %v4024_v56  ;;  %v4203_v38 = vmul.f32 %v4189_v46, %v4024_v56  ;;  %v4386_v36 = vstv %s4305_s17  ;;  %s5491_s17 = smov 125  }
 0x5a2   : > { %v4191_v50 = vpop.permute.xlu0 %1318  ;;  %v4193_v19 = vpop.permute.xlu1 %1295  ;;  %5443 = vst [vmem:[#allocation77_spill] sm:$0xff] %v4199_v51  ;;  %5444 = vst [vmem:[#allocation78_spill] sm:$0xff] %v4203_v38  ;;  %v5330_v42 = vrot.slane %v4199_v51, 2  ;;  %v5331_v34 = vrot.slane %v4203_v38, 2  ;;  %v1786_v51 = vmul.f32 %v1784_v55, %v4013_v49 }
 0x5a3   : > { %5441 = vst [vmem:[#allocation75_spill] sm:$0xff] %v4191_v50  ;;  %5442 = vst [vmem:[#allocation76_spill] sm:$0xff] %v4193_v19  ;;  %v4211_v50 = vstv %s2883_s12  ;;  %v4213_v19 = vstv %s2876_s11  ;;  %s4265_s12 = sld [smem:[#allocation7 + $0x23]]  ;;  %s4279_s11 = sld [smem:[#allocation7]] }
 0x5a4   : > { %2161 = vrot.lane.b32.xlu0 %v5324_v45, %s5355_s16  ;;  %2014 = vrot.lane.b32.xlu1 %v5325_v59, %s3169_s15  ;;  %5445 = vst [vmem:[#allocation79_spill] sm:$0xff] %v4211_v50  ;;  %5446 = vst [vmem:[#allocation80_spill] sm:$0xff] %v4213_v19  ;;  %v4223_v45 = vmul.f32 %v4211_v50, %v4024_v56  ;;  %v4227_v59 = vmul.f32 %v4213_v19, %v4024_v56 }
 0x5a6   : > { %v4215_v31 = vpop.permute.xlu0 %1341  ;;  %v4217_v57 = vpop.permute.xlu1 %1316  ;;  %5449 = vst [vmem:[#allocation83_spill] sm:$0xff] %v4223_v45  ;;  %5450 = vst [vmem:[#allocation84_spill] sm:$0xff] %v4227_v59  ;;  %v5337_v19 = vrot.slane %v4223_v45, 4  ;;  %v5339_v41 = vrot.slane %v4227_v59, 4  ;;  %v1792_v45 = vrot.slane %v1786_v51, 2  ;;  %v1807_v59 = vmul.f32 %v4143_v37, %v4013_v49 }
 0x5a7   : > { %5447 = vst [vmem:[#allocation81_spill] sm:$0xff] %v4215_v31  ;;  %5448 = vst [vmem:[#allocation82_spill] sm:$0xff] %v4217_v57  ;;  %v4235_v57 = vstv %s2888_s23  ;;  %v4237_v31 = vstv %s2881_s13  ;;  %s4290_s23 = sld [smem:[#allocation7 + $0x5c]]  ;;  %s4292_s13 = sld [smem:[#allocation7 + $0xe]] }
 0x5a8   : > { %2262 = vrot.lane.b32.xlu0 %v5330_v42, %s5353_s10  ;;  %2115 = vrot.lane.b32.xlu1 %v5331_v34, %s5355_s16  ;;  %5451 = vst [vmem:[#allocation85_spill] sm:$0xff] %v4235_v57  ;;  %5452 = vst [vmem:[#allocation86_spill] sm:$0xff] %v4237_v31  ;;  %v4247_v42 = vmul.f32 %v4235_v57, %v4024_v56  ;;  %v4251_v34 = vmul.f32 %v4237_v31, %v4024_v56  ;;  %s4367_s16 = sld [smem:[#allocation7 + $0x46]] }
 0x5a9   : > { %v4330_v3 = vstv %s4265_s12  ;;  %s4358_s12 = sld [smem:[#allocation7 + $0x4f]] }
 0x5aa   : > { %v4239_v50 = vpop.permute.xlu0 %1398  ;;  %v4241_v43 = vpop.permute.xlu1 %1343  ;;  %5455 = vst [vmem:[#allocation89_spill] sm:$0xff] %v4247_v42  ;;  %5456 = vst [vmem:[#allocation90_spill] sm:$0xff] %v4251_v34  ;;  %v5344_v31 = vrot.slane %v4247_v42, 2  ;;  %v5345_v21 = vrot.slane %v4251_v34, 2  ;;  %v1813_v34 = vrot.slane %v1807_v59, 2  ;;  %v1806_v59 = vmul.f32 %v4143_v37, %v4001_v30 }
 0x5ab   : > { %5453 = vst [vmem:[#allocation87_spill] sm:$0xff] %v4239_v50  ;;  %5454 = vst [vmem:[#allocation88_spill] sm:$0xff] %v4241_v43  ;;  %v4261_v50 = vstv %s2890_s26  ;;  %s4311_s26 = sld [smem:[#allocation7 + $0x2a]]  ;;  %v5465_v37 = vrot.slane %v4157_v53, 2 }
 0x5ac   : > { %2455 = vrot.lane.b32.xlu0 %v5337_v19, %s5347_s14  ;;  %2308 = vrot.lane.b32.xlu1 %v5339_v41, %s5353_s10  ;;  %5457 = vst [vmem:[#allocation91_spill] sm:$0xff] %v4261_v50  ;;  %v4275_v19 = vmul.f32 %v4261_v50, %v4024_v56  ;;  %v1794_v41 = vrot.slane %v1787_v24, 2  ;;  %v1785_v50 = vmul.f32 %v1784_v55, %v4001_v30  ;;  %v4294_v24 = vld [vmem:[#allocation2 + $0x10] sm:$0x3f]  ;;  %s4365_s10 = sld [smem:[#allocation7 + $0x5b]] }
 0x5ad   : > { %v4354_v54 = vmul.f32 %v4294_v24, %v4330_v3 }
 0x5ae   : > { %v4267_v57 = vpop.permute.xlu0 %1419  ;;  %v4269_v43 = vpop.permute.xlu1 %1396  ;;  %5460 = vst [vmem:[#allocation94_spill] sm:$0xff] %v4275_v19  ;;  %v1795_v55 = vsel %vm679_vm13, %v1792_v45, %v1794_v41  ;;  %v4327_v41 = vstv %s4263_s7  ;;  %s4347_s7 = sld [smem:[#allocation7 + $0x3f]] }
 0x5af   : > { %5458 = vst [vmem:[#allocation92_spill] sm:$0xff] %v4267_v57  ;;  %5459 = vst [vmem:[#allocation93_spill] sm:$0xff] %v4269_v43  ;;  %v4287_v57 = vstv %s2797_s9  ;;  %v1830_v43 = vstv %s2854_s29  ;;  %s4313_s9 = sld [smem:[#allocation7 + $0x38]]  ;;  %s4322_s29 = sld [smem:[#allocation7 + $0x41]] }
 0x5b0   : > { %2556 = vrot.lane.b32.xlu0 %v5344_v31, %s5351_s28  ;;  %2409 = vrot.lane.b32.xlu1 %v5345_v21, %s5347_s14  ;;  %v4298_v51 = vmul.f32 %v4294_v24, %v4287_v57  ;;  %v5349_v21 = vrot.slane %v4275_v19, 4  ;;  %v4309_v14 = vmul.f32 %v1830_v43, %v4013_v49  ;;  %s4324_s14 = sld [smem:[#allocation7 + $0x31]]  ;;  %v1816_v19 = vsel %vm679_vm13, %v1813_v34, %v5465_v37 }
 0x5b2   : > { %v4300_v42 = vpop.permute.xlu0 %1442  ;;  %v4302_v31 = vpop.permute.xlu1 %1417  ;;  %v1838_v28 = vrot.slane %v4309_v14, 4 }
 0x5b3   : > { %5461 = vst [vmem:[#allocation95_spill] sm:$0xff] %v4300_v42  ;;  %5462 = vst [vmem:[#allocation96_spill] sm:$0xff] %v4302_v31  ;;  %v1791_v31 = vrot.slane %v1785_v50, 2  ;;  %v1831_v42 = vmul.f32 %v1830_v43, %v4001_v30  ;;  %v4339_v50 = vmul.f32 %v4127_v52, %v4013_v49 }
 0x5b4   : > { %1798 = vrot.lane.b32.xlu0 %v1795_v55, %s3168_s8  ;;  %2602 = vrot.lane.b32.xlu1 %v5349_v21, %s5351_s28  ;;  %v1833_v55 = vmul.f32 %v1830_v43, %v4024_v56  ;;  %s4360_s28 = sld [smem:[#allocation7 + $0x4d]]  ;;  %v1876_v43 = vstv %s4290_s23 }
 0x5b5   : > { %v1793_v11 = vsel %vm679_vm13, %v1791_v31, %v1792_v45  ;;  %v1837_v14 = vrot.slane %v1831_v42, 4  ;;  %v1812_v31 = vrot.slane %v1806_v59, 2  ;;  %v1852_v45 = vmul.f32 %v4127_v52, %v4001_v30  ;;  %s4431_s23 = sld [smem:[#allocation7 + $0x5d]] }
 0x5b6   : > { %v4333_v10 = vpop.permute.xlu0 %1463  ;;  %v4335_v21 = vpop.permute.xlu1 %1444  ;;  %v1859_v59 = vrot.slane %v4339_v50, 4  ;;  %v4380_v52 = vmul.f32 %v1876_v43, %v4013_v49  ;;  %v1840_v20 = vrot.slane %v1833_v55, 4  ;;  %v1879_v39 = vmul.f32 %v1876_v43, %v4024_v56  ;;  %v4403_v55 = vld [vmem:[#allocation2 + $0x8] sm:$0xff] }
 0x5b7   : > { %5463 = vst [vmem:[#allocation97_spill] sm:$0xff] %v4333_v10  ;;  %5464 = vst [vmem:[#allocation98_spill] sm:$0xff] %v4335_v21  ;;  %v667_v21 = vmul.f32 %v4294_v24, %v4327_v41  ;;  %v1839_v10 = vsel %vm408_vm6, %v1837_v14, %v1838_v28  ;;  %v1814_v44 = vsel %vm679_vm13, %v1812_v31, %v1813_v34  ;;  %v4395_v50 = vstv %s4313_s9  ;;  %s4666_s9 = sld [smem:[#allocation7 + $0x44]] }
 0x5b8   : > { %1819 = vrot.lane.b32.xlu0 %v1816_v19, %s3168_s8  ;;  %1796 = vrot.lane.b32.xlu1 %v1793_v11, %s3168_s8  ;;  %v4370_v19 = vstv %s4292_s13  ;;  %v5466_v11 = vrot.slane %v4298_v51, 2  ;;  %v1841_v33 = vsel %vm408_vm6, %v1838_v28, %v1840_v20  ;;  %v1884_v0 = vrot.slane %v4380_v52, 6  ;;  %s4433_s13 = sld [smem:[#allocation7 + $0x42]] }
 0x5b9   : > { %v673_v34 = vmul.f32 %v4399_v8, %v4370_v19  ;;  %v4407_v31 = vmul.f32 %v4403_v55, %v4370_v19  ;;  %v1886_v23 = vrot.slane %v1879_v39, 6  ;;  %v4440_v39 = vstv %s4365_s10  ;;  %s4575_s10 = sld [smem:[#allocation7 + $0x5e]] }
 0x5ba   : > { %v707_v53 = vadd.f32 %v5466_v11, %v667_v21  ;;  %v4374_v37 = vpop.permute.xlu0 %1490  ;;  %v4376_v42 = vpop.permute.xlu1 %1465  ;;  %v4389_v21 = vstv %s4311_s26  ;;  %v5360_v11 = vrot.slane %v4354_v54, 4  ;;  %v4437_v20 = vstv %s4360_s28  ;;  %5472 = vst [vmem:[#allocation104_spill] sm:$0xff] %v4440_v39  ;;  %s4629_s28 = sld [smem:[#allocation7 + $0x43]]  ;;  %s4664_s26 = sld [smem:[#allocation7 + $0x5f]] }
 0x5bb   : > { %5467 = vst [vmem:[#allocation99_spill] sm:$0xff] %v4374_v37  ;;  %5468 = vst [vmem:[#allocation100_spill] sm:$0xff] %v4376_v42  ;;  %v1858_v42 = vrot.slane %v1852_v45, 4  ;;  %v1931_v37 = vstv %s4322_s29  ;;  %s4700_s29 = sld [smem:[#allocation7 + $0x60]] }
 0x5bc   : > { %1842 = vrot.lane.b32.xlu0 %v1839_v10, %s3168_s8  ;;  %1817 = vrot.lane.b32.xlu1 %v1814_v44, %s3168_s8  ;;  %v743_v10 = vadd.f32 %v5360_v11, %v707_v53  ;;  %v4416_v14 = vmul.f32 %v1931_v37, %v4013_v49  ;;  %v1932_v53 = vmul.f32 %v1931_v37, %v4001_v30 }
 0x5bd   : > { %v1860_v13 = vsel %vm408_vm6, %v1858_v42, %v1859_v59  ;;  %v1877_v11 = vmul.f32 %v1876_v43, %v4001_v30  ;;  %5471 = vst [vmem:[#allocation103_spill] sm:$0xff] %v4437_v20  ;;  %v1934_v42 = vmul.f32 %v1931_v37, %v4024_v56  ;;  %v710_v37 = vmul.f32 %v4399_v8, %v4386_v36 }
 0x5be   : > { %v4411_v44 = vpop.permute.xlu0 %1543  ;;  %v4413_v45 = vpop.permute.xlu1 %1488  ;;  %v794_v28 = vadd.f32 %v3776_v40, %v743_v10  ;;  %v1939_v38 = vrot.slane %v4416_v14, 2  ;;  %v1887_v10 = vsel %vm389_vm3, %v1884_v0, %v1886_v23  ;;  %v1938_v14 = vrot.slane %v1932_v53, 2 }
 0x5bf   : > { %5469 = vst [vmem:[#allocation101_spill] sm:$0xff] %v4411_v44  ;;  %5470 = vst [vmem:[#allocation102_spill] sm:$0xff] %v4413_v45  ;;  %v4426_v44 = vstv %s4347_s7  ;;  %v4429_v45 = vstv %s4358_s12  ;;  %v5477_v23 = vstv %s4279_s11  ;;  %v1941_v20 = vrot.slane %v1934_v42, 2  ;;  %s4737_s7 = sld [smem:[#allocation7 + $0x45]]  ;;  %s5521_s12 = smov 124  }
 0x5c0   : > { %1863 = vrot.lane.b32.xlu0 %v1860_v13, %s3168_s8  ;;  %1844 = vrot.lane.b32.xlu1 %v1841_v33, %s3168_s8  ;;  %v4443_v13 = vstv %s4367_s16  ;;  %v680_v33 = vrot.slane %v673_v34, 2  ;;  %v840_v40 = vadd.f32 %v3940_v61, %v794_v28  ;;  %v1953_v61 = vmul.f32 %v4141_v7, %v4001_v30  ;;  %s4469_s16 = sld [smem:[#allocation7 + $0x50]] }
 0x5c1   : > { %5473 = vst [vmem:[#allocation105_spill] sm:$0xff] %v4443_v13  ;;  %v5476_v13 = vrot.slane %v4137_v63, 4  ;;  %v659_v63 = vmul.f32 %v4399_v8, %v5477_v23  ;;  %v4480_v28 = vmul.f32 %v4403_v55, %v4389_v21  ;;  %v1960_v23 = vrot.slane %v4453_v32, 2 }
 0x5c2   : > { %v4446_v43 = vpop.permute.xlu0 %1564  ;;  %v4448_v52 = vpop.permute.xlu1 %1545  ;;  %v886_v39 = vadd.f32 %v3925_v4, %v840_v40  ;;  %v4495_v6 = vmul.f32 %v4429_v45, %v4013_v49  ;;  %v716_v4 = vrot.slane %v710_v37, 4  ;;  %v675_v40 = vmul.f32 %v4294_v24, %v4370_v19 }
 0x5c3   : > { %5474 = vst [vmem:[#allocation106_spill] sm:$0xff] %v4446_v43  ;;  %5475 = vst [vmem:[#allocation107_spill] sm:$0xff] %v4448_v52  ;;  %v1862_v34 = vsel %vm408_vm6, %v1859_v59, %v5476_v13  ;;  %v4463_v43 = vmul.f32 %v4403_v55, %v4386_v36  ;;  %v1883_v52 = vrot.slane %v1877_v11, 6  ;;  %v746_v59 = vmul.f32 %v4399_v8, %v4389_v21 }
 0x5c4   : > { %1890 = vrot.lane.b32.xlu0 %v1887_v10, %s3168_s8  ;;  %1865 = vrot.lane.b32.xlu1 %v1862_v34, %s3168_s8  ;;  %v5478_v11 = vrot.slane %v4407_v31, 2  ;;  %v1940_v10 = vsel %vm679_vm13, %v1938_v14, %v1939_v38  ;;  %v1959_v14 = vrot.slane %v1953_v61, 2  ;;  %v941_v37 = vadd.f32 %v3813_v35, %v886_v39 }
 0x5c5   : > { %v1885_v34 = vsel %vm389_vm3, %v1883_v52, %v1884_v0  ;;  %v2023_v0 = vstv %s4431_s23  ;;  %v4504_v52 = vstv %s4433_s13  ;;  %v1985_v19 = vrot.slane %v4495_v6, 4  ;;  %s5099_s23 = sld [smem:[#allocation7 + $0x53]]  ;;  %s5123_s13 = sld [smem:[#allocation7 + $0x61]] }
 0x5c6   : > { %v682_v7 = vsel %vm679_vm13, %v680_v33, %v5478_v11  ;;  %v4485_v53 = vpop.permute.xlu0 %1591  ;;  %v4487_v13 = vpop.permute.xlu1 %1566  ;;  %v1980_v33 = vmul.f32 %v4429_v45, %v4024_v56  ;;  %v691_v11 = vmul.f32 %v4399_v8, %v4287_v57  ;;  %v1961_v61 = vsel %vm679_vm13, %v1959_v14, %v1960_v23 }
 0x5c7   : > { %5479 = vst [vmem:[#allocation108_spill] sm:$0xff] %v4485_v53  ;;  %5480 = vst [vmem:[#allocation109_spill] sm:$0xff] %v4487_v13  ;;  %v687_v32 = vadd.f32 %v682_v7, %v659_v63  ;;  %v752_v13 = vrot.slane %v746_v59, 6  ;;  %v4518_v63 = vmul.f32 %v4165_v12, %v4013_v49  ;;  %v1942_v7 = vsel %vm679_vm13, %v1939_v38, %v1941_v20 }
 0x5c8   : > { %1943 = vrot.lane.b32.xlu0 %v1940_v10, %s3169_s15  ;;  %1888 = vrot.lane.b32.xlu1 %v1885_v34, %s3168_s8  ;;  %v1987_v59 = vrot.slane %v1980_v33, 4  ;;  %v5482_v34 = vrot.slane %v4463_v43, 4  ;;  %v4532_v14 = vmul.f32 %v4403_v55, %v4287_v57  ;;  %v4537_v35 = vstv %s4469_s16  ;;  %s4573_s8 = sld [smem:[#allocation7 + $0x54]]  ;;  %s5613_s16 = smov 122  }
 0x5c9   : > { %v5483_v38 = vrot.slane %v4480_v28, 6  ;;  %v683_v39 = vrot.slane %v675_v40, 2  ;;  %v1978_v33 = vmul.f32 %v4429_v45, %v4001_v30  ;;  %v727_v57 = vmul.f32 %v4399_v8, %v4330_v3 }
 0x5ca   : > { %v4511_v53 = vpop.permute.xlu0 %1612  ;;  %v4513_v10 = vpop.permute.xlu1 %1589  ;;  %v718_v42 = vsel %vm408_vm6, %v716_v4, %v5482_v34  ;;  %v697_v4 = vrot.slane %v691_v11, 2  ;;  %v5484_v40 = vrot.slane %v4153_v9, 2  ;;  %v4559_v11 = vmul.f32 %v2023_v0, %v4013_v49 }
 0x5cb   : > { %5481 = vst [vmem:[#allocation110_spill] sm:$0xff] %v4511_v53  ;;  %v4528_v53 = vmul.f32 %v4399_v8, %v4327_v41  ;;  %v723_v6 = vadd.f32 %v718_v42, %v687_v32  ;;  %v754_v20 = vsel %vm389_vm3, %v752_v13, %v5483_v38  ;;  %v2006_v32 = vrot.slane %v4518_v63, 4 }
 0x5cc   : > { %1964 = vrot.lane.b32.xlu0 %v1961_v61, %s3169_s15  ;;  %1945 = vrot.lane.b32.xlu1 %v1942_v7, %s3169_s15  ;;  %v712_v61 = vmul.f32 %v4294_v24, %v4386_v36  ;;  %v987_v42 = vadd.f32 %v3938_v25, %v941_v37  ;;  %v1988_v13 = vsel %vm408_vm6, %v1985_v19, %v1987_v59  ;;  %v698_v8 = vrot.slane %v4532_v14, 2 }
 0x5cd   : > { %v1963_v45 = vsel %vm679_vm13, %v1960_v23, %v5484_v40  ;;  %v4564_v36 = vmul.f32 %v4403_v55, %v4330_v3  ;;  %v5485_v38 = vstv %s4279_s11  ;;  %v748_v25 = vmul.f32 %v4294_v24, %v4389_v21  ;;  %s4638_s11 = sld [smem:[#allocation7 + $0x51]] }
 0x5ce   : > { %v4548_v7 = vpop.permute.xlu0 %1635  ;;  %v4550_v34 = vpop.permute.xlu1 %1610  ;;  %v660_v63 = vmul.f32 %v4403_v55, %v5485_v38  ;;  %v5486_v9 = vrot.slane %v4407_v31, 2  ;;  %v1984_v3 = vrot.slane %v1978_v33, 4  ;;  %v2024_v37 = vmul.f32 %v2023_v0, %v4001_v30 }
 0x5cf   : > { %v1999_v59 = vmul.f32 %v4165_v12, %v4001_v30  ;;  %v719_v40 = vrot.slane %v712_v61, 4  ;;  %v4592_v31 = vmul.f32 %v4504_v52, %v4013_v49  ;;  %v1033_v33 = vadd.f32 %v3951_v17, %v987_v42 }
 0x5d0   : > { %1991 = vrot.lane.b32.xlu0 %v1988_v13, %s3169_s15  ;;  %1966 = vrot.lane.b32.xlu1 %v1963_v45, %s3169_s15  ;;  %v684_v23 = vsel %vm679_vm13, %v5486_v9, %v683_v39  ;;  %v5488_v13 = vrot.slane %v4179_v62, 4  ;;  %v2081_v39 = vmul.f32 %v4504_v52, %v4024_v56  ;;  %v1986_v12 = vsel %vm408_vm6, %v1984_v3, %v1985_v19 }
 0x5d1   : > { %v2031_v61 = vrot.slane %v4559_v11, 6  ;;  %v2026_v38 = vmul.f32 %v2023_v0, %v4024_v56  ;;  %v759_v9 = vadd.f32 %v754_v20, %v723_v6  ;;  %v699_v62 = vsel %vm679_vm13, %v697_v4, %v698_v8 }
 0x5d2   : > { %v4583_v24 = vpop.permute.xlu0 %1755  ;;  %v4585_v21 = vpop.permute.xlu1 %1637  ;;  %v2009_v45 = vsel %vm408_vm6, %v2006_v32, %v5488_v13  ;;  %v733_v13 = vrot.slane %v727_v57, 4  ;;  %v734_v17 = vrot.slane %v4564_v36, 4  ;;  %v755_v42 = vrot.slane %v748_v25, 6 }
 0x5d3   : > { %5487 = vst [vmem:[#allocation111_spill] sm:$0xff] %v4583_v24  ;;  %v688_v24 = vadd.f32 %v684_v23, %v660_v63  ;;  %v2030_v19 = vrot.slane %v2024_v37, 6  ;;  %v2005_v3 = vrot.slane %v1999_v59, 4  ;;  %v5489_v11 = vrot.slane %v4463_v43, 4 }
 0x5d4   : > { %2012 = vrot.lane.b32.xlu0 %v2009_v45, %s3169_s15  ;;  %1989 = vrot.lane.b32.xlu1 %v1986_v12, %s3169_s15  ;;  %v2086_v4 = vrot.slane %v4592_v31, 2  ;;  %v2088_v57 = vrot.slane %v2081_v39, 2  ;;  %v4616_v63 = vmul.f32 %v4537_v35, %v4013_v49  ;;  %v1088_v25 = vadd.f32 %v3835_v16, %v1033_v33 }
 0x5d5   : > { %v720_v0 = vsel %vm408_vm6, %v5489_v11, %v719_v40  ;;  %v2032_v23 = vsel %vm389_vm3, %v2030_v19, %v2031_v61  ;;  %v2007_v43 = vsel %vm408_vm6, %v2005_v3, %v2006_v32  ;;  %v2033_v37 = vrot.slane %v2026_v38, 6 }
 0x5d6   : > { %v4609_v6 = vpop.permute.xlu0 %1771  ;;  %v4611_v20 = vpop.permute.xlu1 %1757  ;;  %v724_v59 = vadd.f32 %v720_v0, %v688_v24  ;;  %v4622_v40 = vstv %s4573_s8  ;;  %v2125_v45 = vmul.f32 %v4537_v35, %v4001_v30  ;;  %v2170_v31 = vstv %s4575_s10  ;;  %s2644_s8 = sld [smem:[#allocation8]]  ;;  %s2892_s10 = sld [smem:[#allocation8 + $0x1]] }
 0x5d7   : > { %v773_v16 = vadd.f32 %v3754_v26, %v759_v9  ;;  %v705_v39 = vadd.f32 %v699_v62, %v4528_v53  ;;  %v735_v32 = vsel %vm408_vm6, %v733_v13, %v734_v17  ;;  %v2079_v24 = vmul.f32 %v4504_v52, %v4001_v30 }
 0x5d8   : > { %2035 = vrot.lane.b32.xlu0 %v2032_v23, %s3169_s15  ;;  %2010 = vrot.lane.b32.xlu1 %v2007_v43, %s3169_s15  ;;  %v5490_v33 = vrot.slane %v4480_v28, 6  ;;  %v2089_v26 = vsel %vm679_vm13, %v2086_v4, %v2088_v57  ;;  %v2132_v53 = vrot.slane %v4616_v63, 4  ;;  %v4650_v9 = vmul.f32 %v2170_v31, %v4013_v49 }
 0x5d9   : > { %v1134_v62 = vadd.f32 %v3961_v15, %v1088_v25  ;;  %v814_v52 = vadd.f32 %v4010_v27, %v773_v16  ;;  %v2034_v13 = vsel %vm389_vm3, %v2031_v61, %v2033_v37  ;;  %v4657_v28 = vmul.f32 %v4189_v46, %v4013_v49 }
 0x5da   : > { %v756_v12 = vsel %vm389_vm3, %v5490_v33, %v755_v42  ;;  %v4643_v38 = vpop.permute.xlu0 %1775  ;;  %v4645_v19 = vpop.permute.xlu1 %1773  ;;  %v666_v3 = vmul.f32 %v4403_v55, %v4327_v41  ;;  %v2131_v11 = vrot.slane %v2125_v45, 4  ;;  %v2171_v0 = vmul.f32 %v2170_v31, %v4001_v30 }
 0x5db   : > { %v760_v42 = vadd.f32 %v756_v12, %v724_v59  ;;  %v5492_v15 = vrot.slane %v4298_v51, 2  ;;  %v860_v61 = vadd.f32 %v4018_v5, %v814_v52  ;;  %v2085_v41 = vrot.slane %v2079_v24, 2 }
 0x5dc   : > { %2092 = vrot.lane.b32.xlu0 %v2089_v26, %s5491_s17  ;;  %2037 = vrot.lane.b32.xlu1 %v2034_v13, %s3169_s15  ;;  %v2100_v55 = vmul.f32 %v4189_v46, %v4001_v30  ;;  %v2133_v51 = vsel %vm408_vm6, %v2131_v11, %v2132_v53  ;;  %v2178_v14 = vrot.slane %v4650_v9, 6  ;;  %v2127_v5 = vmul.f32 %v4537_v35, %v4024_v56  ;;  %s4698_s15 = sld [smem:[#allocation7 + $0x52]]  ;;  %v4804_v9 = vld [vmem:[#allocation2 + $0x18] sm:$0xff] }
 0x5dd   : > { %v701_v27 = vsel %vm679_vm13, %v698_v8, %v5492_v15  ;;  %v774_v57 = vadd.f32 %v3767_v18, %v760_v42  ;;  %v1180_v8 = vadd.f32 %v3949_v48, %v1134_v62  ;;  %v906_v46 = vadd.f32 %v4046_v2, %v860_v61 }
 0x5de   : > { %v4677_v25 = vpop.permute.xlu0 %1904  ;;  %v4679_v23 = vpop.permute.xlu1 %1902  ;;  %v2087_v18 = vsel %vm679_vm13, %v2085_v41, %v2086_v4  ;;  %v2107_v43 = vrot.slane %v4657_v28, 2  ;;  %v4691_v37 = vadd.f32 %v735_v32, %v705_v39  ;;  %v706_v59 = vadd.f32 %v701_v27, %v666_v3  ;;  %v5499_v27 = vld [vmem:[#allocation38_spill] sm:$0xff]  ;;  %v5500_v41 = vld [vmem:[#allocation48_spill] sm:$0xff] }
 0x5df   : > { %5493 = vst [vmem:[#allocation112_spill] sm:$0xff] %v4677_v25  ;;  %5494 = vst [vmem:[#allocation113_spill] sm:$0xff] %v4679_v23  ;;  %v2177_v45 = vrot.slane %v2171_v0, 6  ;;  %v4696_v16 = vstv %s4629_s28  ;;  %v5495_v48 = vrot.slane %v4354_v54, 4  ;;  %v815_v35 = vadd.f32 %v3997_v22, %v774_v57  ;;  %v5501_v57 = vld [vmem:[#allocation78_spill] sm:$0xff]  ;;  %s2789_s28 = sshll.u32 %s3345_s25, 4 }
 0x5e0   : > { %2136 = vrot.lane.b32.xlu0 %v2133_v51, %s5491_s17  ;;  %2090 = vrot.lane.b32.xlu1 %v2087_v18, %s5491_s17  ;;  %v2106_v4 = vrot.slane %v2100_v55, 2  ;;  %v4709_v39 = vstv %s4638_s11  ;;  %v2134_v54 = vrot.slane %v2127_v5, 4  ;;  %v2147_v36 = vmul.f32 %v4163_v47, %v4013_v49  ;;  %s2901_s11 = sshll.u32 %s3228_s22, 8 }
 0x5e1   : > { %v737_v2 = vsel %vm408_vm6, %v734_v17, %v5495_v48  ;;  %v2179_v33 = vsel %vm389_vm3, %v2177_v45, %v2178_v14  ;;  %v2173_v17 = vmul.f32 %v2170_v31, %v4024_v56  ;;  %v1235_v22 = vadd.f32 %v3870_v58, %v1180_v8  ;;  %v5503_v48 = vld [vmem:[#allocation17_spill] sm:$0xff] }
 0x5e2   : > { %v4711_v32 = vpop.permute.xlu0 %1920  ;;  %v4713_v24 = vpop.permute.xlu1 %1918  ;;  %v861_v12 = vadd.f32 %v4030_v1, %v815_v35  ;;  %v920_v26 = vadd.f32 %v3790_v60, %v906_v46  ;;  %v2108_v62 = vsel %vm679_vm13, %v2106_v4, %v2107_v43  ;;  %v4725_v52 = vadd.f32 %v737_v2, %v706_v59  ;;  %v5504_v2 = vld [vmem:[#allocation54_spill] sm:$0xff] }
 0x5e3   : > { %5496 = vst [vmem:[#allocation114_spill] sm:$0xff] %v4711_v32  ;;  %5497 = vst [vmem:[#allocation115_spill] sm:$0xff] %v4713_v24  ;;  %v2146_v13 = vmul.f32 %v4163_v47, %v4001_v30  ;;  %v4732_v28 = vstv %s4664_s26  ;;  %v4735_v31 = vstv %s4666_s9  ;;  %v4741_v60 = vmul.f32 %v4395_v50, %v4024_v56 }
 0x5e4   : > { %2182 = vrot.lane.b32.xlu0 %v2179_v33, %s5491_s17  ;;  %2111 = vrot.lane.b32.xlu1 %v2108_v62, %s5491_s17  ;;  %v907_v58 = vadd.f32 %v4036_v29, %v861_v12  ;;  %v1662_v1 = vmul.f32 %v4426_v44, %v4001_v30  ;;  %v4748_v42 = vmul.f32 %v4426_v44, %v4013_v49  ;;  %v2153_v11 = vrot.slane %v2147_v36, 4  ;;  %v5507_v12 = vld [vmem:[#allocation40_spill] sm:$0xff]  ;;  %v5508_v62 = vld [vmem:[#allocation50_spill] sm:$0xff] }
 0x5e5   : > { %v2180_v0 = vrot.slane %v2173_v17, 6  ;;  %v4756_v15 = vmul.f32 %v4696_v16, %v4013_v49  ;;  %v2228_v29 = vmul.f32 %v4696_v16, %v4024_v56  ;;  %v1281_v61 = vadd.f32 %v5499_v27, %v1235_v22 }
 0x5e6   : > { %v4750_v47 = vpop.permute.xlu0 %2049  ;;  %v4752_v3 = vpop.permute.xlu1 %1922  ;;  %v961_v55 = vadd.f32 %v5500_v41, %v920_v26  ;;  %v5502_v51 = vrot.slane %v5501_v57, 2  ;;  %v2135_v8 = vsel %vm408_vm6, %v2132_v53, %v2134_v54  ;;  %v4770_v46 = vmul.f32 %v4395_v50, %v4013_v49 }
 0x5e7   : > { %5498 = vst [vmem:[#allocation116_spill] sm:$0xff] %v4750_v47  ;;  %v2152_v18 = vrot.slane %v2146_v13, 4  ;;  %v4775_v59 = vstv %s4698_s15  ;;  %v4778_v45 = vstv %s4700_s29  ;;  %v1668_v35 = vrot.slane %v1662_v1, 2  ;;  %s5263_s29 = scalar_lea.hbm %s5315_s5, %s2901_s11 }
 0x5e8   : > { %v2110_v5 = vsel %vm679_vm13, %v2107_v43, %v5502_v51  ;;  %2138 = vrot.lane.b32.xlu1 %v2135_v8, %s5491_s17  ;;  %v921_v43 = vadd.f32 %v5503_v48, %v907_v58  ;;  %v1007_v63 = vadd.f32 %v5504_v2, %v961_v55  ;;  %v5365_v53 = vrot.slane %v4748_v42, 2  ;;  %v5509_v58 = vld [vmem:[#allocation55_spill] sm:$0xff] }
 0x5e9   : > { %2113 = vrot.lane.b32.xlu0 %v2110_v5, %s5491_s17  ;;  %v2154_v54 = vsel %vm408_vm6, %v2152_v18, %v2153_v11  ;;  %v2181_v36 = vsel %vm389_vm3, %v2178_v14, %v2180_v0  ;;  %v2233_v17 = vrot.slane %v4756_v15, 2  ;;  %v4794_v22 = vmul.f32 %v4709_v39, %v4013_v49  ;;  %v5511_v14 = vld [vmem:[#allocation103_spill] sm:$0xff]  ;;  %v5514_v18 = vld [vmem:[#allocation73_spill] sm:$0xff] }
 0x5ea   : > { %v4783_v4 = vpop.permute.xlu0 %2065  ;;  %v4785_v33 = vpop.permute.xlu1 %2051  ;;  %v1327_v26 = vadd.f32 %v5507_v12, %v1281_v61  ;;  %v962_v13 = vadd.f32 %v5508_v62, %v921_v43  ;;  %v1053_v1 = vadd.f32 %v5509_v58, %v1007_v63  ;;  %v2235_v27 = vrot.slane %v2228_v29, 2  ;;  %v5512_v29 = vld [vmem:[#allocation51_spill] sm:$0xff]  ;;  %v4837_v63 = vld [vmem:[#allocation2 + $0x20] sm:$0xff]  ;;  %v5518_v12 = vld [vmem:[#allocation58_spill] sm:$0xff] }
 0x5eb   : > { %5505 = vst [vmem:[#allocation38_spill] sm:$0xff] %v4783_v4  ;;  %5506 = vst [vmem:[#allocation48_spill] sm:$0xff] %v4785_v33  ;;  %v5510_v41 = vstv %s4324_s14  ;;  %v4808_v0 = vmul.f32 %v4804_v9, %v5511_v14  ;;  %v2272_v49 = vmul.f32 %v4804_v9, %v4709_v39  ;;  %v4815_v15 = vstv %s4737_s7  ;;  %v5537_v4 = vld [vmem:[#allocation57_spill] sm:$0xff]  ;;  %s2669_s7 = scalar_lea.sflag [#allocation5], %s3345_s25 }
 0x5ec   : > { %v4802_v55 = vmul.f32 %v5510_v41, %v4001_v30  ;;  %2184 = vrot.lane.b32.xlu1 %v2181_v36, %s5491_s17  ;;  %v1008_v61 = vadd.f32 %v5512_v29, %v962_v13  ;;  %v4821_v30 = vsel %vm679_vm13, %v1668_v35, %v5365_v53  ;;  %v4825_v57 = vmul.f32 %v4804_v9, %v4395_v50  ;;  %v5516_v35 = vld [vmem:[#allocation74_spill] sm:$0xff]  ;;  %v5517_v36 = vld [vmem:[#allocation31_spill] sm:$0xff]  ;;  %v5519_v13 = vld [vmem:[#allocation20_spill] sm:$0xff] }
 0x5ed   : > { %2157 = vrot.lane.b32.xlu0 %v2154_v54, %s5491_s17  ;;  %v2226_v51 = vmul.f32 %v4804_v9, %v4696_v16  ;;  %v5515_v48 = vrot.slane %v5514_v18, 4  ;;  %v2279_v2 = vrot.slane %v4794_v22, 4  ;;  %v2248_v54 = vmul.f32 %v4837_v63, %v5516_v35  ;;  %v5520_v29 = vld [vmem:[#allocation104_spill] sm:$0xff] }
 0x5ee   : > { %v4829_v5 = vpop.permute.xlu0 %2069  ;;  %v4831_v8 = vpop.permute.xlu1 %2067  ;;  %v2274_v50 = vmul.f32 %v4709_v39, %v4024_v56  ;;  %v1382_v16 = vadd.f32 %v5517_v36, %v1327_v26  ;;  %v1054_v62 = vadd.f32 %v5518_v12, %v1008_v61  ;;  %v1067_v58 = vadd.f32 %v5519_v13, %v1053_v1  ;;  %v5522_v39 = vld [vmem:[#allocation15_spill] sm:$0xff]  ;;  %v5523_v1 = vld [vmem:[#allocation60_spill] sm:$0xff] }
 0x5ef   : > { %5513 = vst [vmem:[#allocation78_spill] sm:$0xff] %v4831_v8  ;;  %v2156_v43 = vsel %vm408_vm6, %v2153_v11, %v5515_v48  ;;  %v2236_v41 = vsel %vm679_vm13, %v2233_v17, %v2235_v27  ;;  %v4850_v22 = vmul.f32 %v4804_v9, %v5520_v29  ;;  %v2278_v18 = vrot.slane %v2272_v49, 4 }
 0x5f0   : > { %2159 = vrot.lane.b32.xlu1 %v2156_v43, %s5491_s17  ;;  %v2247_v56 = vmul.f32 %v4804_v9, %v5516_v35  ;;  %v792_v26 = vadd.f32 %v5522_v39, %v4691_v37  ;;  %v1108_v61 = vadd.f32 %v5523_v1, %v1067_v58  ;;  %v2232_v27 = vrot.slane %v2226_v51, 2  ;;  %v5526_v35 = vld [vmem:[#allocation42_spill] sm:$0xff]  ;;  %v5528_v1 = vld [vmem:[#allocation61_spill] sm:$0xff]  ;;  %s269_s17 = scalar_lea.vmem [#allocation10], %s2789_s28 }
 0x5f1   : > { %2239 = vrot.lane.b32.xlu0 %v2236_v41, %s5521_s12  ;;  %v4861_v48 = vmul.f32 %v4837_v63, %v4732_v28  ;;  %v2280_v43 = vsel %vm408_vm6, %v2278_v18, %v2279_v2  ;;  %v2254_v49 = vrot.slane %v2248_v54, 2  ;;  %v2281_v13 = vrot.slane %v2274_v50, 4  ;;  %v4868_v41 = vld [vmem:[#allocation2 + $0x28] sm:$0x3f]  ;;  %s2682_s26 = sshll.u32 %s269_s17, 4  ;;  %s5265_s26 = int_to_ptr.vmem [resolvable:$true] %s2682_s26 }
 0x5f2   : > { %v4863_v36 = vpop.permute.xlu0 %2196  ;;  %v4865_v12 = vpop.permute.xlu1 %2198  ;;  %v2320_v37 = vmul.f32 %v4868_v41, %v4732_v28  ;;  %v1428_v51 = vadd.f32 %v5526_v35, %v1382_v16  ;;  %v5527_v58 = vld [vmem:[#allocation22_spill] sm:$0xff]  ;;  %v1154_v53 = vadd.f32 %v5528_v1, %v1108_v61  ;;  %v2234_v11 = vsel %vm679_vm13, %v2232_v27, %v2233_v17  ;;  %v5530_v61 = vld [vmem:[#allocation68_spill] sm:$0xff]  ;;  %s3083_s22 = scalar_lea.vmem %s5265_s26, 256 }
 0x5f3   : > { %5524 = vst [vmem:[#allocation17_spill] sm:$0xff] %v4863_v36  ;;  %5525 = vst [vmem:[#allocation54_spill] sm:$0xff] %v4865_v12  ;;  %v1068_v39 = vadd.f32 %v5527_v58, %v1054_v62  ;;  %v4878_v12 = vmul.f32 %v4837_v63, %v5511_v14  ;;  %v4882_v54 = vmul.f32 %v4837_v63, %v5520_v29  ;;  %v2253_v16 = vrot.slane %v2247_v56, 2  ;;  %v5529_v62 = vld [vmem:[#allocation45_spill] sm:$0xff]  ;;  %v5531_v35 = vld [vmem:[#allocation80_spill] sm:$0xff]  ;;  %p3084_p5 = scmp.ne.s32.totalorder %s5265_s26, %s3083_s22 }
 0x5f4   : > { %v1664_v50 = vmul.f32 %v4868_v41, %v4426_v44  ;;  %2237 = vrot.lane.b32.xlu1 %v2234_v11, %s5521_s12  ;;  %v838_v18 = vadd.f32 %v5529_v62, %v792_v26  ;;  %v1200_v17 = vadd.f32 %v5530_v61, %v1154_v53  ;;  %v4893_v58 = vmul.f32 %v4837_v63, %v5531_v35  ;;  %v5535_v53 = vld [vmem:[#allocation39_spill] sm:$0xff]  ;;  %v5536_v61 = vld [vmem:[#allocation46_spill] sm:$0xff] }
 0x5f5   : > { %2283 = vrot.lane.b32.xlu0 %v2280_v43, %s5521_s12  ;;  %v5532_v1 = vstv %s4324_s14  ;;  %v2255_v11 = vsel %vm679_vm13, %v2253_v16, %v2254_v49  ;;  %v2325_v56 = vrot.slane %v4861_v48, 6  ;;  %v2327_v26 = vrot.slane %v2320_v37, 6  ;;  %v5539_v37 = vld [vmem:[#allocation64_spill] sm:$0xff]  ;;  %v5540_v16 = vld [vmem:[#allocation25_spill] sm:$0xff]  ;;  %s5573_s14 = smov 123   ;;  %p3085_p8 = pnand %p3084_p5, %p5653_p2 }
 0x5f6   : > { %v4898_v36 = vmul.f32 %v4837_v63, %v5532_v1  ;;  %v4900_v44 = vpop.permute.xlu0 %2214  ;;  %v4902_v43 = vpop.permute.xlu1 %2212  ;;  %v1474_v62 = vadd.f32 %v5535_v53, %v1428_v51  ;;  %v884_v27 = vadd.f32 %v5536_v61, %v838_v18  ;;  %v1109_v8 = vadd.f32 %v5537_v4, %v1068_v39  ;;  %v5538_v1 = vld [vmem:[#allocation16_spill] sm:$0xff]  ;;  %v5541_v4 = vld [vmem:[#allocation105_spill] sm:$0xff] }
 0x5f7   : > { %5533 = vst [vmem:[#allocation40_spill] sm:$0xff] %v4900_v44  ;;  %5534 = vst [vmem:[#allocation50_spill] sm:$0xff] %v4902_v43  ;;  %v2282_v33 = vsel %vm408_vm6, %v2279_v2, %v2281_v13  ;;  %v793_v24 = vadd.f32 %v5538_v1, %v4725_v52  ;;  %v1671_v47 = vrot.slane %v1664_v50, 2  ;;  %v2318_v48 = vmul.f32 %v4804_v9, %v4732_v28  ;;  %v5542_v13 = vld [vmem:[#allocation44_spill] sm:$0xff]  ;;  %v5546_v61 = vld [vmem:[#allocation37_spill] sm:$0xff]  ;;  %p3086_p10 = pneg %p3085_p8 }
 0x5f8   : > { %2285 = vrot.lane.b32.xlu1 %v2282_v33, %s5521_s12  ;;  %v1155_v51 = vadd.f32 %v5539_v37, %v1109_v8  ;;  %v1214_v18 = vadd.f32 %v5540_v16, %v1200_v17  ;;  %v4921_v2 = vmul.f32 %v4804_v9, %v5541_v4  ;;  %v2300_v52 = vrot.slane %v4893_v58, 4  ;;  %v5544_v33 = vld [vmem:[#allocation77_spill] sm:$0xff]  ;;  %v5547_v58 = vld [vmem:[#allocation19_spill] sm:$0xff] }
 0x5f9   : > { %2258 = vrot.lane.b32.xlu0 %v2255_v11, %s5521_s12  ;;  %v839_v39 = vadd.f32 %v5542_v13, %v793_v24  ;;  %v5545_v53 = vrot.slane %v5544_v33, 2  ;;  %v4934_v8 = vmul.f32 %v4837_v63, %v4735_v31  ;;  %v2375_v17 = vmul.f32 %v4868_v41, %v4735_v31  ;;  %v5548_v24 = vld [vmem:[#allocation65_spill] sm:$0xff]  ;;  %v5549_v44 = vld [vmem:[#allocation47_spill] sm:$0xff] }
 0x5fa   : > { %v4925_v50 = vpop.permute.xlu0 %2343  ;;  %v4927_v11 = vpop.permute.xlu1 %2216  ;;  %v1529_v1 = vadd.f32 %v5546_v61, %v1474_v62  ;;  %v939_v37 = vadd.f32 %v5547_v58, %v884_v27  ;;  %v1201_v16 = vadd.f32 %v5548_v24, %v1155_v51  ;;  %v2328_v13 = vsel %vm389_vm3, %v2325_v56, %v2327_v26  ;;  %v5553_v26 = vld [vmem:[#allocation49_spill] sm:$0xff]  ;;  %v5559_v24 = vld [vmem:[#allocation86_spill] sm:$0xff] }
 0x5fb   : > { %5543 = vst [vmem:[#allocation55_spill] sm:$0xff] %v4925_v50  ;;  %v2257_v28 = vsel %vm679_vm13, %v2254_v49, %v5545_v53  ;;  %v885_v50 = vadd.f32 %v5549_v44, %v839_v39  ;;  %v5550_v33 = vrot.slane %v4878_v12, 4  ;;  %v5551_v49 = vrot.slane %v4808_v0, 4  ;;  %v5554_v44 = vld [vmem:[#allocation67_spill] sm:$0xff]  ;;  %v5555_v39 = vld [vmem:[#allocation84_spill] sm:$0xff] }
 0x5fc   : > { %v5552_v43 = vrot.slane %v4748_v42, 2  ;;  %2260 = vrot.lane.b32.xlu1 %v2257_v28, %s5521_s12  ;;  %v2324_v27 = vrot.slane %v2318_v48, 6  ;;  %v985_v62 = vadd.f32 %v5553_v26, %v939_v37  ;;  %v1255_v51 = vadd.f32 %v5554_v44, %v1214_v18  ;;  %v5560_v18 = vld [vmem:[#allocation41_spill] sm:$0xff]  ;;  %v5562_v26 = vld [vmem:[#allocation24_spill] sm:$0xff] }
 0x5fd   : > { %v4948_v53 = vsel %vm408_vm6, %v5551_v49, %v5550_v33  ;;  %2331 = vrot.lane.b32.xlu0 %v2328_v13, %s5521_s12  ;;  %v5556_v61 = vrot.slane %v5555_v39, 4  ;;  %v2293_v58 = vmul.f32 %v4804_v9, %v5531_v35  ;;  %v2380_v28 = vrot.slane %v4934_v8, 2  ;;  %v5561_v33 = vld [vmem:[#allocation56_spill] sm:$0xff] }
 0x5fe   : > { %v4953_v32 = vsel %vm679_vm13, %v5552_v43, %v1671_v47  ;;  %v4964_v42 = vpop.permute.xlu0 %2359  ;;  %v4966_v47 = vpop.permute.xlu1 %2345  ;;  %v2326_v43 = vsel %vm389_vm3, %v2324_v27, %v2325_v56  ;;  %v2382_v48 = vrot.slane %v2375_v17, 2  ;;  %v4972_v37 = vmul.f32 %v4837_v63, %v5559_v24  ;;  %v5563_v35 = vld [vmem:[#allocation76_spill] sm:$0xff]  ;;  %v5565_v17 = vld [vmem:[#allocation70_spill] sm:$0xff] }
 0x5ff   : > { %v2303_v0 = vsel %vm408_vm6, %v2300_v52, %v5556_v61  ;;  %5557 = vst [vmem:[#allocation103_spill] sm:$0xff] %v4964_v42  ;;  %5558 = vst [vmem:[#allocation51_spill] sm:$0xff] %v4966_v47  ;;  %v1575_v13 = vadd.f32 %v5560_v18, %v1529_v1  ;;  %v1031_v49 = vadd.f32 %v5561_v33, %v985_v62  ;;  %v5564_v61 = vld [vmem:[#allocation18_spill] sm:$0xff]  ;;  %v2299_v62 = vrot.slane %v2293_v58, 4  ;;  %v5570_v58 = vld [vmem:[#allocation21_spill] sm:$0xff] }
 0x600   : > { %v1215_v44 = vadd.f32 %v5562_v26, %v1201_v16  ;;  %v1301_v39 = vadd.f32 %v5563_v35, %v1255_v51  ;;  %v940_v42 = vadd.f32 %v5564_v61, %v885_v50  ;;  %v4982_v56 = vmul.f32 %v4868_v41, %v5541_v4  ;;  %2329 = vrot.lane.b32.xlu1 %v2326_v43, %s5521_s12  ;;  %v5566_v16 = vld [vmem:[#allocation81_spill] sm:$0xff]  ;;  %v5567_v51 = vld [vmem:[#allocation52_spill] sm:$0xff]  ;;  %v5571_v61 = vld [vmem:[#allocation71_spill] sm:$0xff] }
 0x601   : > { %2306 = vrot.lane.b32.xlu0 %v2303_v0, %s5521_s12  ;;  %v2373_v8 = vmul.f32 %v4804_v9, %v4735_v31  ;;  %v4992_v50 = vmul.f32 %v4837_v63, %v4775_v59  ;;  %v2383_v0 = vsel %vm679_vm13, %v2380_v28, %v2382_v48  ;;  %v2401_v43 = vrot.slane %v4972_v37, 2 }
 0x602   : > { %v1256_v1 = vadd.f32 %v5565_v17, %v1215_v44  ;;  %v1347_v27 = vadd.f32 %v5566_v16, %v1301_v39  ;;  %v986_v18 = vadd.f32 %v5567_v51, %v940_v42  ;;  %v4995_v33 = vpop.permute.xlu0 %2363  ;;  %v4997_v26 = vpop.permute.xlu1 %2361  ;;  %v2419_v31 = vmul.f32 %v4804_v9, %v4775_v59  ;;  %v5569_v44 = vld [vmem:[#allocation43_spill] sm:$0xff]  ;;  %v5572_v42 = vld [vmem:[#allocation53_spill] sm:$0xff] }
 0x603   : > { %5568 = vst [vmem:[#allocation73_spill] sm:$0xff] %v4997_v26  ;;  %v1621_v35 = vadd.f32 %v5569_v44, %v1575_v13  ;;  %v1086_v39 = vadd.f32 %v5570_v58, %v1031_v49  ;;  %v2301_v16 = vsel %vm408_vm6, %v2299_v62, %v2300_v52  ;;  %v5010_v47 = vmul.f32 %v4868_v41, %v4622_v40  ;;  %v5574_v13 = vld [vmem:[#allocation62_spill] sm:$0xff]  ;;  %v5575_v44 = vld [vmem:[#allocation88_spill] sm:$0xff]  ;;  %v5581_v26 = vld [vmem:[#allocation79_spill] sm:$0xff] }
 0x604   : > { %v1302_v17 = vadd.f32 %v5571_v61, %v1256_v1  ;;  %v1032_v51 = vadd.f32 %v5572_v42, %v986_v18  ;;  %2304 = vrot.lane.b32.xlu1 %v2301_v16, %s5521_s12  ;;  %v2379_v48 = vrot.slane %v2373_v8, 2  ;;  %v2394_v37 = vmul.f32 %v4804_v9, %v5559_v24  ;;  %v5576_v58 = vld [vmem:[#allocation28_spill] sm:$0xff]  ;;  %v5579_v42 = vld [vmem:[#allocation90_spill] sm:$0xff]  ;;  %s3174_s12 = smov [#allocation10]  }
 0x605   : > { %2386 = vrot.lane.b32.xlu0 %v2383_v0, %s5573_s14  ;;  %v1132_v49 = vadd.f32 %v5574_v13, %v1086_v39  ;;  %v1361_v52 = vadd.f32 %v5576_v58, %v1347_v27  ;;  %v2426_v62 = vrot.slane %v4992_v50, 4  ;;  %v5580_v0 = vrot.slane %v5579_v42, 2  ;;  %v5582_v27 = vld [vmem:[#allocation63_spill] sm:$0xff]  ;;  %v5583_v50 = vld [vmem:[#allocation93_spill] sm:$0xff] }
 0x606   : > { %v1348_v1 = vadd.f32 %v5575_v44, %v1302_v17  ;;  %v5020_v18 = vpop.permute.xlu0 %2508  ;;  %v5022_v61 = vpop.permute.xlu1 %2506  ;;  %v2425_v8 = vrot.slane %v2419_v31, 4  ;;  %v2441_v24 = vmul.f32 %v4837_v63, %v5581_v26  ;;  %v2421_v39 = vmul.f32 %v4868_v41, %v4775_v59 }
 0x607   : > { %5577 = vst [vmem:[#allocation74_spill] sm:$0xff] %v5020_v18  ;;  %5578 = vst [vmem:[#allocation31_spill] sm:$0xff] %v5022_v61  ;;  %v2404_v16 = vsel %vm679_vm13, %v2401_v43, %v5580_v0  ;;  %v1659_v17 = vadd.f32 %v4741_v60, %v1621_v35  ;;  %v1178_v13 = vadd.f32 %v5582_v27, %v1132_v49  ;;  %v5584_v61 = vld [vmem:[#allocation23_spill] sm:$0xff]  ;;  %v5366_v42 = vrot.slane %v4982_v56, 2  ;;  %v5585_v0 = vld [vmem:[#allocation30_spill] sm:$0xff] }
 0x608   : > { %v1402_v44 = vadd.f32 %v5583_v50, %v1361_v52  ;;  %v2381_v58 = vsel %vm679_vm13, %v2379_v48, %v2380_v28  ;;  %v1087_v18 = vadd.f32 %v5584_v61, %v1032_v51  ;;  %v2400_v31 = vrot.slane %v2394_v37, 2  ;;  %v5586_v35 = vld [vmem:[#allocation95_spill] sm:$0xff] }
 0x609   : > { %2407 = vrot.lane.b32.xlu0 %v2404_v16, %s5573_s14  ;;  %2384 = vrot.lane.b32.xlu1 %v2381_v58, %s5573_s14  ;;  %v2440_v59 = vmul.f32 %v4804_v9, %v5581_v26  ;;  %v1362_v60 = vadd.f32 %v5585_v0, %v1348_v1  ;;  %v2427_v52 = vsel %vm408_vm6, %v2425_v8, %v2426_v62  ;;  %v5587_v51 = vld [vmem:[#allocation59_spill] sm:$0xff]  ;;  %v2447_v37 = vrot.slane %v2441_v24, 4 }
 0x60a   : > { %v1448_v49 = vadd.f32 %v5586_v35, %v1402_v44  ;;  %v5046_v28 = vmul.f32 %v4837_v63, %v4778_v45  ;;  %v1133_v48 = vadd.f32 %v5587_v51, %v1087_v18  ;;  %v5049_v61 = vpop.permute.xlu0 %2490  ;;  %v5051_v16 = vpop.permute.xlu1 %2510  ;;  %v2428_v27 = vrot.slane %v2421_v39, 4  ;;  %v5589_v1 = vld [vmem:[#allocation27_spill] sm:$0xff]  ;;  %v5590_v44 = vld [vmem:[#allocation102_spill] sm:$0xff]  ;;  %v5592_v39 = vld [vmem:[#allocation85_spill] sm:$0xff] }
 0x60b   : > { %5588 = vst [vmem:[#allocation58_spill] sm:$0xff] %v5049_v61  ;;  %v2467_v26 = vmul.f32 %v4868_v41, %v4778_v45  ;;  %v1233_v50 = vadd.f32 %v5589_v1, %v1178_v13  ;;  %v1695_v8 = vadd.f32 %v5366_v42, %v1659_v17  ;;  %v2402_v0 = vsel %vm679_vm13, %v2400_v31, %v2401_v43  ;;  %v5591_v35 = vld [vmem:[#allocation66_spill] sm:$0xff]  ;;  %v5593_v13 = vld [vmem:[#allocation69_spill] sm:$0xff]  ;;  %v5594_v1 = vld [vmem:[#allocation87_spill] sm:$0xff] }
 0x60c   : > { %v1494_v58 = vadd.f32 %v5590_v44, %v1448_v49  ;;  %v1179_v18 = vadd.f32 %v5591_v35, %v1133_v48  ;;  %v2446_v24 = vrot.slane %v2440_v59, 4  ;;  %v5066_v61 = vmul.f32 %v4837_v63, %v5592_v39  ;;  %v5596_v42 = vld [vmem:[#allocation82_spill] sm:$0xff] }
 0x60d   : > { %2430 = vrot.lane.b32.xlu0 %v2427_v52, %s5573_s14  ;;  %2405 = vrot.lane.b32.xlu1 %v2402_v0, %s5573_s14  ;;  %v1279_v49 = vadd.f32 %v5593_v13, %v1233_v50  ;;  %v1403_v44 = vadd.f32 %v5594_v1, %v1362_v60  ;;  %v1724_v17 = vrot.slane %v5010_v47, 4  ;;  %v2541_v43 = vmul.f32 %v4804_v9, %v5592_v39  ;;  %v5597_v50 = vld [vmem:[#allocation98_spill] sm:$0xff] }
 0x60e   : > { %v1868_v31 = vpop.permute.xlu0 %1867  ;;  %v5073_v48 = vpop.permute.xlu1 %2492  ;;  %v2448_v52 = vsel %vm408_vm6, %v2446_v24, %v2447_v37  ;;  %v2429_v59 = vsel %vm408_vm6, %v2426_v62, %v2428_v27  ;;  %v2472_v0 = vrot.slane %v5046_v28, 6  ;;  %v2474_v35 = vrot.slane %v2467_v26, 6  ;;  %v5598_v60 = vld [vmem:[#allocation34_spill] sm:$0xff]  ;;  %v5600_v28 = vld [vmem:[#allocation99_spill] sm:$0xff] }
 0x60f   : > { %5595 = vst [vmem:[#allocation20_spill] sm:$0xff] %v5073_v48  ;;  %v1325_v51 = vadd.f32 %v5596_v42, %v1279_v49  ;;  %v1449_v13 = vadd.f32 %v5597_v50, %v1403_v44  ;;  %v1508_v1 = vadd.f32 %v5598_v60, %v1494_v58  ;;  %v1731_v25 = vadd.f32 %v1724_v17, %v1695_v8  ;;  %v5599_v39 = vld [vmem:[#allocation26_spill] sm:$0xff]  ;;  %v5602_v44 = vld [vmem:[#allocation83_spill] sm:$0xff]  ;;  %v5604_v50 = vld [vmem:[#allocation29_spill] sm:$0xff] }
 0x610   : > { %v1234_v23 = vadd.f32 %v5599_v39, %v1179_v18  ;;  %v5086_v48 = vmul.f32 %v4837_v63, %v5541_v4  ;;  %v2548_v62 = vrot.slane %v5066_v61, 2  ;;  %v2465_v42 = vmul.f32 %v4804_v9, %v4778_v45  ;;  %v5601_v4 = vld [vmem:[#allocation72_spill] sm:$0xff] }
 0x611   : > { %2451 = vrot.lane.b32.xlu0 %v2448_v52, %s5573_s14  ;;  %2432 = vrot.lane.b32.xlu1 %v2429_v59, %s5573_s14  ;;  %v1495_v27 = vadd.f32 %v5600_v28, %v1449_v13  ;;  %v5096_v26 = vmul.f32 %v4837_v63, %v4622_v40  ;;  %v1782_v58 = vadd.f32 %v4643_v38, %v1731_v25  ;;  %v2547_v8 = vrot.slane %v2541_v43, 2  ;;  %v5605_v38 = vld [vmem:[#allocation101_spill] sm:$0xff] }
 0x612   : > { %v1280_v18 = vadd.f32 %v5601_v4, %v1234_v23  ;;  %v1969_v24 = vpop.permute.xlu0 %1968  ;;  %v1822_v49 = vpop.permute.xlu1 %1821  ;;  %v5603_v61 = vrot.slane %v5602_v44, 4  ;;  %v2521_v45 = vmul.f32 %v4837_v63, %v4815_v15  ;;  %v2522_v59 = vmul.f32 %v4868_v41, %v4815_v15  ;;  %v5606_v23 = vld [vmem:[#allocation75_spill] sm:$0xff]  ;;  %v5607_v44 = vld [vmem:[#allocation96_spill] sm:$0xff] }
 0x613   : > { %v1380_v13 = vadd.f32 %v5604_v50, %v1325_v51  ;;  %v1549_v25 = vadd.f32 %v5605_v38, %v1508_v1  ;;  %v1828_v43 = vadd.f32 %v1822_v49, %v1782_v58  ;;  %v2475_v60 = vsel %vm389_vm3, %v2472_v0, %v2474_v35 }
 0x614   : > { %v2450_v52 = vsel %vm408_vm6, %v2447_v37, %v5603_v61  ;;  %v1326_v39 = vadd.f32 %v5606_v23, %v1280_v18  ;;  %v5115_v28 = vmul.f32 %v4868_v41, %v5511_v14  ;;  %v2549_v37 = vsel %vm679_vm13, %v2547_v8, %v2548_v62  ;;  %v5608_v61 = vld [vmem:[#allocation33_spill] sm:$0xff] }
 0x615   : > { %2478 = vrot.lane.b32.xlu0 %v2475_v60, %s5573_s14  ;;  %2453 = vrot.lane.b32.xlu1 %v2450_v52, %s5573_s14  ;;  %v2471_v4 = vrot.slane %v2465_v42, 6  ;;  %v1426_v51 = vadd.f32 %v5607_v44, %v1380_v13  ;;  %v1509_v1 = vadd.f32 %v5608_v61, %v1495_v27  ;;  %v1595_v58 = vadd.f32 %v4513_v10, %v1549_v25  ;;  %v5609_v52 = vld [vmem:[#allocation91_spill] sm:$0xff]  ;;  %v5610_v42 = vld [vmem:[#allocation97_spill] sm:$0xff]  ;;  %v5617_v61 = vld [vmem:[#allocation92_spill] sm:$0xff] }
 0x616   : > { %v1874_v35 = vadd.f32 %v1868_v31, %v1828_v43  ;;  %v2162_v18 = vpop.permute.xlu0 %2161  ;;  %v2015_v49 = vpop.permute.xlu1 %2014  ;;  %v2527_v50 = vrot.slane %v2521_v45, 2  ;;  %v2529_v38 = vrot.slane %v2522_v59, 2  ;;  %v2588_v8 = vmul.f32 %v4837_v63, %v5609_v52  ;;  %v5611_v13 = vld [vmem:[#allocation107_spill] sm:$0xff]  ;;  %v5612_v31 = vld [vmem:[#allocation32_spill] sm:$0xff]  ;;  %v5615_v44 = vld [vmem:[#allocation89_spill] sm:$0xff] }
 0x617   : > { %v2473_v14 = vsel %vm389_vm3, %v2471_v4, %v2472_v0  ;;  %v1472_v60 = vadd.f32 %v5610_v42, %v1426_v51  ;;  %v1550_v23 = vadd.f32 %v5611_v13, %v1509_v1  ;;  %v1641_v27 = vadd.f32 %v4548_v7, %v1595_v58  ;;  %v5614_v59 = vld [vmem:[#allocation108_spill] sm:$0xff] }
 0x618   : > { %v1929_v10 = vadd.f32 %v4752_v3, %v1874_v35  ;;  %v1381_v25 = vadd.f32 %v5612_v31, %v1326_v39  ;;  %v1686_v43 = vrot.slane %v5086_v48, 2  ;;  %v5136_v0 = vmul.f32 %v4868_v41, %v5520_v29  ;;  %v5618_v42 = vld [vmem:[#allocation36_spill] sm:$0xff] }
 0x619   : > { %2552 = vrot.lane.b32.xlu0 %v2549_v37, %s5613_s16  ;;  %2476 = vrot.lane.b32.xlu1 %v2473_v14, %s5573_s14  ;;  %v2520_v45 = vmul.f32 %v4804_v9, %v4815_v15  ;;  %v1596_v4 = vadd.f32 %v5614_v59, %v1550_v23  ;;  %v5616_v3 = vrot.slane %v5615_v44, 2  ;;  %v2565_v51 = vstv %s5099_s23  ;;  %s3087_s14 = sshll.u32 %s3174_s12, 4  ;;  %s3088_s14 = int_to_ptr.vmem [resolvable:$false] %s3087_s14 }
 0x61a   : > { %v1975_v7 = vadd.f32 %v1969_v24, %v1929_v10  ;;  %v1427_v1 = vadd.f32 %v5617_v61, %v1381_v25  ;;  %v2263_v58 = vpop.permute.xlu0 %2262  ;;  %v2116_v29 = vpop.permute.xlu1 %2115  ;;  %v2530_v37 = vsel %vm679_vm13, %v2527_v50, %v2529_v38  ;;  %v2594_v35 = vrot.slane %v2588_v8, 4  ;;  %v5619_v10 = vld [vmem:[#allocation100_spill] sm:$0xff]  ;;  %v5620_v8 = vld [vmem:[#allocation106_spill] sm:$0xff]  ;;  %s3089_s23 = scalar_lea.vmem %s3088_s14, 512  ;;  %p3090_p4 = scmp.lt.s32.totalorder %s5265_s26, %s3088_s14 }
 0x61b   : > { %v2551_v39 = vsel %vm679_vm13, %v2548_v62, %v5616_v3  ;;  %v2567_v14 = vmul.f32 %v4837_v63, %v2565_v51  ;;  %v1527_v15 = vadd.f32 %v5618_v42, %v1472_v60  ;;  %v1650_v13 = vadd.f32 %v4802_v55, %v1641_v27  ;;  %p3091_p12 = scmp.lt.s32.totalorder %s3089_s23, %s3083_s22 }
 0x61c   : > { %v1642_v24 = vadd.f32 %v4585_v21, %v1596_v4  ;;  %v2021_v23 = vadd.f32 %v2015_v49, %v1975_v7  ;;  %v1473_v62 = vadd.f32 %v5619_v10, %v1427_v1  ;;  %v2526_v31 = vrot.slane %v2520_v45, 2  ;;  %v5621_v4 = vld [vmem:[#allocation94_spill] sm:$0xff] }
 0x61d   : > { %2533 = vrot.lane.b32.xlu0 %v2530_v37, %s5613_s16  ;;  %2554 = vrot.lane.b32.xlu1 %v2551_v39, %s5613_s16  ;;  %v2566_v25 = vmul.f32 %v4804_v9, %v2565_v51  ;;  %v2587_v38 = vmul.f32 %v4804_v9, %v5609_v52  ;;  %v1573_v59 = vadd.f32 %v5620_v8, %v1527_v15  ;;  %v2611_v55 = vstv %s5123_s13  ;;  %p3092_p0 = por %p3091_p12, %p3090_p4 }
 0x61e   : > { %v2076_v60 = vadd.f32 %v4829_v5, %v2021_v23  ;;  %v2568_v21 = vmul.f32 %v4868_v41, %v2565_v51  ;;  %v5163_v49 = vpop.permute.xlu0 %2455  ;;  %v2309_v27 = vpop.permute.xlu1 %2308  ;;  %v5622_v7 = vrot.slane %v5621_v4, 4  ;;  %v2528_v45 = vsel %vm679_vm13, %v2526_v31, %v2527_v50  ;;  %v5623_v51 = vld [vmem:[#allocation35_spill] sm:$0xff] }
 0x61f   : > { %v2573_v3 = vrot.slane %v2567_v14, 4  ;;  %v2613_v39 = vmul.f32 %v4837_v63, %v2611_v55  ;;  %v1675_v52 = vadd.f32 %v4821_v30, %v1650_v13  ;;  %v1619_v61 = vadd.f32 %v4550_v34, %v1573_v59  ;;  %v5624_v34 = vld [vmem:[#allocation109_spill] sm:$0xff]  ;;  %p3093_p7 = pnand %p3092_p0, %p3086_p10 }
 0x620   : > { %v2597_v44 = vsel %vm408_vm6, %v2594_v35, %v5622_v7  ;;  %v1651_v5 = vadd.f32 %v4898_v36, %v1642_v24  ;;  %v2122_v1 = vadd.f32 %v2116_v29, %v2076_v60  ;;  %v1528_v37 = vadd.f32 %v5623_v51, %v1473_v62 }
 0x621   : > { %2600 = vrot.lane.b32.xlu0 %v2597_v44, %s5613_s16  ;;  %2531 = vrot.lane.b32.xlu1 %v2528_v45, %s5613_s16  ;;  %v2572_v42 = vrot.slane %v2566_v25, 4  ;;  %v2593_v15 = vrot.slane %v2587_v38, 4  ;;  %v2612_v50 = vmul.f32 %v4804_v9, %v2611_v55  ;;  %v1707_v14 = vrot.slane %v5115_v28, 4 }
 0x622   : > { %v2168_v63 = vadd.f32 %v2162_v18, %v2122_v1  ;;  %v2575_v23 = vrot.slane %v2568_v21, 4  ;;  %v2614_v30 = vmul.f32 %v4868_v41, %v2611_v55  ;;  %v1574_v13 = vadd.f32 %v5624_v34, %v1528_v37  ;;  %v2557_v36 = vpop.permute.xlu0 %2556  ;;  %v2410_v29 = vpop.permute.xlu1 %2409 }
 0x623   : > { %v2574_v24 = vsel %vm408_vm6, %v2572_v42, %v2573_v3  ;;  %v2595_v10 = vsel %vm408_vm6, %v2593_v15, %v2594_v35  ;;  %v2619_v62 = vrot.slane %v2613_v39, 6  ;;  %v1657_v31 = vadd.f32 %v4825_v57, %v1619_v61 }
 0x624   : > { %v1711_v25 = vadd.f32 %v4948_v53, %v1675_v52  ;;  %v1676_v38 = vadd.f32 %v4953_v32, %v1651_v5  ;;  %v2223_v28 = vadd.f32 %v4927_v11, %v2168_v63  ;;  %v5625_v18 = vrot.slane %v4882_v54, 6  ;;  %v5627_v53 = vld [vmem:[#allocation110_spill] sm:$0xff] }
 0x625   : > { %v5626_v41 = vrot.slane %v4850_v22, 6  ;;  %v1715_v59 = vmul.f32 %v4804_v9, %v4622_v40  ;;  %v1722_v35 = vrot.slane %v5096_v26, 4  ;;  %2577 = vrot.lane.b32.xlu0 %v2574_v24, %s5613_s16  ;;  %2598 = vrot.lane.b32.xlu1 %v2595_v10, %s5613_s16  ;;  %v2618_v57 = vrot.slane %v2612_v50, 6 }
 0x626   : > { %v1620_v32 = vadd.f32 %v5627_v53, %v1574_v13  ;;  %v5628_v11 = vrot.slane %v4921_v2, 2  ;;  %v1743_v60 = vrot.slane %v5136_v0, 6  ;;  %v2269_v55 = vadd.f32 %v2263_v58, %v2223_v28  ;;  %v1799_v26 = vpop.permute.xlu0 %1798  ;;  %v2603_v21 = vpop.permute.xlu1 %2602 }
 0x627   : > { %v1742_v8 = vsel %vm389_vm3, %v5626_v41, %v5625_v18  ;;  %v5629_v40 = vrot.slane %v4878_v12, 4  ;;  %v2620_v4 = vsel %vm389_vm3, %v2618_v57, %v2619_v62  ;;  %v2576_v7 = vsel %vm408_vm6, %v2573_v3, %v2575_v23 }
 0x628   : > { %v1687_v22 = vsel %vm679_vm13, %v5628_v11, %v1686_v43  ;;  %v2621_v44 = vrot.slane %v2614_v30, 6  ;;  %v1747_v45 = vadd.f32 %v1742_v8, %v1711_v25  ;;  %v2315_v2 = vadd.f32 %v2309_v27, %v2269_v55  ;;  %v5631_v27 = vld [vmem:[#allocation111_spill] sm:$0xff] }
 0x629   : > { %v1708_v9 = vsel %vm408_vm6, %v5629_v40, %v1707_v14  ;;  %v1693_v39 = vadd.f32 %v1687_v22, %v1657_v31  ;;  %v1721_v61 = vrot.slane %v1715_v59, 4  ;;  %2623 = vrot.lane.b32.xlu0 %v2620_v4, %s5613_s16  ;;  %2579 = vrot.lane.b32.xlu1 %v2576_v7, %s5613_s16  ;;  %v1658_v12 = vadd.f32 %v4770_v46, %v1620_v32 }
 0x62a   : > { %v1712_v52 = vadd.f32 %v1708_v9, %v1676_v38  ;;  %v2370_v0 = vadd.f32 %v4995_v33, %v2315_v2  ;;  %v5630_v5 = vmov %v5625_v18  ;;  %v1820_v1 = vpop.permute.xlu0 %1819  ;;  %v1797_v51 = vpop.permute.xlu1 %1796  ;;  %v2622_v37 = vsel %vm389_vm3, %v2619_v62, %v2621_v44 }
 0x62b   : > { %v1723_v58 = vsel %vm408_vm6, %v1721_v61, %v1722_v35  ;;  %v1744_v3 = vsel %vm389_vm3, %v5630_v5, %v1743_v60  ;;  %v1761_v42 = vadd.f32 %v5631_v27, %v1747_v45  ;;  %v5632_v63 = vrot.slane %v4982_v56, 2  ;;  %v5633_v61 = vld [vmem:[#allocation113_spill] sm:$0xff] }
 0x62c   : > { %v1729_v15 = vadd.f32 %v1723_v58, %v1693_v39  ;;  %v1748_v50 = vadd.f32 %v1744_v3, %v1712_v52  ;;  %v2416_v14 = vadd.f32 %v2410_v29, %v2370_v0  ;;  %v1725_v56 = vsel %vm408_vm6, %v1722_v35, %v1724_v17 }
 0x62d   : > { %v1689_v46 = vsel %vm679_vm13, %v1686_v43, %v5632_v63  ;;  %2625 = vrot.lane.b32.xlu1 %v2622_v37, %s5613_s16  ;;  %v1802_v23 = vadd.f32 %v1797_v51, %v1761_v42  ;;  %v5634_v37 = vld [vmem:[#allocation112_spill] sm:$0xff]  ;;  %v5635_v63 = vld [vmem:[#allocation114_spill] sm:$0xff] }
 0x62e   : > { %v1694_v54 = vadd.f32 %v1689_v46, %v1658_v12  ;;  %v2462_v33 = vadd.f32 %v5163_v49, %v2416_v14  ;;  %v1843_v30 = vpop.permute.xlu0 %1842  ;;  %v1818_v34 = vpop.permute.xlu1 %1817  ;;  %v1780_v13 = vadd.f32 %v4609_v6, %v1729_v15  ;;  %v1762_v24 = vadd.f32 %v4611_v20, %v1748_v50 }
 0x62f   : > { %v1848_v10 = vadd.f32 %v1843_v30, %v1802_v23  ;;  %v5636_v23 = vld [vmem:[#allocation116_spill] sm:$0xff] }
 0x630   : > { %v2517_v29 = vadd.f32 %v5051_v16, %v2462_v33  ;;  %v1730_v48 = vadd.f32 %v1725_v56, %v1694_v54  ;;  %v1803_v43 = vadd.f32 %v1799_v26, %v1762_v24  ;;  %v1826_v31 = vadd.f32 %v1818_v34, %v1780_v13  ;;  %v5637_v24 = vld [vmem:[#allocation115_spill] sm:$0xff] }
 0x632   : > { %v2563_v62 = vadd.f32 %v2557_v36, %v2517_v29  ;;  %v1864_v25 = vpop.permute.xlu0 %1863  ;;  %v1845_v49 = vpop.permute.xlu1 %1844  ;;  %v1781_v38 = vadd.f32 %v4645_v19, %v1730_v48 }
 0x633   : > { %v1872_v6 = vadd.f32 %v1864_v25, %v1826_v31  ;;  %v1849_v18 = vadd.f32 %v1845_v49, %v1803_v43  ;;  %v5638_v49 = vld [vmem:[#allocation48_spill] sm:$0xff] }
 0x634   : > { %v5232_v28 = vadd.f32 %v2603_v21, %v2563_v62  ;;  %v1827_v20 = vadd.f32 %v1820_v1, %v1781_v38 }
 0x635   : > { %v1927_v29 = vadd.f32 %v5637_v24, %v1872_v6 }
 0x636   : > { %v1891_v41 = vpop.permute.xlu0 %1890  ;;  %v1866_v16 = vpop.permute.xlu1 %1865 }
 0x637   : > { %v1895_v8 = vadd.f32 %v1891_v41, %v1849_v18  ;;  %v1873_v59 = vadd.f32 %v1866_v16, %v1827_v20  ;;  %v5639_v20 = vld [vmem:[#allocation78_spill] sm:$0xff] }
 0x639   : > { %v1909_v27 = vadd.f32 %v5634_v37, %v1895_v8  ;;  %v1928_v46 = vadd.f32 %v5635_v63, %v1873_v59  ;;  %v5644_v37 = vld [vmem:[#allocation50_spill] sm:$0xff]  ;;  %v5645_v63 = vld [vmem:[#allocation73_spill] sm:$0xff] }
 0x63a   : > { %v1944_v47 = vpop.permute.xlu0 %1943  ;;  %v1889_v57 = vpop.permute.xlu1 %1888 }
 0x63b   : > { %v1894_v39 = vadd.f32 %v1889_v57, %v1848_v10  ;;  %v5640_v57 = vld [vmem:[#allocation38_spill] sm:$0xff] }
 0x63d   : > { %v1908_v12 = vadd.f32 %v5633_v61, %v1894_v39  ;;  %v5642_v39 = vld [vmem:[#allocation40_spill] sm:$0xff] }
 0x63e   : > { %v1965_v17 = vpop.permute.xlu0 %1964  ;;  %v1946_v35 = vpop.permute.xlu1 %1945 }
 0x63f   : > { %v1949_v5 = vadd.f32 %v1944_v47, %v1908_v12  ;;  %v1950_v14 = vadd.f32 %v1946_v35, %v1909_v27  ;;  %v1973_v43 = vadd.f32 %v1965_v17, %v1927_v29  ;;  %v5647_v29 = vld [vmem:[#allocation103_spill] sm:$0xff] }
 0x642   : > { %v1992_v53 = vpop.permute.xlu0 %1991  ;;  %v1967_v36 = vpop.permute.xlu1 %1966 }
 0x643   : > { %v1996_v54 = vadd.f32 %v1992_v53, %v1950_v14  ;;  %v1974_v33 = vadd.f32 %v1967_v36, %v1928_v46 }
 0x646   : > { %v2013_v32 = vpop.permute.xlu0 %2012  ;;  %v1990_v11 = vpop.permute.xlu1 %1989 }
 0x647   : > { %v1995_v51 = vadd.f32 %v1990_v11, %v1949_v5  ;;  %v2020_v10 = vadd.f32 %v2013_v32, %v1974_v33 }
 0x649   : > { %v2075_v41 = vadd.f32 %v5639_v20, %v2020_v10 }
 0x64a   : > { %v2036_v22 = vpop.permute.xlu0 %2035  ;;  %v2011_v60 = vpop.permute.xlu1 %2010 }
 0x64b   : > { %v2041_v42 = vadd.f32 %v2036_v22, %v1995_v51  ;;  %v2019_v25 = vadd.f32 %v2011_v60, %v1973_v43  ;;  %v5641_v60 = vld [vmem:[#allocation17_spill] sm:$0xff]  ;;  %v5643_v51 = vld [vmem:[#allocation54_spill] sm:$0xff]  ;;  %v5648_v43 = vld [vmem:[#allocation51_spill] sm:$0xff] }
 0x64d   : > { %v2055_v30 = vadd.f32 %v5636_v23, %v2041_v42  ;;  %v2074_v35 = vadd.f32 %v5640_v57, %v2019_v25  ;;  %v5649_v25 = vld [vmem:[#allocation74_spill] sm:$0xff] }
 0x64e   : > { %v2093_v19 = vpop.permute.xlu0 %2092  ;;  %v2038_v55 = vpop.permute.xlu1 %2037 }
 0x64f   : > { %v2042_v56 = vadd.f32 %v2038_v55, %v1996_v54 }
 0x651   : > { %v2056_v38 = vadd.f32 %v5638_v49, %v2042_v56 }
 0x652   : > { %v2137_v40 = vpop.permute.xlu0 %2136  ;;  %v2091_v9 = vpop.permute.xlu1 %2090 }
 0x653   : > { %v2096_v48 = vadd.f32 %v2091_v9, %v2055_v30  ;;  %v2097_v53 = vadd.f32 %v2093_v19, %v2056_v38  ;;  %v5646_v30 = vld [vmem:[#allocation55_spill] sm:$0xff] }
 0x655   : > { %v2142_v18 = vadd.f32 %v2137_v40, %v2096_v48 }
 0x656   : > { %v2183_v26 = vpop.permute.xlu0 %2182  ;;  %v2112_v21 = vpop.permute.xlu1 %2111 }
 0x657   : > { %v2188_v47 = vadd.f32 %v2183_v26, %v2142_v18  ;;  %v2120_v36 = vadd.f32 %v2112_v21, %v2074_v35 }
 0x659   : > { %v2202_v9 = vadd.f32 %v5641_v60, %v2188_v47 }
 0x65a   : > { %v2139_v7 = vpop.permute.xlu1 %2138 }
 0x65b   : > { %v2114_v4 = vpop.permute.xlu0 %2113  ;;  %v2143_v32 = vadd.f32 %v2139_v7, %v2097_v53 }
 0x65c   : > { %v2121_v16 = vadd.f32 %v2114_v4, %v2075_v41 }
 0x65e   : > { %v2185_v45 = vpop.permute.xlu1 %2184 }
 0x65f   : > { %v2158_v44 = vpop.permute.xlu0 %2157  ;;  %v2189_v55 = vadd.f32 %v2185_v45, %v2143_v32 }
 0x660   : > { %v2166_v22 = vadd.f32 %v2158_v44, %v2120_v36 }
 0x661   : > { %v2203_v26 = vadd.f32 %v5643_v51, %v2189_v55  ;;  %v5652_v55 = vld [vmem:[#allocation20_spill] sm:$0xff] }
 0x662   : > { %v2160_v2 = vpop.permute.xlu1 %2159  ;;  %v2221_v27 = vadd.f32 %v5644_v37, %v2166_v22  ;;  %v2649_v37 = vstv %s2892_s10 }
 0x663   : > { %v2240_v52 = vpop.permute.xlu0 %2239  ;;  %v2167_v6 = vadd.f32 %v2160_v2, %v2121_v16  ;;  %v5650_v16 = vld [vmem:[#allocation31_spill] sm:$0xff] }
 0x664   : > { %v2244_v14 = vadd.f32 %v2240_v52, %v2203_v26 }
 0x665   : > { %v2222_v40 = vadd.f32 %v5642_v39, %v2167_v6  ;;  %v5651_v6 = vld [vmem:[#allocation58_spill] sm:$0xff] }
 0x666   : > { %v2238_v58 = vpop.permute.xlu1 %2237 }
 0x667   : > { %v2284_v0 = vpop.permute.xlu0 %2283  ;;  %v2243_v61 = vadd.f32 %v2238_v58, %v2202_v9 }
 0x669   : > { %v2289_v21 = vadd.f32 %v2284_v0, %v2243_v61 }
 0x66a   : > { %v2286_v1 = vpop.permute.xlu1 %2285 }
 0x66b   : > { %v2259_v3 = vpop.permute.xlu0 %2258  ;;  %v2290_v54 = vadd.f32 %v2286_v1, %v2244_v14 }
 0x66c   : > { %v2267_v2 = vadd.f32 %v2259_v3, %v2221_v27 }
 0x66e   : > { %v2261_v50 = vpop.permute.xlu1 %2260 }
 0x66f   : > { %v2332_v15 = vpop.permute.xlu0 %2331  ;;  %v2268_v12 = vadd.f32 %v2261_v50, %v2222_v40 }
 0x670   : > { %v2336_v23 = vadd.f32 %v2332_v15, %v2290_v54 }
 0x672   : > { %v2330_v13 = vpop.permute.xlu1 %2329  ;;  %v2350_v52 = vadd.f32 %v5648_v43, %v2336_v23 }
 0x673   : > { %v2307_v34 = vpop.permute.xlu0 %2306  ;;  %v2335_v44 = vadd.f32 %v2330_v13, %v2289_v21 }
 0x674   : > { %v2314_v19 = vadd.f32 %v2307_v34, %v2268_v12 }
 0x675   : > { %v2349_v24 = vadd.f32 %v5646_v30, %v2335_v44 }
 0x676   : > { %v2305_v31 = vpop.permute.xlu1 %2304  ;;  %v2369_v46 = vadd.f32 %v5645_v63, %v2314_v19 }
 0x677   : > { %v2387_v62 = vpop.permute.xlu0 %2386  ;;  %v2313_v45 = vadd.f32 %v2305_v31, %v2267_v2 }
 0x678   : > { %v2391_v1 = vadd.f32 %v2387_v62, %v2350_v52 }
 0x679   : > { %v2368_v10 = vadd.f32 %v5647_v29, %v2313_v45 }
 0x67b   : > { %v2408_v8 = vpop.permute.xlu0 %2407  ;;  %v2385_v59 = vpop.permute.xlu1 %2384 }
 0x67c   : > { %v2415_v33 = vadd.f32 %v2408_v8, %v2369_v46  ;;  %v2390_v34 = vadd.f32 %v2385_v59, %v2349_v24  ;;  %v2638_v59 = vrot.slane %v5232_v28, 1 }
 0x67f   : > { %v2431_v11 = vpop.permute.xlu0 %2430  ;;  %v2406_v17 = vpop.permute.xlu1 %2405 }
 0x680   : > { %v2414_v3 = vadd.f32 %v2406_v17, %v2368_v10  ;;  %v2436_v13 = vadd.f32 %v2431_v11, %v2390_v34 }
 0x683   : > { %v2452_v4 = vpop.permute.xlu0 %2451  ;;  %v2433_v5 = vpop.permute.xlu1 %2432 }
 0x684   : > { %v2460_v31 = vadd.f32 %v2452_v4, %v2414_v3  ;;  %v2437_v41 = vadd.f32 %v2433_v5, %v2391_v1  ;;  %v2645_v5 = vstv %s2644_s8 }
 0x686   : > { %v2515_v8 = vadd.f32 %v5650_v16, %v2460_v31 }
 0x687   : > { %v2479_v7 = vpop.permute.xlu0 %2478  ;;  %v2454_v42 = vpop.permute.xlu1 %2453 }
 0x688   : > { %v2461_v56 = vadd.f32 %v2454_v42, %v2415_v33  ;;  %v2483_v57 = vadd.f32 %v2479_v7, %v2437_v41 }
 0x68a   : > { %v2516_v49 = vadd.f32 %v5649_v25, %v2461_v56  ;;  %v2497_v60 = vadd.f32 %v5652_v55, %v2483_v57 }
 0x68b   : > { %v2553_v58 = vpop.permute.xlu0 %2552  ;;  %v2477_v50 = vpop.permute.xlu1 %2476 }
 0x68c   : > { %v2482_v38 = vadd.f32 %v2477_v50, %v2436_v13  ;;  %v2561_v35 = vadd.f32 %v2553_v58, %v2515_v8 }
 0x68e   : > { %v2496_v36 = vadd.f32 %v5651_v6, %v2482_v38 }
 0x68f   : > { %v2534_v0 = vpop.permute.xlu0 %2533  ;;  %v2555_v48 = vpop.permute.xlu1 %2554 }
 0x690   : > { %v2562_v18 = vadd.f32 %v2555_v48, %v2516_v49  ;;  %v2538_v61 = vadd.f32 %v2534_v0, %v2497_v60 }
 0x693   : > { %v2601_v20 = vpop.permute.xlu0 %2600  ;;  %v2532_v15 = vpop.permute.xlu1 %2531 }
 0x694   : > { %v2608_v47 = vadd.f32 %v2601_v20, %v2562_v18  ;;  %v2537_v62 = vadd.f32 %v2532_v15, %v2496_v36 }
 0x696   : > { %v2636_v53 = vrot.slane %v2608_v47, 1 }
 0x697   : > { %v2578_v32 = vpop.permute.xlu0 %2577  ;;  %v2599_v11 = vpop.permute.xlu1 %2598 }
 0x698   : > { %v2607_v17 = vadd.f32 %v2599_v11, %v2561_v35  ;;  %v2639_v22 = vsel %vm2634_vm14, %v2636_v53, %v2638_v59  ;;  %v2583_v9 = vadd.f32 %v2578_v32, %v2537_v62 }
 0x69a   : > { %v2635_v39 = vrot.slane %v2607_v17, 1 }
 0x69b   : > { %v2624_v40 = vpop.permute.xlu0 %2623  ;;  %v2580_v28 = vpop.permute.xlu1 %2579 }
 0x69c   : > { %v2629_v12 = vadd.f32 %v2624_v40, %v2583_v9  ;;  %v2637_v4 = vsel %vm2634_vm14, %v2635_v39, %v2636_v53  ;;  %v2584_v26 = vadd.f32 %v2580_v28, %v2538_v61 }
 0x69e   : > { %v2642_v51 = vadd.f32 %v2637_v4, %v2629_v12 }
 0x69f   : > { %v2626_v27 = vpop.permute.xlu1 %2625 }
 0x6a0   : > { %v2646_v19 = vmul.f32 %v2645_v5, %v2642_v51  ;;  %v2630_v2 = vadd.f32 %v2626_v27, %v2584_v26 }
 0x6a2   : > { %v2650_v21 = vadd.f32 %v2649_v37, %v2646_v19  ;;  %v2643_v7 = vadd.f32 %v2639_v22, %v2630_v2 }
 0x6a4   : > { %v2652_v42 = vmax.f32 %v2650_v21, 0.0  ;;  %v2647_v14 = vmul.f32 %v2645_v5, %v2643_v7 }
 0x6a6   : > { %v2893_v44 = vmul.f32 -1.442695, %v2652_v42  ;;  %v2651_v45 = vadd.f32 %v2649_v37, %v2647_v14 }
 0x6a8   : > { %3009 = vpow2.f32 %v2893_v44  ;;  %v2653_v63 = vmax.f32 %v2651_v45, 0.0 }
 0x6aa   : > { %v2894_v46 = vmul.f32 -1.442695, %v2653_v63 }
 0x6ac   : > { %3011 = vpow2.f32 %v2894_v46 }
 0x6b2   : > { %v3010_v54 = vpop.eup %3009 }
 0x6b3   : > { %v2660_v33 = vadd.f32 1.0, %v3010_v54 }
 0x6b5   : > { %3013 = vrcp.f32 %v2660_v33 }
 0x6b6   : > { %v3012_v58 = vpop.eup %3011 }
 0x6b7   : > { %v2661_v50 = vadd.f32 1.0, %v3012_v58 }
 0x6b9   : > { %3015 = vrcp.f32 %v2661_v50 }
 0x6bf   : > { %v3014_v23 = vpop.eup %3013 }
 0x6c0   : > { %2666 = vst.msk [vmem:[%s269_s17] sm:$0xff] %vm278_vm0, %v3014_v23 }
 0x6c3   : > { %v3016_v30 = vpop.eup %3015 }
 0x6c4   : > { %2667 = vst.msk [vmem:[%s269_s17 + $0x8] sm:$0xff] %vm278_vm0, %v3016_v30 }
 0x6c5   : > { %3096 = shalt.err (!%p3093_p7)
}
 0x6c6   : > { %s3097_s13 = scalar_lea.hbm %s5263_s29, 256  ;;  %s3101_s10 = scalar_lea.hbm %s5315_s5, 512 }
 0x6c7   : > { %p3098_p11 = scmp.ne.s32.totalorder %s5263_s29, %s3097_s13  ;;  %p3102_p6 = scmp.lt.u32.totalorder %s5263_s29, %s5315_s5 }
 0x6c8   : > { %p3103_p9 = scmp.lt.u32.totalorder %s3101_s10, %s3097_s13  ;;  %p3105_p5 = scmp.lt.u32.totalorder %s3097_s13, %s5263_s29 }
 0x6c9   : > { %p3099_p13 = pnand %p3098_p11, %p5653_p2 }
 0x6ca   : > { %p3104_p1 = por %p3103_p9, %p3102_p6 }
 0x6cb   : > { %p3100_p3 = pneg %p3099_p13 }
 0x6cc   : > { %p3106_p8 = por %p3105_p5, %p3104_p1 }
 0x6ce   : > { %p3107_p10 = pnand %p3106_p8, %p3100_p3 }
 0x6d0   : > { %3110 = shalt.err (!%p3107_p10)
}
 0x6d1   : > { %s3175_s17 = smov 128   ;;  %s3176_s9 = smov 8  }
 0x6d2   : > { %2934 = dma.vmem_to_hbm [thread:$0]  (%p5653_p2), %s5265_s26, 256, %s5263_s29, %s2669_s7, %s3175_s17, %s3175_s17, %s3176_s9  }
 0x6d3 PF: > { %s2697_s15 = sand.u32 1, %s3145_s18   ;;  %p5654_p4 = scmp.ne.s32.totalorder %s5370_s6, 0 }
 0x6d4   : > { %p5655_p12 = scmp.ge.s32.totalorder %s3157_s21, 2  ;;  %s2698_s22 = scalar_lea.sflag [#allocation5], %s2697_s15 }
 0x6d6   : > { %p2948_p0 = pnand %p5655_p12, %p5654_p4 }
 0x6d8   : > { %3140 = dma.done.wait (!%p2948_p0), %s2698_s22, 256  }
 0x6d9   : > { %3142 = vsyncadd (!%p2948_p0), %s2698_s22, 4294967040  ;;  %p20_p7 = scmp.ge.s32.totalorder %s3232_s24, 4   ;;  %s5656_s18 = smov %s3149_s19 }
 0x6da   : > { %s5657_s19 = smov %s3153_s20  ;;  %s5658_s20 = smov %s3244_s27 }
 0x6db   : > { %s5659_s21 = smov %s3232_s24  ;;  %22 = sbr.rel (!%p20_p7) target bundleno = 7 (0x7), region = 95 }
 0x6e2   :  { %2703 = vsyncpa [#allocation4], 1 }
 0x6e3   :  { %2705 = vsyncpa [#allocation4 + $0x1], 1 }
 0x6e4   :  { %2706 = vsyncpa [#allocation5], 1 }
 0x6e5   :  { %2708 = vsyncpa [#allocation5 + $0x1], 1 }
 0x6e6   :  { %2709 = vsyncpa [#allocation6], 1 }
 0x6e7   :  { %2711 = vsyncpa [#allocation6 + $0x1], 1 }
 0x6e8   :  { %2712 = vsyncpa [#allocation9], 1 }

</bundles_post_ra>
